<compile_context>
chip_gen: v5e
topology: v5e:2x2
jax: 0.10.0
libtpu: 0.0.40
codegen_flags: <defaults>
</compile_context>

<pallas_src>
import functools
import math

import jax
import jax.numpy as jnp
from jax import lax
from jax.experimental import pallas as pl
from jax.experimental.pallas import tpu as pltpu

F32 = jnp.float32
BF16 = jnp.bfloat16
OUT_PAD = 128                      # lane-dense padded width of the final store
_VMEM = pl.BlockSpec(memory_space=pltpu.MemorySpace.VMEM)


def _round_up(n, m):
    return ((n + m - 1) // m) * m


def _we_layout(E, F):
    """Column layout of the (E, *) bf16 weight slab. Every segment starts at a
    128-lane-aligned column so static slices need no lane rotation."""
    pad3e = _round_up(3 * E, 128)      # in_proj segment width
    pade = _round_up(E, 128)           # out_proj segment width
    padf = _round_up(F, 128)           # ff1 segment width
    stride = pad3e + pade + padf       # per-layer column stride
    return pad3e, pade, padf, stride


# ----------------------------------------------------------------------------
# In-kernel helpers
# ----------------------------------------------------------------------------
def _layer_norm(y, w, b, eps=1e-5):
    mu = jnp.mean(y, axis=-1, keepdims=True)
    var = jnp.mean((y - mu) ** 2, axis=-1, keepdims=True)
    return (y - mu) * lax.rsqrt(var + eps) * w + b


# ----------------------------------------------------------------------------
# Fused forward kernel: x -> embedding -> L encoder layers -> fc_out (padded)
# ----------------------------------------------------------------------------
def _fused_forward_kernel(num_heads, num_layers, E, F,
                          x_ref, emb_w_ref, we_ref, wf_ref, bias_ref, o_ref):
    H = num_heads
    hd = E // H
    pad3e, pade, _, stride = _we_layout(E, F)

    # ---- embedding: (S, input_dim) @ (input_dim, E) + b ---------------------
    h = jnp.dot(x_ref[...].astype(BF16), emb_w_ref[...],
                preferred_element_type=jnp.float32) + bias_ref[0:1, :E]

    for l in range(num_layers):                        # num_layers is static
        c = l * stride
        rb = 2 + 8 * l
        in_w = we_ref[:, c:c + 3 * E]                  # (E, 3E)   bf16
        out_w = we_ref[:, c + pad3e:c + pad3e + E]     # (E, E)    bf16
        ff1_w = we_ref[:, c + pad3e + pade:c + pad3e + pade + F]   # (E, F) bf16
        ff2_w = wf_ref[l * F:(l + 1) * F, :]           # (F, E)    bf16
        in_b = bias_ref[rb + 0:rb + 1, :3 * E]
        out_b = bias_ref[rb + 1:rb + 2, :E]
        ln1_w = bias_ref[rb + 2:rb + 3, :E]
        ln1_b = bias_ref[rb + 3:rb + 4, :E]
        ln2_w = bias_ref[rb + 4:rb + 5, :E]
        ln2_b = bias_ref[rb + 5:rb + 6, :E]
        ff1_b = bias_ref[rb + 6:rb + 7, :F]
        ff2_b = bias_ref[rb + 7:rb + 8, :E]

        # ---- Multi-head self-attention, batched over heads -----------------
        # 1/sqrt(hd) is pre-folded into the q rows of in_w / in_b.
        qkv = jnp.dot(h.astype(BF16), in_w,
                      preferred_element_type=jnp.float32) + in_b      # (S, 3E) f32
        q3 = jnp.stack([qkv[:, i * hd:(i + 1) * hd]
                        for i in range(H)], axis=0).astype(BF16)       # (H, S, hd)
        k3 = jnp.stack([qkv[:, E + i * hd:E + (i + 1) * hd]
                        for i in range(H)], axis=0).astype(BF16)       # (H, S, hd)
        v3 = jnp.stack([qkv[:, 2 * E + i * hd:2 * E + (i + 1) * hd]
                        for i in range(H)], axis=0).astype(BF16)       # (H, S, hd)

        s = jnp.einsum('hqd,hkd->hqk', q3, k3,
                       preferred_element_type=jnp.float32)             # (H, S, S)
        s = s - jnp.max(s, axis=-1, keepdims=True)
        p = jnp.exp(s)
        p = p * pl.reciprocal(jnp.sum(p, axis=-1, keepdims=True), approx=True)
        o3 = jnp.einsum('hqk,hkd->hqd', p.astype(BF16), v3,
                        preferred_element_type=jnp.float32)            # (H, S, hd)
        attn = jnp.concatenate([o3[i] for i in range(H)], axis=-1)     # (S, E) f32
        attn = jnp.dot(attn.astype(BF16), out_w,
                       preferred_element_type=jnp.float32) + out_b     # (S, E)

        # ---- Add & Norm 1 ---------------------------------------------------
        y = _layer_norm(h + attn, ln1_w, ln1_b)

        # ---- Feed-forward (Linear -> ReLU -> Linear) -------------------------
        h1 = jnp.dot(y.astype(BF16), ff1_w,
                     preferred_element_type=jnp.float32) + ff1_b       # (S, F) f32
        h1 = jnp.maximum(h1, 0.0).astype(BF16)                         # bf16 once
        ff = jnp.dot(h1, ff2_w,
                     preferred_element_type=jnp.float32) + ff2_b       # (S, E)

        # ---- Add & Norm 2 ---------------------------------------------------
        h = _layer_norm(y + ff, ln2_w, ln2_b)

    # ---- dropout (eval): identity.  mean over size-1 batch axis: identity. --
    # ---- fc_out: lane-dense padded store -------------------------------------
    fc_w = we_ref[:, num_layers * stride:num_layers * stride + OUT_PAD]
    fc_b = bias_ref[1:2, :OUT_PAD]
    o_ref[...] = jnp.dot(h.astype(BF16), fc_w,
                         preferred_element_type=jnp.float32) + fc_b


# ----------------------------------------------------------------------------
# Wrapper: single pallas_call, 5 packed operands, everything resident in VMEM
# ----------------------------------------------------------------------------
def oil_content_predictor_forward(x, params, num_heads):
    """x: (B, input_dim) float32 -> (B, output_dim) float32."""
    S = x.shape[0]
    E = params["model_dim"]
    F = params["dim_feedforward"]
    L = params["num_layers"]
    output_dim = params["output_dim"]

    kernel = functools.partial(_fused_forward_kernel, num_heads, L, E, F)
    out_padded = pl.pallas_call(
        kernel,
        out_shape=jax.ShapeDtypeStruct((S, OUT_PAD), F32),
        in_specs=[_VMEM] * 5,
        out_specs=_VMEM,
    )(x, params["emb_w"], params["we"], params["wf"], params["biases"])
    return out_padded[:, :output_dim]


# ----------------------------------------------------------------------------
# Deterministic parameter initialization (PyTorch-Linear-style uniform bounds),
# stored directly in the packed kernel layout:
#   * matmul weights pre-transposed to (in, out), bf16, packed into two slabs
#   * 1/sqrt(head_dim) folded into the q rows of in_proj
#   * biases / layernorm params kept f32 as rows of one slab
#   * fc_out weight/bias zero-padded to OUT_PAD lanes
# ----------------------------------------------------------------------------
def _init_linear(key, out_dim, in_dim):
    kw, kb = jax.random.split(key)
    bound = 1.0 / math.sqrt(in_dim)
    w = jax.random.uniform(kw, (out_dim, in_dim), F32, -bound, bound)  # torch (out, in)
    b = jax.random.uniform(kb, (out_dim,), F32, -bound, bound)
    return w, b


def init_params(key, input_dim, model_dim, num_heads, num_layers, output_dim,
                dim_feedforward=2048):
    assert model_dim % num_heads == 0, "model_dim must be divisible by num_heads"
    E, F = model_dim, dim_feedforward
    hd = E // num_heads
    scale = 1.0 / math.sqrt(hd)

    pad3e, pade, _, stride = _we_layout(E, F)
    total_cols = num_layers * stride + OUT_PAD
    bcols = _round_up(max(3 * E, F, OUT_PAD), 128)

    we = jnp.zeros((E, total_cols), F32)
    wf = jnp.zeros((num_layers * F, E), F32)
    biases = jnp.zeros((2 + 8 * num_layers, bcols), F32)

    keys = jax.random.split(key, 3 + num_layers)

    # embedding
    emb_w, emb_b = _init_linear(keys[0], E, input_dim)
    emb_w_k = emb_w.T.astype(BF16)                     # (input_dim, E)
    biases = biases.at[0, :E].set(emb_b)

    # fc_out (zero-padded to OUT_PAD lanes)
    fc_w, fc_b = _init_linear(keys[1], output_dim, E)
    c_fc = num_layers * stride
    we = we.at[:, c_fc:c_fc + output_dim].set(fc_w.T)
    biases = biases.at[1, :output_dim].set(fc_b)

    for l in range(num_layers):
        lk = jax.random.split(keys[2 + l], 4)
        in_w, in_b = _init_linear(lk[0], 3 * E, E)
        out_w, out_b = _init_linear(lk[1], E, E)
        ff1_w, ff1_b = _init_linear(lk[2], F, E)
        ff2_w, ff2_b = _init_linear(lk[3], E, F)

        # fold the attention scale into the q rows of the in-projection
        in_w = in_w.at[:E, :].multiply(scale)
        in_b = in_b.at[:E].multiply(scale)

        c = l * stride
        we = we.at[:, c:c + 3 * E].set(in_w.T)
        we = we.at[:, c + pad3e:c + pad3e + E].set(out_w.T)
        we = we.at[:, c + pad3e + pade:c + pad3e + pade + F].set(ff1_w.T)
        wf = wf.at[l * F:(l + 1) * F, :].set(ff2_w.T)

        rb = 2 + 8 * l
        biases = biases.at[rb + 0, :3 * E].set(in_b)
        biases = biases.at[rb + 1, :E].set(out_b)
        biases = biases.at[rb + 2, :E].set(jnp.ones((E,), F32))   # ln1 weight
        # rb+3: ln1 bias = 0 (already zero)
        biases = biases.at[rb + 4, :E].set(jnp.ones((E,), F32))   # ln2 weight
        # rb+5: ln2 bias = 0 (already zero)
        biases = biases.at[rb + 6, :F].set(ff1_b)
        biases = biases.at[rb + 7, :E].set(ff2_b)

    params = dict(
        emb_w=emb_w_k,
        we=we.astype(BF16),
        wf=wf.astype(BF16),
        biases=biases,
        model_dim=E, dim_feedforward=F, num_layers=num_layers,
        output_dim=output_dim,
    )
    return params, keys[-1]


# ----------------------------------------------------------------------------
if __name__ == "__main__":
    # Small shapes consistent with the module's forward:
    #   x: (batch=8, input_dim=16); model_dim=32, 4 heads, 2 layers, output_dim=1
    B = 8
    input_dim, model_dim, num_heads, num_layers, output_dim = 16, 32, 4, 2, 1

    key = jax.random.PRNGKey(0)
    params, key = init_params(key, input_dim, model_dim, num_heads, num_layers,
                              output_dim)
    x = jax.random.normal(key, (B, input_dim), dtype=F32)

    out = oil_content_predictor_forward(x, params, num_heads)
    out = jax.block_until_ready(out)

    assert out.shape == (B, output_dim), out.shape
    assert bool(jnp.all(jnp.isfinite(out)))
    print("KERNEL_OK")
</pallas_src>

<mosaic_0001>
module attributes {stable_mosaic.version = 11 : i64} {
  func.func @_fused_forward_kernel(%arg0: memref<8x16xf32, #tpu.memory_space<vmem>>, %arg1: memref<16x32xbf16, #tpu.memory_space<vmem>>, %arg2: memref<32x4736xbf16, #tpu.memory_space<vmem>>, %arg3: memref<4096x32xbf16, #tpu.memory_space<vmem>>, %arg4: memref<18x2048xf32, #tpu.memory_space<vmem>>, %arg5: memref<8x128xf32, #tpu.memory_space<vmem>>) attributes {dimension_semantics = [], scalar_prefetch = 0 : i64, scratch_operands = 0 : i64, tpu.core_type = #tpu.core_type<tc>} {
    %c0 = arith.constant 0 : index
    %c0_0 = arith.constant 0 : index
    %0 = vector.load %arg0[%c0, %c0_0] : memref<8x16xf32, #tpu.memory_space<vmem>>, vector<8x16xf32>
    %1 = arith.truncf %0 : vector<8x16xf32> to vector<8x16xbf16>
    %c0_1 = arith.constant 0 : index
    %c0_2 = arith.constant 0 : index
    %2 = vector.load %arg1[%c0_1, %c0_2] : memref<16x32xbf16, #tpu.memory_space<vmem>>, vector<16x32xbf16>
    %cst = arith.constant dense<0.000000e+00> : vector<8x32xf32>
    %3 = tpu.matmul %1, %2, %cst {dimension_numbers = #tpu.dot_dimension_numbers<[1], [0], [0], [1], [0, 0, 1, 1], [], []>} : vector<8x16xbf16>, vector<16x32xbf16>, vector<8x32xf32> -> vector<8x32xf32>
    %c0_3 = arith.constant 0 : index
    %c0_4 = arith.constant 0 : index
    %4 = vector.load %arg4[%c0_3, %c0_4] : memref<18x2048xf32, #tpu.memory_space<vmem>>, vector<1x32xf32>
    %5 = vector.broadcast %4 : vector<1x32xf32> to vector<8x32xf32>
    %6 = arith.addf %3, %5 : vector<8x32xf32>
    %c0_5 = arith.constant 0 : index
    %c0_6 = arith.constant 0 : index
    %7 = vector.load %arg2[%c0_5, %c0_6] : memref<32x4736xbf16, #tpu.memory_space<vmem>>, vector<32x96xbf16>
    %c0_7 = arith.constant 0 : index
    %c128 = arith.constant 128 : index
    %8 = vector.load %arg2[%c0_7, %c128] : memref<32x4736xbf16, #tpu.memory_space<vmem>>, vector<32x32xbf16>
    %c0_8 = arith.constant 0 : index
    %c256 = arith.constant 256 : index
    %9 = vector.load %arg2[%c0_8, %c256] : memref<32x4736xbf16, #tpu.memory_space<vmem>>, vector<32x2048xbf16>
    %c0_9 = arith.constant 0 : index
    %c0_10 = arith.constant 0 : index
    %10 = vector.load %arg3[%c0_9, %c0_10] : memref<4096x32xbf16, #tpu.memory_space<vmem>>, vector<2048x32xbf16>
    %c2 = arith.constant 2 : index
    %c0_11 = arith.constant 0 : index
    %11 = vector.load %arg4[%c2, %c0_11] : memref<18x2048xf32, #tpu.memory_space<vmem>>, vector<1x96xf32>
    %c3 = arith.constant 3 : index
    %c0_12 = arith.constant 0 : index
    %12 = vector.load %arg4[%c3, %c0_12] : memref<18x2048xf32, #tpu.memory_space<vmem>>, vector<1x32xf32>
    %c4 = arith.constant 4 : index
    %c0_13 = arith.constant 0 : index
    %13 = vector.load %arg4[%c4, %c0_13] : memref<18x2048xf32, #tpu.memory_space<vmem>>, vector<1x32xf32>
    %c5 = arith.constant 5 : index
    %c0_14 = arith.constant 0 : index
    %14 = vector.load %arg4[%c5, %c0_14] : memref<18x2048xf32, #tpu.memory_space<vmem>>, vector<1x32xf32>
    %c6 = arith.constant 6 : index
    %c0_15 = arith.constant 0 : index
    %15 = vector.load %arg4[%c6, %c0_15] : memref<18x2048xf32, #tpu.memory_space<vmem>>, vector<1x32xf32>
    %c7 = arith.constant 7 : index
    %c0_16 = arith.constant 0 : index
    %16 = vector.load %arg4[%c7, %c0_16] : memref<18x2048xf32, #tpu.memory_space<vmem>>, vector<1x32xf32>
    %c8 = arith.constant 8 : index
    %c0_17 = arith.constant 0 : index
    %17 = vector.load %arg4[%c8, %c0_17] : memref<18x2048xf32, #tpu.memory_space<vmem>>, vector<1x2048xf32>
    %c9 = arith.constant 9 : index
    %c0_18 = arith.constant 0 : index
    %18 = vector.load %arg4[%c9, %c0_18] : memref<18x2048xf32, #tpu.memory_space<vmem>>, vector<1x32xf32>
    %19 = arith.truncf %6 : vector<8x32xf32> to vector<8x32xbf16>
    %cst_19 = arith.constant dense<0.000000e+00> : vector<8x96xf32>
    %20 = tpu.matmul %19, %7, %cst_19 {dimension_numbers = #tpu.dot_dimension_numbers<[1], [0], [0], [1], [0, 0, 1, 1], [], []>} : vector<8x32xbf16>, vector<32x96xbf16>, vector<8x96xf32> -> vector<8x96xf32>
    %21 = vector.broadcast %11 : vector<1x96xf32> to vector<8x96xf32>
    %22 = arith.addf %20, %21 : vector<8x96xf32>
    %23 = vector.extract_strided_slice %22 {offsets = [0, 0], sizes = [8, 8], strides = [1, 1]} : vector<8x96xf32> to vector<8x8xf32>
    %24 = vector.extract_strided_slice %22 {offsets = [0, 8], sizes = [8, 8], strides = [1, 1]} : vector<8x96xf32> to vector<8x8xf32>
    %25 = vector.extract_strided_slice %22 {offsets = [0, 16], sizes = [8, 8], strides = [1, 1]} : vector<8x96xf32> to vector<8x8xf32>
    %26 = vector.extract_strided_slice %22 {offsets = [0, 24], sizes = [8, 8], strides = [1, 1]} : vector<8x96xf32> to vector<8x8xf32>
    %27 = vector.shape_cast %23 : vector<8x8xf32> to vector<1x8x8xf32>
    %28 = vector.shape_cast %24 : vector<8x8xf32> to vector<1x8x8xf32>
    %29 = vector.shape_cast %25 : vector<8x8xf32> to vector<1x8x8xf32>
    %30 = vector.shape_cast %26 : vector<8x8xf32> to vector<1x8x8xf32>
    %31 = tpu.concatenate %27, %28, %29, %30 in 0 : vector<1x8x8xf32>, vector<1x8x8xf32>, vector<1x8x8xf32>, vector<1x8x8xf32> -> vector<4x8x8xf32>
    %32 = arith.truncf %31 : vector<4x8x8xf32> to vector<4x8x8xbf16>
    %33 = vector.extract_strided_slice %22 {offsets = [0, 32], sizes = [8, 8], strides = [1, 1]} : vector<8x96xf32> to vector<8x8xf32>
    %34 = vector.extract_strided_slice %22 {offsets = [0, 40], sizes = [8, 8], strides = [1, 1]} : vector<8x96xf32> to vector<8x8xf32>
    %35 = vector.extract_strided_slice %22 {offsets = [0, 48], sizes = [8, 8], strides = [1, 1]} : vector<8x96xf32> to vector<8x8xf32>
    %36 = vector.extract_strided_slice %22 {offsets = [0, 56], sizes = [8, 8], strides = [1, 1]} : vector<8x96xf32> to vector<8x8xf32>
    %37 = vector.shape_cast %33 : vector<8x8xf32> to vector<1x8x8xf32>
    %38 = vector.shape_cast %34 : vector<8x8xf32> to vector<1x8x8xf32>
    %39 = vector.shape_cast %35 : vector<8x8xf32> to vector<1x8x8xf32>
    %40 = vector.shape_cast %36 : vector<8x8xf32> to vector<1x8x8xf32>
    %41 = tpu.concatenate %37, %38, %39, %40 in 0 : vector<1x8x8xf32>, vector<1x8x8xf32>, vector<1x8x8xf32>, vector<1x8x8xf32> -> vector<4x8x8xf32>
    %42 = arith.truncf %41 : vector<4x8x8xf32> to vector<4x8x8xbf16>
    %43 = vector.extract_strided_slice %22 {offsets = [0, 64], sizes = [8, 8], strides = [1, 1]} : vector<8x96xf32> to vector<8x8xf32>
    %44 = vector.extract_strided_slice %22 {offsets = [0, 72], sizes = [8, 8], strides = [1, 1]} : vector<8x96xf32> to vector<8x8xf32>
    %45 = vector.extract_strided_slice %22 {offsets = [0, 80], sizes = [8, 8], strides = [1, 1]} : vector<8x96xf32> to vector<8x8xf32>
    %46 = vector.extract_strided_slice %22 {offsets = [0, 88], sizes = [8, 8], strides = [1, 1]} : vector<8x96xf32> to vector<8x8xf32>
    %47 = vector.shape_cast %43 : vector<8x8xf32> to vector<1x8x8xf32>
    %48 = vector.shape_cast %44 : vector<8x8xf32> to vector<1x8x8xf32>
    %49 = vector.shape_cast %45 : vector<8x8xf32> to vector<1x8x8xf32>
    %50 = vector.shape_cast %46 : vector<8x8xf32> to vector<1x8x8xf32>
    %51 = tpu.concatenate %47, %48, %49, %50 in 0 : vector<1x8x8xf32>, vector<1x8x8xf32>, vector<1x8x8xf32>, vector<1x8x8xf32> -> vector<4x8x8xf32>
    %52 = arith.truncf %51 : vector<4x8x8xf32> to vector<4x8x8xbf16>
    "tpu.trace_start"() <{level = 10 : i32, message = "hqd,hkd->hqk"}> : () -> ()
    %cst_20 = arith.constant dense<0.000000e+00> : vector<4x8x8xf32>
    %53 = tpu.matmul %32, %42, %cst_20 {dimension_numbers = #tpu.dot_dimension_numbers<[2], [2], [1], [1], [0, 0, 0, 1, 1, 1], [0], [0]>} : vector<4x8x8xbf16>, vector<4x8x8xbf16>, vector<4x8x8xf32> -> vector<4x8x8xf32>
    "tpu.trace_stop"() : () -> ()
    %cst_21 = arith.constant dense<0xFF800000> : vector<4x8xf32>
    %54 = vector.multi_reduction <maximumf>, %53, %cst_21 [2] : vector<4x8x8xf32> to vector<4x8xf32>
    %55 = vector.shape_cast %54 : vector<4x8xf32> to vector<4x8x1xf32>
    %56 = vector.broadcast %55 : vector<4x8x1xf32> to vector<4x8x8xf32>
    %57 = arith.subf %53, %56 : vector<4x8x8xf32>
    %58 = math.exp %57 : vector<4x8x8xf32>
    %cst_22 = arith.constant dense<0.000000e+00> : vector<4x8xf32>
    %59 = vector.multi_reduction <add>, %58, %cst_22 [2] : vector<4x8x8xf32> to vector<4x8xf32>
    %60 = vector.shape_cast %59 : vector<4x8xf32> to vector<4x8x1xf32>
    %61 = tpu.reciprocal %60 {approx = true} : vector<4x8x1xf32> -> vector<4x8x1xf32>
    %62 = vector.broadcast %61 : vector<4x8x1xf32> to vector<4x8x8xf32>
    %63 = arith.mulf %58, %62 : vector<4x8x8xf32>
    %64 = arith.truncf %63 : vector<4x8x8xf32> to vector<4x8x8xbf16>
    "tpu.trace_start"() <{level = 10 : i32, message = "hqk,hkd->hqd"}> : () -> ()
    %cst_23 = arith.constant dense<0.000000e+00> : vector<4x8x8xf32>
    %65 = tpu.matmul %64, %52, %cst_23 {dimension_numbers = #tpu.dot_dimension_numbers<[2], [1], [1], [2], [0, 0, 0, 1, 1, 2], [0], [0]>} : vector<4x8x8xbf16>, vector<4x8x8xbf16>, vector<4x8x8xf32> -> vector<4x8x8xf32>
    "tpu.trace_stop"() : () -> ()
    %66 = vector.extract_strided_slice %65 {offsets = [0, 0, 0], sizes = [1, 8, 8], strides = [1, 1, 1]} : vector<4x8x8xf32> to vector<1x8x8xf32>
    %67 = vector.shape_cast %66 : vector<1x8x8xf32> to vector<8x8xf32>
    %68 = vector.extract_strided_slice %65 {offsets = [1, 0, 0], sizes = [1, 8, 8], strides = [1, 1, 1]} : vector<4x8x8xf32> to vector<1x8x8xf32>
    %69 = vector.shape_cast %68 : vector<1x8x8xf32> to vector<8x8xf32>
    %70 = vector.extract_strided_slice %65 {offsets = [2, 0, 0], sizes = [1, 8, 8], strides = [1, 1, 1]} : vector<4x8x8xf32> to vector<1x8x8xf32>
    %71 = vector.shape_cast %70 : vector<1x8x8xf32> to vector<8x8xf32>
    %72 = vector.extract_strided_slice %65 {offsets = [3, 0, 0], sizes = [1, 8, 8], strides = [1, 1, 1]} : vector<4x8x8xf32> to vector<1x8x8xf32>
    %73 = vector.shape_cast %72 : vector<1x8x8xf32> to vector<8x8xf32>
    %74 = tpu.concatenate %67, %69, %71, %73 in 1 : vector<8x8xf32>, vector<8x8xf32>, vector<8x8xf32>, vector<8x8xf32> -> vector<8x32xf32>
    %75 = arith.truncf %74 : vector<8x32xf32> to vector<8x32xbf16>
    %cst_24 = arith.constant dense<0.000000e+00> : vector<8x32xf32>
    %76 = tpu.matmul %75, %8, %cst_24 {dimension_numbers = #tpu.dot_dimension_numbers<[1], [0], [0], [1], [0, 0, 1, 1], [], []>} : vector<8x32xbf16>, vector<32x32xbf16>, vector<8x32xf32> -> vector<8x32xf32>
    %77 = vector.broadcast %12 : vector<1x32xf32> to vector<8x32xf32>
    %78 = arith.addf %76, %77 : vector<8x32xf32>
    %79 = arith.addf %6, %78 : vector<8x32xf32>
    %cst_25 = arith.constant dense<0.000000e+00> : vector<8xf32>
    %80 = vector.multi_reduction <add>, %79, %cst_25 [1] : vector<8x32xf32> to vector<8xf32>
    %81 = vector.shape_cast %80 : vector<8xf32> to vector<8x1xf32>
    %cst_26 = arith.constant 3.200000e+01 : f32
    %82 = vector.broadcast %cst_26 : f32 to vector<8x1xf32>
    %83 = arith.divf %81, %82 : vector<8x1xf32>
    %84 = vector.broadcast %83 : vector<8x1xf32> to vector<8x32xf32>
    %85 = arith.subf %79, %84 : vector<8x32xf32>
    %86 = arith.mulf %85, %85 : vector<8x32xf32>
    %cst_27 = arith.constant dense<0.000000e+00> : vector<8xf32>
    %87 = vector.multi_reduction <add>, %86, %cst_27 [1] : vector<8x32xf32> to vector<8xf32>
    %88 = vector.shape_cast %87 : vector<8xf32> to vector<8x1xf32>
    %cst_28 = arith.constant 3.200000e+01 : f32
    %89 = vector.broadcast %cst_28 : f32 to vector<8x1xf32>
    %90 = arith.divf %88, %89 : vector<8x1xf32>
    %91 = vector.broadcast %83 : vector<8x1xf32> to vector<8x32xf32>
    %92 = arith.subf %79, %91 : vector<8x32xf32>
    %cst_29 = arith.constant 9.99999974E-6 : f32
    %93 = vector.broadcast %cst_29 : f32 to vector<8x1xf32>
    %94 = arith.addf %90, %93 : vector<8x1xf32>
    %95 = math.rsqrt %94 : vector<8x1xf32>
    %96 = vector.broadcast %95 : vector<8x1xf32> to vector<8x32xf32>
    %97 = arith.mulf %92, %96 : vector<8x32xf32>
    %98 = vector.broadcast %13 : vector<1x32xf32> to vector<8x32xf32>
    %99 = arith.mulf %97, %98 : vector<8x32xf32>
    %100 = vector.broadcast %14 : vector<1x32xf32> to vector<8x32xf32>
    %101 = arith.addf %99, %100 : vector<8x32xf32>
    %102 = arith.truncf %101 : vector<8x32xf32> to vector<8x32xbf16>
    %cst_30 = arith.constant dense<0.000000e+00> : vector<8x2048xf32>
    %103 = tpu.matmul %102, %9, %cst_30 {dimension_numbers = #tpu.dot_dimension_numbers<[1], [0], [0], [1], [0, 0, 1, 1], [], []>} : vector<8x32xbf16>, vector<32x2048xbf16>, vector<8x2048xf32> -> vector<8x2048xf32>
    %104 = vector.broadcast %17 : vector<1x2048xf32> to vector<8x2048xf32>
    %105 = arith.addf %103, %104 : vector<8x2048xf32>
    %cst_31 = arith.constant 0.000000e+00 : f32
    %106 = vector.broadcast %cst_31 : f32 to vector<8x2048xf32>
    %107 = arith.maximumf %105, %106 : vector<8x2048xf32>
    %108 = arith.truncf %107 : vector<8x2048xf32> to vector<8x2048xbf16>
    %cst_32 = arith.constant dense<0.000000e+00> : vector<8x32xf32>
    %109 = tpu.matmul %108, %10, %cst_32 {dimension_numbers = #tpu.dot_dimension_numbers<[1], [0], [0], [1], [0, 0, 1, 1], [], []>} : vector<8x2048xbf16>, vector<2048x32xbf16>, vector<8x32xf32> -> vector<8x32xf32>
    %110 = vector.broadcast %18 : vector<1x32xf32> to vector<8x32xf32>
    %111 = arith.addf %109, %110 : vector<8x32xf32>
    %112 = arith.addf %101, %111 : vector<8x32xf32>
    %cst_33 = arith.constant dense<0.000000e+00> : vector<8xf32>
    %113 = vector.multi_reduction <add>, %112, %cst_33 [1] : vector<8x32xf32> to vector<8xf32>
    %114 = vector.shape_cast %113 : vector<8xf32> to vector<8x1xf32>
    %cst_34 = arith.constant 3.200000e+01 : f32
    %115 = vector.broadcast %cst_34 : f32 to vector<8x1xf32>
    %116 = arith.divf %114, %115 : vector<8x1xf32>
    %117 = vector.broadcast %116 : vector<8x1xf32> to vector<8x32xf32>
    %118 = arith.subf %112, %117 : vector<8x32xf32>
    %119 = arith.mulf %118, %118 : vector<8x32xf32>
    %cst_35 = arith.constant dense<0.000000e+00> : vector<8xf32>
    %120 = vector.multi_reduction <add>, %119, %cst_35 [1] : vector<8x32xf32> to vector<8xf32>
    %121 = vector.shape_cast %120 : vector<8xf32> to vector<8x1xf32>
    %cst_36 = arith.constant 3.200000e+01 : f32
    %122 = vector.broadcast %cst_36 : f32 to vector<8x1xf32>
    %123 = arith.divf %121, %122 : vector<8x1xf32>
    %124 = vector.broadcast %116 : vector<8x1xf32> to vector<8x32xf32>
    %125 = arith.subf %112, %124 : vector<8x32xf32>
    %cst_37 = arith.constant 9.99999974E-6 : f32
    %126 = vector.broadcast %cst_37 : f32 to vector<8x1xf32>
    %127 = arith.addf %123, %126 : vector<8x1xf32>
    %128 = math.rsqrt %127 : vector<8x1xf32>
    %129 = vector.broadcast %128 : vector<8x1xf32> to vector<8x32xf32>
    %130 = arith.mulf %125, %129 : vector<8x32xf32>
    %131 = vector.broadcast %15 : vector<1x32xf32> to vector<8x32xf32>
    %132 = arith.mulf %130, %131 : vector<8x32xf32>
    %133 = vector.broadcast %16 : vector<1x32xf32> to vector<8x32xf32>
    %134 = arith.addf %132, %133 : vector<8x32xf32>
    %c0_38 = arith.constant 0 : index
    %c2304 = arith.constant 2304 : index
    %135 = vector.load %arg2[%c0_38, %c2304] : memref<32x4736xbf16, #tpu.memory_space<vmem>>, vector<32x96xbf16>
    %c0_39 = arith.constant 0 : index
    %c2432 = arith.constant 2432 : index
    %136 = vector.load %arg2[%c0_39, %c2432] : memref<32x4736xbf16, #tpu.memory_space<vmem>>, vector<32x32xbf16>
    %c0_40 = arith.constant 0 : index
    %c2560 = arith.constant 2560 : index
    %137 = vector.load %arg2[%c0_40, %c2560] : memref<32x4736xbf16, #tpu.memory_space<vmem>>, vector<32x2048xbf16>
    %c2048 = arith.constant 2048 : index
    %c0_41 = arith.constant 0 : index
    %138 = vector.load %arg3[%c2048, %c0_41] : memref<4096x32xbf16, #tpu.memory_space<vmem>>, vector<2048x32xbf16>
    %c10 = arith.constant 10 : index
    %c0_42 = arith.constant 0 : index
    %139 = vector.load %arg4[%c10, %c0_42] : memref<18x2048xf32, #tpu.memory_space<vmem>>, vector<1x96xf32>
    %c11 = arith.constant 11 : index
    %c0_43 = arith.constant 0 : index
    %140 = vector.load %arg4[%c11, %c0_43] : memref<18x2048xf32, #tpu.memory_space<vmem>>, vector<1x32xf32>
    %c12 = arith.constant 12 : index
    %c0_44 = arith.constant 0 : index
    %141 = vector.load %arg4[%c12, %c0_44] : memref<18x2048xf32, #tpu.memory_space<vmem>>, vector<1x32xf32>
    %c13 = arith.constant 13 : index
    %c0_45 = arith.constant 0 : index
    %142 = vector.load %arg4[%c13, %c0_45] : memref<18x2048xf32, #tpu.memory_space<vmem>>, vector<1x32xf32>
    %c14 = arith.constant 14 : index
    %c0_46 = arith.constant 0 : index
    %143 = vector.load %arg4[%c14, %c0_46] : memref<18x2048xf32, #tpu.memory_space<vmem>>, vector<1x32xf32>
    %c15 = arith.constant 15 : index
    %c0_47 = arith.constant 0 : index
    %144 = vector.load %arg4[%c15, %c0_47] : memref<18x2048xf32, #tpu.memory_space<vmem>>, vector<1x32xf32>
    %c16 = arith.constant 16 : index
    %c0_48 = arith.constant 0 : index
    %145 = vector.load %arg4[%c16, %c0_48] : memref<18x2048xf32, #tpu.memory_space<vmem>>, vector<1x2048xf32>
    %c17 = arith.constant 17 : index
    %c0_49 = arith.constant 0 : index
    %146 = vector.load %arg4[%c17, %c0_49] : memref<18x2048xf32, #tpu.memory_space<vmem>>, vector<1x32xf32>
    %147 = arith.truncf %134 : vector<8x32xf32> to vector<8x32xbf16>
    %cst_50 = arith.constant dense<0.000000e+00> : vector<8x96xf32>
    %148 = tpu.matmul %147, %135, %cst_50 {dimension_numbers = #tpu.dot_dimension_numbers<[1], [0], [0], [1], [0, 0, 1, 1], [], []>} : vector<8x32xbf16>, vector<32x96xbf16>, vector<8x96xf32> -> vector<8x96xf32>
    %149 = vector.broadcast %139 : vector<1x96xf32> to vector<8x96xf32>
    %150 = arith.addf %148, %149 : vector<8x96xf32>
    %151 = vector.extract_strided_slice %150 {offsets = [0, 0], sizes = [8, 8], strides = [1, 1]} : vector<8x96xf32> to vector<8x8xf32>
    %152 = vector.extract_strided_slice %150 {offsets = [0, 8], sizes = [8, 8], strides = [1, 1]} : vector<8x96xf32> to vector<8x8xf32>
    %153 = vector.extract_strided_slice %150 {offsets = [0, 16], sizes = [8, 8], strides = [1, 1]} : vector<8x96xf32> to vector<8x8xf32>
    %154 = vector.extract_strided_slice %150 {offsets = [0, 24], sizes = [8, 8], strides = [1, 1]} : vector<8x96xf32> to vector<8x8xf32>
    %155 = vector.shape_cast %151 : vector<8x8xf32> to vector<1x8x8xf32>
    %156 = vector.shape_cast %152 : vector<8x8xf32> to vector<1x8x8xf32>
    %157 = vector.shape_cast %153 : vector<8x8xf32> to vector<1x8x8xf32>
    %158 = vector.shape_cast %154 : vector<8x8xf32> to vector<1x8x8xf32>
    %159 = tpu.concatenate %155, %156, %157, %158 in 0 : vector<1x8x8xf32>, vector<1x8x8xf32>, vector<1x8x8xf32>, vector<1x8x8xf32> -> vector<4x8x8xf32>
    %160 = arith.truncf %159 : vector<4x8x8xf32> to vector<4x8x8xbf16>
    %161 = vector.extract_strided_slice %150 {offsets = [0, 32], sizes = [8, 8], strides = [1, 1]} : vector<8x96xf32> to vector<8x8xf32>
    %162 = vector.extract_strided_slice %150 {offsets = [0, 40], sizes = [8, 8], strides = [1, 1]} : vector<8x96xf32> to vector<8x8xf32>
    %163 = vector.extract_strided_slice %150 {offsets = [0, 48], sizes = [8, 8], strides = [1, 1]} : vector<8x96xf32> to vector<8x8xf32>
    %164 = vector.extract_strided_slice %150 {offsets = [0, 56], sizes = [8, 8], strides = [1, 1]} : vector<8x96xf32> to vector<8x8xf32>
    %165 = vector.shape_cast %161 : vector<8x8xf32> to vector<1x8x8xf32>
    %166 = vector.shape_cast %162 : vector<8x8xf32> to vector<1x8x8xf32>
    %167 = vector.shape_cast %163 : vector<8x8xf32> to vector<1x8x8xf32>
    %168 = vector.shape_cast %164 : vector<8x8xf32> to vector<1x8x8xf32>
    %169 = tpu.concatenate %165, %166, %167, %168 in 0 : vector<1x8x8xf32>, vector<1x8x8xf32>, vector<1x8x8xf32>, vector<1x8x8xf32> -> vector<4x8x8xf32>
    %170 = arith.truncf %169 : vector<4x8x8xf32> to vector<4x8x8xbf16>
    %171 = vector.extract_strided_slice %150 {offsets = [0, 64], sizes = [8, 8], strides = [1, 1]} : vector<8x96xf32> to vector<8x8xf32>
    %172 = vector.extract_strided_slice %150 {offsets = [0, 72], sizes = [8, 8], strides = [1, 1]} : vector<8x96xf32> to vector<8x8xf32>
    %173 = vector.extract_strided_slice %150 {offsets = [0, 80], sizes = [8, 8], strides = [1, 1]} : vector<8x96xf32> to vector<8x8xf32>
    %174 = vector.extract_strided_slice %150 {offsets = [0, 88], sizes = [8, 8], strides = [1, 1]} : vector<8x96xf32> to vector<8x8xf32>
    %175 = vector.shape_cast %171 : vector<8x8xf32> to vector<1x8x8xf32>
    %176 = vector.shape_cast %172 : vector<8x8xf32> to vector<1x8x8xf32>
    %177 = vector.shape_cast %173 : vector<8x8xf32> to vector<1x8x8xf32>
    %178 = vector.shape_cast %174 : vector<8x8xf32> to vector<1x8x8xf32>
    %179 = tpu.concatenate %175, %176, %177, %178 in 0 : vector<1x8x8xf32>, vector<1x8x8xf32>, vector<1x8x8xf32>, vector<1x8x8xf32> -> vector<4x8x8xf32>
    %180 = arith.truncf %179 : vector<4x8x8xf32> to vector<4x8x8xbf16>
    "tpu.trace_start"() <{level = 10 : i32, message = "hqd,hkd->hqk"}> : () -> ()
    %cst_51 = arith.constant dense<0.000000e+00> : vector<4x8x8xf32>
    %181 = tpu.matmul %160, %170, %cst_51 {dimension_numbers = #tpu.dot_dimension_numbers<[2], [2], [1], [1], [0, 0, 0, 1, 1, 1], [0], [0]>} : vector<4x8x8xbf16>, vector<4x8x8xbf16>, vector<4x8x8xf32> -> vector<4x8x8xf32>
    "tpu.trace_stop"() : () -> ()
    %cst_52 = arith.constant dense<0xFF800000> : vector<4x8xf32>
    %182 = vector.multi_reduction <maximumf>, %181, %cst_52 [2] : vector<4x8x8xf32> to vector<4x8xf32>
    %183 = vector.shape_cast %182 : vector<4x8xf32> to vector<4x8x1xf32>
    %184 = vector.broadcast %183 : vector<4x8x1xf32> to vector<4x8x8xf32>
    %185 = arith.subf %181, %184 : vector<4x8x8xf32>
    %186 = math.exp %185 : vector<4x8x8xf32>
    %cst_53 = arith.constant dense<0.000000e+00> : vector<4x8xf32>
    %187 = vector.multi_reduction <add>, %186, %cst_53 [2] : vector<4x8x8xf32> to vector<4x8xf32>
    %188 = vector.shape_cast %187 : vector<4x8xf32> to vector<4x8x1xf32>
    %189 = tpu.reciprocal %188 {approx = true} : vector<4x8x1xf32> -> vector<4x8x1xf32>
    %190 = vector.broadcast %189 : vector<4x8x1xf32> to vector<4x8x8xf32>
    %191 = arith.mulf %186, %190 : vector<4x8x8xf32>
    %192 = arith.truncf %191 : vector<4x8x8xf32> to vector<4x8x8xbf16>
    "tpu.trace_start"() <{level = 10 : i32, message = "hqk,hkd->hqd"}> : () -> ()
    %cst_54 = arith.constant dense<0.000000e+00> : vector<4x8x8xf32>
    %193 = tpu.matmul %192, %180, %cst_54 {dimension_numbers = #tpu.dot_dimension_numbers<[2], [1], [1], [2], [0, 0, 0, 1, 1, 2], [0], [0]>} : vector<4x8x8xbf16>, vector<4x8x8xbf16>, vector<4x8x8xf32> -> vector<4x8x8xf32>
    "tpu.trace_stop"() : () -> ()
    %194 = vector.extract_strided_slice %193 {offsets = [0, 0, 0], sizes = [1, 8, 8], strides = [1, 1, 1]} : vector<4x8x8xf32> to vector<1x8x8xf32>
    %195 = vector.shape_cast %194 : vector<1x8x8xf32> to vector<8x8xf32>
    %196 = vector.extract_strided_slice %193 {offsets = [1, 0, 0], sizes = [1, 8, 8], strides = [1, 1, 1]} : vector<4x8x8xf32> to vector<1x8x8xf32>
    %197 = vector.shape_cast %196 : vector<1x8x8xf32> to vector<8x8xf32>
    %198 = vector.extract_strided_slice %193 {offsets = [2, 0, 0], sizes = [1, 8, 8], strides = [1, 1, 1]} : vector<4x8x8xf32> to vector<1x8x8xf32>
    %199 = vector.shape_cast %198 : vector<1x8x8xf32> to vector<8x8xf32>
    %200 = vector.extract_strided_slice %193 {offsets = [3, 0, 0], sizes = [1, 8, 8], strides = [1, 1, 1]} : vector<4x8x8xf32> to vector<1x8x8xf32>
    %201 = vector.shape_cast %200 : vector<1x8x8xf32> to vector<8x8xf32>
    %202 = tpu.concatenate %195, %197, %199, %201 in 1 : vector<8x8xf32>, vector<8x8xf32>, vector<8x8xf32>, vector<8x8xf32> -> vector<8x32xf32>
    %203 = arith.truncf %202 : vector<8x32xf32> to vector<8x32xbf16>
    %cst_55 = arith.constant dense<0.000000e+00> : vector<8x32xf32>
    %204 = tpu.matmul %203, %136, %cst_55 {dimension_numbers = #tpu.dot_dimension_numbers<[1], [0], [0], [1], [0, 0, 1, 1], [], []>} : vector<8x32xbf16>, vector<32x32xbf16>, vector<8x32xf32> -> vector<8x32xf32>
    %205 = vector.broadcast %140 : vector<1x32xf32> to vector<8x32xf32>
    %206 = arith.addf %204, %205 : vector<8x32xf32>
    %207 = arith.addf %134, %206 : vector<8x32xf32>
    %cst_56 = arith.constant dense<0.000000e+00> : vector<8xf32>
    %208 = vector.multi_reduction <add>, %207, %cst_56 [1] : vector<8x32xf32> to vector<8xf32>
    %209 = vector.shape_cast %208 : vector<8xf32> to vector<8x1xf32>
    %cst_57 = arith.constant 3.200000e+01 : f32
    %210 = vector.broadcast %cst_57 : f32 to vector<8x1xf32>
    %211 = arith.divf %209, %210 : vector<8x1xf32>
    %212 = vector.broadcast %211 : vector<8x1xf32> to vector<8x32xf32>
    %213 = arith.subf %207, %212 : vector<8x32xf32>
    %214 = arith.mulf %213, %213 : vector<8x32xf32>
    %cst_58 = arith.constant dense<0.000000e+00> : vector<8xf32>
    %215 = vector.multi_reduction <add>, %214, %cst_58 [1] : vector<8x32xf32> to vector<8xf32>
    %216 = vector.shape_cast %215 : vector<8xf32> to vector<8x1xf32>
    %cst_59 = arith.constant 3.200000e+01 : f32
    %217 = vector.broadcast %cst_59 : f32 to vector<8x1xf32>
    %218 = arith.divf %216, %217 : vector<8x1xf32>
    %219 = vector.broadcast %211 : vector<8x1xf32> to vector<8x32xf32>
    %220 = arith.subf %207, %219 : vector<8x32xf32>
    %cst_60 = arith.constant 9.99999974E-6 : f32
    %221 = vector.broadcast %cst_60 : f32 to vector<8x1xf32>
    %222 = arith.addf %218, %221 : vector<8x1xf32>
    %223 = math.rsqrt %222 : vector<8x1xf32>
    %224 = vector.broadcast %223 : vector<8x1xf32> to vector<8x32xf32>
    %225 = arith.mulf %220, %224 : vector<8x32xf32>
    %226 = vector.broadcast %141 : vector<1x32xf32> to vector<8x32xf32>
    %227 = arith.mulf %225, %226 : vector<8x32xf32>
    %228 = vector.broadcast %142 : vector<1x32xf32> to vector<8x32xf32>
    %229 = arith.addf %227, %228 : vector<8x32xf32>
    %230 = arith.truncf %229 : vector<8x32xf32> to vector<8x32xbf16>
    %cst_61 = arith.constant dense<0.000000e+00> : vector<8x2048xf32>
    %231 = tpu.matmul %230, %137, %cst_61 {dimension_numbers = #tpu.dot_dimension_numbers<[1], [0], [0], [1], [0, 0, 1, 1], [], []>} : vector<8x32xbf16>, vector<32x2048xbf16>, vector<8x2048xf32> -> vector<8x2048xf32>
    %232 = vector.broadcast %145 : vector<1x2048xf32> to vector<8x2048xf32>
    %233 = arith.addf %231, %232 : vector<8x2048xf32>
    %cst_62 = arith.constant 0.000000e+00 : f32
    %234 = vector.broadcast %cst_62 : f32 to vector<8x2048xf32>
    %235 = arith.maximumf %233, %234 : vector<8x2048xf32>
    %236 = arith.truncf %235 : vector<8x2048xf32> to vector<8x2048xbf16>
    %cst_63 = arith.constant dense<0.000000e+00> : vector<8x32xf32>
    %237 = tpu.matmul %236, %138, %cst_63 {dimension_numbers = #tpu.dot_dimension_numbers<[1], [0], [0], [1], [0, 0, 1, 1], [], []>} : vector<8x2048xbf16>, vector<2048x32xbf16>, vector<8x32xf32> -> vector<8x32xf32>
    %238 = vector.broadcast %146 : vector<1x32xf32> to vector<8x32xf32>
    %239 = arith.addf %237, %238 : vector<8x32xf32>
    %240 = arith.addf %229, %239 : vector<8x32xf32>
    %cst_64 = arith.constant dense<0.000000e+00> : vector<8xf32>
    %241 = vector.multi_reduction <add>, %240, %cst_64 [1] : vector<8x32xf32> to vector<8xf32>
    %242 = vector.shape_cast %241 : vector<8xf32> to vector<8x1xf32>
    %cst_65 = arith.constant 3.200000e+01 : f32
    %243 = vector.broadcast %cst_65 : f32 to vector<8x1xf32>
    %244 = arith.divf %242, %243 : vector<8x1xf32>
    %245 = vector.broadcast %244 : vector<8x1xf32> to vector<8x32xf32>
    %246 = arith.subf %240, %245 : vector<8x32xf32>
    %247 = arith.mulf %246, %246 : vector<8x32xf32>
    %cst_66 = arith.constant dense<0.000000e+00> : vector<8xf32>
    %248 = vector.multi_reduction <add>, %247, %cst_66 [1] : vector<8x32xf32> to vector<8xf32>
    %249 = vector.shape_cast %248 : vector<8xf32> to vector<8x1xf32>
    %cst_67 = arith.constant 3.200000e+01 : f32
    %250 = vector.broadcast %cst_67 : f32 to vector<8x1xf32>
    %251 = arith.divf %249, %250 : vector<8x1xf32>
    %252 = vector.broadcast %244 : vector<8x1xf32> to vector<8x32xf32>
    %253 = arith.subf %240, %252 : vector<8x32xf32>
    %cst_68 = arith.constant 9.99999974E-6 : f32
    %254 = vector.broadcast %cst_68 : f32 to vector<8x1xf32>
    %255 = arith.addf %251, %254 : vector<8x1xf32>
    %256 = math.rsqrt %255 : vector<8x1xf32>
    %257 = vector.broadcast %256 : vector<8x1xf32> to vector<8x32xf32>
    %258 = arith.mulf %253, %257 : vector<8x32xf32>
    %259 = vector.broadcast %143 : vector<1x32xf32> to vector<8x32xf32>
    %260 = arith.mulf %258, %259 : vector<8x32xf32>
    %261 = vector.broadcast %144 : vector<1x32xf32> to vector<8x32xf32>
    %262 = arith.addf %260, %261 : vector<8x32xf32>
    %c0_69 = arith.constant 0 : index
    %c4608 = arith.constant 4608 : index
    %263 = vector.load %arg2[%c0_69, %c4608] : memref<32x4736xbf16, #tpu.memory_space<vmem>>, vector<32x128xbf16>
    %c1 = arith.constant 1 : index
    %c0_70 = arith.constant 0 : index
    %264 = vector.load %arg4[%c1, %c0_70] : memref<18x2048xf32, #tpu.memory_space<vmem>>, vector<1x128xf32>
    %265 = arith.truncf %262 : vector<8x32xf32> to vector<8x32xbf16>
    %cst_71 = arith.constant dense<0.000000e+00> : vector<8x128xf32>
    %266 = tpu.matmul %265, %263, %cst_71 {dimension_numbers = #tpu.dot_dimension_numbers<[1], [0], [0], [1], [0, 0, 1, 1], [], []>} : vector<8x32xbf16>, vector<32x128xbf16>, vector<8x128xf32> -> vector<8x128xf32>
    %267 = vector.broadcast %264 : vector<1x128xf32> to vector<8x128xf32>
    %268 = arith.addf %266, %267 : vector<8x128xf32>
    %c0_72 = arith.constant 0 : index
    %c0_73 = arith.constant 0 : index
    %269 = vector.load %arg5[%c0_72, %c0_73] : memref<8x128xf32, #tpu.memory_space<vmem>>, vector<8x128xf32>
    tpu.vector_store %arg5[%c0_72, %c0_73], %268 {strides = array<i32>} : memref<8x128xf32, #tpu.memory_space<vmem>>, vector<8x128xf32>,
    return
  }
}

</mosaic_0001>

<bundles_post_ra>
// kernel: tpu_custom_call.1
= control target key start
LH: loop header
LB: loop body
LE: loop exit
PB: predicated region body
PF: predicated region fallthrough
CT: control target
= control target key end

     0   :  { %s7672_s0 = inlined_call_operand.vmem [shape: f32[8,16], index: 0, kind: input, shape index: {}]   ;;  %s7673_s1 = inlined_call_operand.vmem [shape: bf16[16,32], index: 1, kind: input, shape index: {}]   ;;  %s7674_s2 = inlined_call_operand.vmem [shape: bf16[32,4736], index: 2, kind: input, shape index: {}]   ;;  %s7675_s3 = inlined_call_operand.vmem [shape: bf16[4096,32], index: 3, kind: input, shape index: {}]   ;;  %s7676_s4 = inlined_call_operand.vmem [shape: f32[18,2048], index: 4, kind: input, shape index: {}]   ;;  %s7677_s5 = inlined_call_operand.hbm [shape: f32[8,128], index: 5, kind: output, shape index: {}]  }
   0x1   :  { %v5678_v0 = vld [vmem:[%s7673_s1] sm:$0xff]  ;;  %v4307_v2 = vld [vmem:[%s7674_s2 + $0x128] sm:$0xf]  ;;  %v5680_v4 = vld [vmem:[%s7674_s2 + $0x1b8] sm:$0xf0] }
   0x2   :  { %v22_v1 = vld [vmem:[%s7672_s0] sm:$0xff] }
   0x3   :  { %v23_v3 = vpack.c.bf16 %v22_v1, %v22_v1 }
   0x4   :  { %10 = vsyncpa [#allocation3], 0  ;;  %44 = vmatpush.bf16.msra.mxu0 %v5678_v0  ;;  %vm33_vm0 = vcmask 130048   ;;  %v4308_v5 = vor.u32 %v5680_v4, %v4307_v2  ;;  %v4303_v6 = vld [vmem:[%s7674_s2] sm:$0xf]  ;;  %vm374_vm1 = vcmask 261120  }
   0x5   :  { %v5679_v7 = vld [vmem:[%s7674_s2 + $0x90] sm:$0xf0]  ;;  %v26_v9 = vld [vmem:[%s7676_s4] ss:$0 sm:$0xff]  ;;  %v346_v14 = vld [vmem:[%s7676_s4 + $0x2] ss:$0 sm:$0xff] }
   0x6   :  { %384 = vmatpush.bf16.msra.mxu1 %v4308_v5  ;;  %v4304_v8 = vor.u32 %v5679_v7, %v4303_v6  ;;  %s6087_s7 = smov 104   ;;  %s6088_s8 = smov 120   ;;  %vm410_vm2 = vcmask 64512   ;;  %vm555_vm3 = vcmask 1043456   ;;  %vm649_vm4 = vcmask 195584  }
   0x7   :  { %4296 = vmatmul.msk.bf16.vlgmr.msra.gmra.mxu0 %vm33_vm0, %v23_v3  ;;  %s6089_s9 = smov 112   ;;  %s6090_s10 = smov 96  }
   0x8   :  { %s6091_s11 = smov 64   ;;  %s6092_s12 = smov 16  }
   0x9   :  { %s6093_s13 = smov 8   ;;  %s6094_s14 = smov 24  }
   0xa   :  { %385 = vmatpush.bf16.msra.mxu1 %v4304_v8  ;;  %s6096_s1 = smov [#allocation2]   ;;  %s4283_s28 = sshll.u32 %s7677_s5, 4  ;;  %s4284_s28 = int_to_ptr.hbm [resolvable:$true] %s4283_s28 }
   0xb   :  { %s4281_s26 = sshll.u32 %s6096_s1, 4  ;;  %s4282_s26 = int_to_ptr.vmem [resolvable:$true] %s4281_s26 }
  0x84   :  { %v46_v10 = vpop.f32.mrf.mxu0 }
  0x85   :  { %v6149_v11 = vadd.f32 %v46_v10, %v26_v9 }
  0x87   :  { %v361_v12 = vpack.c.bf16 %v6149_v11, %v6149_v11 }
  0x89   :  { %4309 = vmatmul.msk.bf16.vlgmr.msra.gmra.mxu1 %vm374_vm1, %v361_v12 }
  0x8c   :  { %v48_v13 = vpop.f32.mrf.mxu0 }
 0x106   :  { %v387_v15 = vpop.f32.mrf.mxu1 }
 0x107   :  { %v388_v16 = vadd.f32 %v387_v15, %v346_v14 }
 0x109   :  { %398 = vrot.lane.b32.xlu1 %v388_v16, %s6087_s7  ;;  %392 = vrot.lane.b32.xlu0 %v388_v16, %s6088_s8  ;;  %v401_v18 = vpack.c.bf16 %v388_v16, %v388_v16 }
 0x10b   :  { %v406_v19 = vunpack.c.l.b16 %v401_v18 }
 0x10d   :  { %v6160_v20 = vpack.c.b16 %v406_v19, %v406_v19 }
 0x10e   :  { %v389_v17 = vpop.f32.mrf.mxu1 }
 0x111   :  { %395 = vrot.lane.b32.xlu0 %v388_v16, %s6089_s9 }
 0x119   :  { %408 = vrot.lane.b32.xlu0 %v6160_v20, %s6090_s10 }
 0x17b   :  { %v393_v21 = vpop.permute.xlu0 %392  ;;  %v399_v27 = vpop.permute.xlu1 %398 }
 0x17c   :  { %v402_v22 = vpack.c.bf16 %v393_v21, %v393_v21  ;;  %v404_v29 = vpack.c.bf16 %v399_v27, %v399_v27 }
 0x17e   :  { %v431_v23 = vunpack.c.l.b16 %v402_v22  ;;  %v479_v32 = vunpack.c.l.b16 %v404_v29 }
 0x180   :  { %v6164_v24 = vpack.c.b16 %v431_v23, %v431_v23  ;;  %v480_v34 = vpack.c.b16 %v479_v32, %v479_v32 }
 0x182   :  { %433 = vrot.lane.b32.xlu1 %v6164_v24, %s6090_s10 }
 0x183   :  { %v396_v25 = vpop.permute.xlu0 %395 }
 0x184   :  { %v403_v26 = vpack.c.bf16 %v396_v25, %v396_v25 }
 0x186   :  { %v455_v28 = vunpack.c.l.b16 %v403_v26 }
 0x188   :  { %v456_v30 = vpack.c.b16 %v455_v28, %v455_v28 }
 0x18a   :  { %457 = vrot.lane.b32.xlu2 %v456_v30, %s6090_s10 }
 0x18b   :  { %v409_v31 = vpop.permute.xlu0 %408 }
 0x18c   :  { %v415_v33 = vsel %vm410_vm2, %v409_v31, 0 }
 0x18d   :  { %424 = vmatpush.bf16.xpose.msra.mxu2 %v415_v33 }
 0x192   :  { %481 = vrot.lane.b32.xlu2 %v480_v34, %s6090_s10 }
 0x194   :  { %4310 = vmatmul.msk.bf16.vlgmr.msra.gmra.mxu2 %vm410_vm2, %v401_v18 }
 0x1e4   :  { %v458_v35 = vpop.permute.xlu2 %457 }
 0x1e5   :  { %v463_v36 = vsel %vm410_vm2, %v458_v35, 0 }
 0x1e6   :  { %472 = vmatpush.bf16.xpose.msrb.mxu0 %v463_v36 }
 0x1ec   :  { %v482_v37 = vpop.permute.xlu2 %481 }
 0x1ed   :  { %4312 = vmatmul.msk.bf16.vlgmr.msrb.gmra.mxu0 %vm410_vm2, %v403_v26  ;;  %v487_v38 = vsel %vm410_vm2, %v482_v37, 0 }
 0x1ee   :  { %496 = vmatpush.bf16.xpose.msrb.mxu1 %v487_v38 }
 0x1f4   :  { %v434_v39 = vpop.permute.xlu1 %433 }
 0x1f5   :  { %4313 = vmatmul.msk.bf16.vlgmr.msrb.gmra.mxu1 %vm410_vm2, %v404_v29  ;;  %v439_v40 = vsel %vm410_vm2, %v434_v39, 0 }
 0x1f6   :  { %448 = vmatpush.bf16.xpose.msra.mxu3 %v439_v40 }
 0x1fd   :  { %4311 = vmatmul.msk.bf16.vlgmr.msra.gmra.mxu3 %vm410_vm2, %v402_v22 }
 0x217   :  { %v426_v41 = vpop.f32.mrf.mxu2 }
 0x218   :  { %v502_v48 = vsel %vm410_vm2, %v426_v41, -inf }
 0x21f   :  { %v428_v42 = vpop.f32.mrf.mxu2 }
 0x220   :  { %v4324_v42 = vld [vmem:[%s7674_s2 + $0x12c] sm:$0xf] }
 0x26a   :  { %v474_v43 = vpop.f32.mrf.mxu0 }
 0x26b   :  { %v508_v44 = vsel %vm410_vm2, %v474_v43, -inf }
 0x26c   :  { %509 = vmax.xlane.f32.xlu2 %v508_v44 }
 0x272   :  { %v476_v45 = vpop.f32.mrf.mxu0  ;;  %v498_v46 = vpop.f32.mrf.mxu1 }
 0x273   :  { %v511_v47 = vsel %vm410_vm2, %v498_v46, -inf  ;;  %v4320_v45 = vld [vmem:[%s7674_s2 + $0x4] sm:$0xf] }
 0x274   :  { %512 = vmax.xlane.f32.xlu0 %v511_v47  ;;  %503 = vmax.xlane.f32.xlu2 %v502_v48 }
 0x27a   :  { %v500_v49 = vpop.f32.mrf.mxu1 }
 0x280   :  { %v450_v50 = vpop.f32.mrf.mxu3 }
 0x281   :  { %v505_v51 = vsel %vm410_vm2, %v450_v50, -inf }
 0x282   :  { %506 = vmax.xlane.f32.xlu1 %v505_v51 }
 0x288   :  { %v452_v52 = vpop.f32.mrf.mxu3 }
 0x2df   :  { %v510_v53 = vpop.xlane.xlu2 %509 }
 0x2e0   :  { %v516_v54 = vsub.f32 %v474_v43, %v510_v53  ;;  %v5682_v43 = vld [vmem:[%s7674_s2 + $0x1bc] sm:$0xf0] }
 0x2e1   :  { %v4325_v44 = vor.u32 %v5682_v43, %v4324_v42 }
 0x2e2   :  { %v522_v55 = vmul.f32 1.442695, %v516_v54 }
 0x2e4   :  { %6019 = vpow2.f32 %v522_v55  ;;  %v347_v55 = vld [vmem:[%s7676_s4 + $0x3] ss:$0 sm:$0xff] }
 0x2e7   :  { %v513_v56 = vpop.xlane.xlu0 %512  ;;  %v504_v4 = vpop.xlane.xlu2 %503 }
 0x2e8   :  { %v517_v57 = vsub.f32 %v498_v46, %v513_v56  ;;  %v514_v5 = vsub.f32 %v426_v41, %v504_v4  ;;  %v5681_v46 = vld [vmem:[%s7674_s2 + $0x94] sm:$0xf0] }
 0x2e9   :  { %v4321_v47 = vor.u32 %v5681_v46, %v4320_v45  ;;  %v4419_v45 = vld [vmem:[%s7674_s2 + $0x1dc] sm:$0xf0]  ;;  %v4345_v46 = vld [vmem:[%s7674_s2 + $0x18] sm:$0xf] }
 0x2ea   :  { %v6020_v58 = vpop.eup %6019  ;;  %v524_v59 = vmul.f32 1.442695, %v517_v57  ;;  %v518_v6 = vmul.f32 1.442695, %v514_v5 }
 0x2eb   :  { %v532_v60 = vsel %vm410_vm2, %v6020_v58, 0.0 }
 0x2ec   :  { %533 = vadd.xlane.f32.xlu2 %v532_v60  ;;  %6021 = vpow2.f32 %v524_v59 }
 0x2f2   :  { %v6022_v61 = vpop.eup %6021 }
 0x2f3   :  { %v535_v62 = vsel %vm410_vm2, %v6022_v61, 0.0 }
 0x2f4   :  { %536 = vadd.xlane.f32.xlu0 %v535_v62 }
 0x2f5   :  { %v507_v63 = vpop.xlane.xlu1 %506 }
 0x2f6   :  { %v515_v0 = vsub.f32 %v450_v50, %v507_v63 }
 0x2f8   :  { %v520_v1 = vmul.f32 1.442695, %v515_v0 }
 0x2fa   :  { %6023 = vpow2.f32 %v520_v1 }
 0x2fb   :  { %6025 = vpow2.f32 %v518_v6 }
 0x300   :  { %v6024_v2 = vpop.eup %6023 }
 0x301   :  { %v529_v3 = vsel %vm410_vm2, %v6024_v2, 0.0  ;;  %v6026_v7 = vpop.eup %6025 }
 0x302   :  { %530 = vadd.xlane.f32.xlu1 %v529_v3  ;;  %v526_v8 = vsel %vm410_vm2, %v6026_v7, 0.0 }
 0x304   :  { %593 = vrot.lane.b32.xlu2 %v456_v30, %s6091_s11 }
 0x308   :  { %614 = vrot.lane.b32.xlu0 %v480_v34, %s6091_s11 }
 0x310   :  { %550 = vrot.lane.b32.xlu0 %v6160_v20, %s6091_s11 }
 0x31b   :  { %572 = vrot.lane.b32.xlu1 %v6164_v24, %s6091_s11 }
 0x345   :  { %527 = vadd.xlane.f32.xlu1 %v526_v8  ;;  %v4393_v8 = vld [vmem:[%s7674_s2 + $0x130] sm:$0xf] }
 0x35f   :  { %v534_v9 = vpop.xlane.xlu2 %533 }
 0x360   :  { %6027 = vrcp.f32 %v534_v9  ;;  %v5707_v9 = vld [vmem:[%s7674_s2 + $0x1c0] sm:$0xf0] }
 0x366   :  { %v6028_v10 = vpop.eup %6027 }
 0x367   :  { %v544_v12 = vmul.f32 %v6028_v10, %v6020_v58  ;;  %v594_v13 = vpop.permute.xlu2 %593  ;;  %v537_v16 = vpop.xlane.xlu0 %536  ;;  %v5699_v10 = vld [vmem:[%s7674_s2 + $0x134] sm:$0xf] }
 0x368   :  { %v599_v14 = vsel %vm555_vm3, %v594_v13, 0  ;;  %6029 = vrcp.f32 %v537_v16  ;;  %v4395_v13 = vld [vmem:[%s7674_s2 + $0x1c4] sm:$0xf0] }
 0x369   :  { %v548_v15 = vpack.c.bf16 %v544_v12, %v544_v12  ;;  %608 = vmatpush.bf16.msra.mxu0 %v599_v14  ;;  %v4394_v12 = vor.u32 %v5707_v9, %v4393_v8  ;;  %v4401_v14 = vld [vmem:[%s7674_s2 + $0x138] sm:$0xf]  ;;  %v4398_v16 = vor.u32 %v5699_v10, %v4395_v13  ;;  %v4425_v8 = vld [vmem:[%s7674_s2 + $0x150] sm:$0xf]  ;;  %v5711_v9 = vld [vmem:[%s7674_s2 + $0x1e0] sm:$0xf0] }
 0x36a   :  { %v5703_v10 = vld [vmem:[%s7674_s2 + $0x154] sm:$0xf] }
 0x36c   :  { %4316 = vmatmul.msk.bf16.vlgmr.msra.gmra.mxu0 %vm410_vm2, %v548_v15  ;;  %v5708_v15 = vld [vmem:[%s7674_s2 + $0x1c8] sm:$0xf0] }
 0x36d   :  { %929 = vmatpush.bf16.msrb.mxu0 %v4398_v16  ;;  %v4435_v16 = vld [vmem:[%s7674_s2 + $0x1ec] sm:$0xf0] }
 0x36e   :  { %v6030_v17 = vpop.eup %6029 }
 0x36f   :  { %v545_v18 = vmul.f32 %v6030_v17, %v6022_v61  ;;  %v6095_v61 = vmov 32.0   ;;  %v4402_v17 = vor.u32 %v5708_v15, %v4401_v14  ;;  %v5712_v14 = vld [vmem:[%s7674_s2 + $0x1e8] sm:$0xf0]  ;;  %v5704_v15 = vld [vmem:[%s7674_s2 + $0x15c] sm:$0xf] }
 0x371   :  { %v549_v21 = vpack.c.bf16 %v545_v18, %v545_v18  ;;  %v5700_v18 = vld [vmem:[%s7674_s2 + $0x13c] sm:$0xf] }
 0x375   :  { %v531_v22 = vpop.xlane.xlu1 %530 }
 0x376   :  { %6031 = vrcp.f32 %v531_v22  ;;  %v5691_v22 = vld [vmem:[%s7674_s2 + $0x98] sm:$0xf0] }
 0x37a   :  { %v615_v19 = vpop.permute.xlu0 %614 }
 0x37b   :  { %v620_v20 = vsel %vm555_vm3, %v615_v19, 0  ;;  %v4403_v19 = vld [vmem:[%s7674_s2 + $0x1cc] sm:$0xf0] }
 0x37c   :  { %629 = vmatpush.bf16.msra.mxu1 %v620_v20  ;;  %v6032_v25 = vpop.eup %6031  ;;  %v4406_v20 = vor.u32 %v5700_v18, %v4403_v19  ;;  %v4426_v18 = vor.u32 %v5711_v9, %v4425_v8  ;;  %v5735_v8 = vld [vmem:[%s7675_s3 + $0xa0] sm:$0xff] }
 0x37d   :  { %v543_v26 = vmul.f32 %v6032_v25, %v6024_v2  ;;  %v4331_v25 = vld [vmem:[%s7674_s2 + $0x9c] sm:$0xf0] }
 0x37e   :  { %v5719_v9 = vld [vmem:[%s7675_s3 + $0x20] sm:$0xff] }
 0x37f   :  { %4317 = vmatmul.msk.bf16.vlgmr.msra.gmra.mxu1 %vm410_vm2, %v549_v21  ;;  %v547_v29 = vpack.c.bf16 %v543_v26, %v543_v26  ;;  %v4329_v21 = vld [vmem:[%s7674_s2 + $0x8] sm:$0xf]  ;;  %v4337_v26 = vld [vmem:[%s7674_s2 + $0x10] sm:$0xf] }
 0x380   :  { %942 = vmatpush.bf16.msrb.mxu1 %v4402_v17 }
 0x382   :  { %v551_v23 = vpop.permute.xlu0 %550 }
 0x383   :  { %v557_v24 = vsel %vm555_vm3, %v551_v23, 0  ;;  %v5683_v23 = vld [vmem:[%s7674_s2 + $0xc] sm:$0xf] }
 0x384   :  { %566 = vmatpush.bf16.msrb.mxu2 %v557_v24  ;;  %v4330_v24 = vor.u32 %v5691_v22, %v4329_v21  ;;  %v5695_v21 = vld [vmem:[%s7674_s2 + $0xb8] sm:$0xf0] }
 0x388   :  { %673 = vmatpush.bf16.msra.mxu2 %v4325_v44  ;;  %v5702_v44 = vld [vmem:[%s7674_s2 + $0x14c] sm:$0xf] }
 0x38c   :  { %674 = vmatpush.bf16.msra.mxu2 %v4321_v47 }
 0x38d   :  { %v573_v27 = vpop.permute.xlu1 %572 }
 0x38e   :  { %v578_v28 = vsel %vm555_vm3, %v573_v27, 0  ;;  %v5692_v27 = vld [vmem:[%s7674_s2 + $0xa0] sm:$0xf0] }
 0x38f   :  { %587 = vmatpush.bf16.msrb.mxu3 %v578_v28  ;;  %v4334_v28 = vor.u32 %v5683_v23, %v4331_v25  ;;  %v4438_v23 = vor.u32 %v5704_v15, %v4435_v16  ;;  %v4363_v25 = vld [vmem:[%s7674_s2 + $0xbc] sm:$0xf0]  ;;  %v5742_v15 = vld [vmem:[%s7675_s3 + $0xd8] sm:$0xff]  ;;  %v5725_v16 = vld [vmem:[%s7675_s3 + $0x50] sm:$0xff] }
 0x391   :  { %930 = vmatpush.bf16.msrb.mxu0 %v4334_v28  ;;  %v5688_v28 = vld [vmem:[%s7674_s2 + $0x34] sm:$0xf] }
 0x392   :  { %4315 = vmatmul.msk.bf16.vlgmr.msrb.gmra.mxu3 %vm410_vm2, %v547_v29  ;;  %v4338_v29 = vor.u32 %v5692_v27, %v4337_v26  ;;  %v4369_v26 = vld [vmem:[%s7674_s2 + $0x30] sm:$0xf]  ;;  %v5696_v27 = vld [vmem:[%s7674_s2 + $0xc0] sm:$0xf0] }
 0x393   :  { %916 = vmatpush.bf16.msra.mxu3 %v4394_v12  ;;  %v4433_v12 = vld [vmem:[%s7674_s2 + $0x158] sm:$0xf] }
 0x394   :  { %943 = vmatpush.bf16.msrb.mxu1 %v4338_v29  ;;  %v4434_v22 = vor.u32 %v5712_v14, %v4433_v12  ;;  %v4371_v29 = vld [vmem:[%s7674_s2 + $0xc4] sm:$0xf0]  ;;  %v5734_v12 = vld [vmem:[%s7675_s3 + $0x98] sm:$0xff] }
 0x395   :  { %v5718_v14 = vld [vmem:[%s7675_s3 + $0x18] sm:$0xff] }
 0x397   :  { %917 = vmatpush.bf16.msra.mxu3 %v4330_v24  ;;  %v5687_v24 = vld [vmem:[%s7674_s2 + $0x2c] sm:$0xf] }
 0x3b8   :  { %v528_v30 = vpop.xlane.xlu1 %527 }
 0x3b9   :  { %6033 = vrcp.f32 %v528_v30  ;;  %v5684_v30 = vld [vmem:[%s7674_s2 + $0x14] sm:$0xf] }
 0x3ba   :  { %6035 = vrcp.f32 %v6095_v61 }
 0x3bf   :  { %v6034_v31 = vpop.eup %6033 }
 0x3c0   :  { %v542_v32 = vmul.f32 %v6034_v31, %v6026_v7  ;;  %v6036_v62 = vpop.eup %6035  ;;  %v4339_v31 = vld [vmem:[%s7674_s2 + $0xa4] sm:$0xf0] }
 0x3c1   :  { %v685_v63 = vmul.f32 32.0, %v6036_v62  ;;  %vm689_vm5 = vweird.f32 %v6036_v62 }
 0x3c2   :  { %v546_v33 = vpack.c.bf16 %v542_v32, %v542_v32  ;;  %v4342_v32 = vor.u32 %v5684_v30, %v4339_v31  ;;  %v4366_v31 = vor.u32 %v5687_v24, %v4363_v25  ;;  %v5723_v24 = vld [vmem:[%s7675_s3 + $0x40] sm:$0xff] }
 0x3c3   :  { %v686_v0 = vsub.f32 1.0, %v685_v63  ;;  %v5731_v25 = vld [vmem:[%s7675_s3 + $0x80] sm:$0xff] }
 0x3c4   :  { %4314 = vmatmul.msk.bf16.vlgmr.msrb.gmra.mxu2 %vm410_vm2, %v546_v33 }
 0x3c5   :  { %v687_v1 = vmul.f32 %v6036_v62, %v686_v0  ;;  %955 = vmatpush.bf16.msrb.mxu2 %v4406_v20  ;;  %v4361_v20 = vld [vmem:[%s7674_s2 + $0x28] sm:$0xf] }
 0x3c6   :  { %v4362_v30 = vor.u32 %v5695_v21, %v4361_v20  ;;  %v5724_v20 = vld [vmem:[%s7675_s3 + $0x48] sm:$0xff] }
 0x3c7   :  { %v688_v2 = vadd.f32 %v6036_v62, %v687_v1  ;;  %v5732_v21 = vld [vmem:[%s7675_s3 + $0x88] sm:$0xff] }
 0x3c9   :  { %v6224_v3 = vsel %vm689_vm5, %v6036_v62, %v688_v2  ;;  %956 = vmatpush.bf16.msrb.mxu2 %v4342_v32  ;;  %v348_v2 = vld [vmem:[%s7676_s4 + $0x4] ss:$0 sm:$0xff]  ;;  %v4370_v32 = vor.u32 %v5696_v27, %v4369_v26  ;;  %v5762_v26 = vld [vmem:[%s7675_s3 + $0x178] sm:$0xff] }
 0x3ca   :  { %v5770_v27 = vld [vmem:[%s7675_s3 + $0x1b8] sm:$0xff] }
 0x3e9   :  { %v610_v34 = vpop.f32.mrf.mxu0 }
 0x3ea   :  { %640 = vrot.lane.b32.xlu0 %v610_v34, %s6092_s12  ;;  %v4409_v34 = vld [vmem:[%s7674_s2 + $0x140] sm:$0xf] }
 0x3f1   :  { %v612_v35 = vpop.f32.mrf.mxu0 }
 0x3f2   :  { %v5709_v35 = vld [vmem:[%s7674_s2 + $0x1d0] sm:$0xf0] }
 0x3fc   :  { %v631_v36 = vpop.f32.mrf.mxu1 }
 0x404   :  { %v633_v37 = vpop.f32.mrf.mxu1 }
 0x415   :  { %v589_v38 = vpop.f32.mrf.mxu3 }
 0x416   :  { %636 = vrot.lane.b32.xlu2 %v589_v38, %s6093_s13  ;;  %v4410_v38 = vor.u32 %v5709_v35, %v4409_v34  ;;  %v4441_v34 = vld [vmem:[%s7674_s2 + $0x160] sm:$0xf]  ;;  %v5713_v35 = vld [vmem:[%s7674_s2 + $0x1f0] sm:$0xf0] }
 0x418   :  { %968 = vmatpush.bf16.msrb.mxu3 %v4410_v38  ;;  %v4449_v38 = vld [vmem:[%s7674_s2 + $0x168] sm:$0xf] }
 0x41d   :  { %v591_v39 = vpop.f32.mrf.mxu3 }
 0x41e   :  { %644 = vrot.lane.b32.xlu2 %v631_v36, %s6094_s14  ;;  %v5701_v36 = vld [vmem:[%s7674_s2 + $0x144] sm:$0xf]  ;;  %v4411_v39 = vld [vmem:[%s7674_s2 + $0x1d4] sm:$0xf0] }
 0x41f   :  { %v4414_v42 = vor.u32 %v5701_v36, %v4411_v39  ;;  %v5705_v36 = vld [vmem:[%s7674_s2 + $0x164] sm:$0xf]  ;;  %v5714_v39 = vld [vmem:[%s7674_s2 + $0x1f8] sm:$0xf0] }
 0x421   :  { %981 = vmatpush.bf16.msra.mxu0 %v4414_v42  ;;  %v4442_v42 = vor.u32 %v5713_v35, %v4441_v34  ;;  %v5753_v34 = vld [vmem:[%s7675_s3 + $0x130] sm:$0xff] }
 0x422   :  { %v5777_v35 = vld [vmem:[%s7675_s3 + $0x1f0] sm:$0xff] }
 0x447   :  { %v568_v40 = vpop.f32.mrf.mxu2 }
 0x44f   :  { %v570_v41 = vpop.f32.mrf.mxu2 }
 0x450   :  { %v5710_v41 = vld [vmem:[%s7674_s2 + $0x1d8] sm:$0xf0] }
 0x45c   :  { %v641_v50 = vpop.permute.xlu0 %640 }
 0x470   :  { %v637_v48 = vpop.permute.xlu2 %636 }
 0x471   :  { %v647_v49 = vsel %vm410_vm2, %v568_v40, %v637_v48  ;;  %v4417_v40 = vld [vmem:[%s7674_s2 + $0x148] sm:$0xf]  ;;  %v4422_v48 = vor.u32 %v5702_v44, %v4419_v45  ;;  %v4377_v44 = vld [vmem:[%s7674_s2 + $0x38] sm:$0xf]  ;;  %v5697_v45 = vld [vmem:[%s7674_s2 + $0xc8] sm:$0xf0] }
 0x472   :  { %v648_v52 = vsel %vm33_vm0, %v647_v49, %v641_v50  ;;  %v4418_v43 = vor.u32 %v5710_v41, %v4417_v40  ;;  %v5693_v49 = vld [vmem:[%s7674_s2 + $0xa8] sm:$0xf0]  ;;  %v5685_v50 = vld [vmem:[%s7674_s2 + $0x1c] sm:$0xf]  ;;  %v4451_v41 = vld [vmem:[%s7674_s2 + $0x1fc] sm:$0xf0] }
 0x473   :  { %v5706_v40 = vld [vmem:[%s7674_s2 + $0x16c] sm:$0xf] }
 0x474   :  { %994 = vmatpush.bf16.msra.mxu1 %v4418_v43 }
 0x478   :  { %v645_v51 = vpop.permute.xlu2 %644 }
 0x479   :  { %v650_v53 = vsel %vm649_vm4, %v648_v52, %v645_v51  ;;  %v4346_v51 = vor.u32 %v5693_v49, %v4345_v46  ;;  %v4347_v52 = vld [vmem:[%s7674_s2 + $0xac] sm:$0xf0]  ;;  %v4450_v46 = vor.u32 %v5714_v39, %v4449_v38  ;;  %v5752_v38 = vld [vmem:[%s7675_s3 + $0x128] sm:$0xff] }
 0x47a   :  { %v651_v54 = vpack.c.bf16 %v650_v53, %v650_v53  ;;  %v4353_v53 = vld [vmem:[%s7674_s2 + $0x20] sm:$0xf]  ;;  %v4379_v49 = vld [vmem:[%s7674_s2 + $0xcc] sm:$0xf0]  ;;  %v5776_v39 = vld [vmem:[%s7675_s3 + $0x1e8] sm:$0xff] }
 0x47b   :  { %969 = vmatpush.bf16.msrb.mxu3 %v4346_v51  ;;  %v5698_v51 = vld [vmem:[%s7674_s2 + $0xd0] sm:$0xf0] }
 0x47c   :  { %4326 = vmatmul.msk.bf16.vlgmr.msra.gmra.mxu2 %vm374_vm1, %v651_v54  ;;  %v5694_v54 = vld [vmem:[%s7674_s2 + $0xb0] sm:$0xf0] }
 0x47d   :  { %1007 = vmatpush.bf16.msra.mxu2 %v4422_v48  ;;  %v5689_v48 = vld [vmem:[%s7674_s2 + $0x3c] sm:$0xf] }
 0x4ff   :  { %v676_v56 = vpop.f32.mrf.mxu2 }
 0x500   :  { %v677_v57 = vadd.f32 %v676_v56, %v347_v55  ;;  %v4350_v55 = vor.u32 %v5685_v50, %v4347_v52  ;;  %v4354_v56 = vor.u32 %v5694_v54, %v4353_v53  ;;  %v4385_v50 = vld [vmem:[%s7674_s2 + $0x40] sm:$0xf]  ;;  %v5690_v52 = vld [vmem:[%s7674_s2 + $0x44] sm:$0xf]  ;;  %v4387_v53 = vld [vmem:[%s7674_s2 + $0xd4] sm:$0xf0]  ;;  %v4378_v54 = vor.u32 %v5697_v45, %v4377_v44 }
 0x501   :  { %v5758_v44 = vld [vmem:[%s7675_s3 + $0x158] sm:$0xff] }
 0x502   :  { %v680_v58 = vadd.f32 %v677_v57, %v6149_v11  ;;  %v5686_v57 = vld [vmem:[%s7674_s2 + $0x24] sm:$0xf]  ;;  %982 = vmatpush.bf16.msra.mxu0 %v4350_v55  ;;  %995 = vmatpush.bf16.msra.mxu1 %v4354_v56  ;;  %v4382_v55 = vor.u32 %v5689_v48, %v4379_v49  ;;  %v4386_v56 = vor.u32 %v5698_v51, %v4385_v50  ;;  %v5766_v45 = vld [vmem:[%s7675_s3 + $0x198] sm:$0xff]  ;;  %v5756_v50 = vld [vmem:[%s7675_s3 + $0x148] sm:$0xff] }
 0x503   :  { %v5750_v48 = vld [vmem:[%s7675_s3 + $0x118] sm:$0xff]  ;;  %v5764_v51 = vld [vmem:[%s7675_s3 + $0x188] sm:$0xff] }
 0x504   :  { %v681_v59 = vsel %vm374_vm1, %v680_v58, 0.0  ;;  %v5774_v49 = vld [vmem:[%s7675_s3 + $0x1d8] sm:$0xff] }
 0x505   :  { %682 = vadd.xlane.f32.xlu0 %v681_v59 }
 0x507   :  { %v678_v60 = vpop.f32.mrf.mxu2 }
 0x578   :  { %v683_v4 = vpop.xlane.xlu0 %682 }
 0x579   :  { %v691_v5 = vmul.f32 %v6224_v3, %v683_v4 }
 0x57b   :  { %v6227_v6 = vsub.f32 %v680_v58, %v691_v5  ;;  %v4355_v58 = vld [vmem:[%s7674_s2 + $0xb4] sm:$0xf0] }
 0x57c   :  { %v4358_v59 = vor.u32 %v5686_v57, %v4355_v58  ;;  %v4390_v57 = vor.u32 %v5690_v52, %v4387_v53  ;;  %v5730_v58 = vld [vmem:[%s7675_s3 + $0x78] sm:$0xff]  ;;  %v5749_v52 = vld [vmem:[%s7675_s3 + $0x110] sm:$0xff] }
 0x57d   :  { %v693_v11 = vmul.f32 %v6227_v6, %v6227_v6  ;;  %v5773_v53 = vld [vmem:[%s7675_s3 + $0x1d0] sm:$0xff] }
 0x57e   :  { %1008 = vmatpush.bf16.msra.mxu2 %v4358_v59  ;;  %v5738_v59 = vld [vmem:[%s7675_s3 + $0xb8] sm:$0xff] }
 0x57f   :  { %v694_v7 = vsel %vm374_vm1, %v693_v11, 0.0  ;;  %v349_v11 = vld [vmem:[%s7676_s4 + $0x5] ss:$0 sm:$0xff] }
 0x580   :  { %695 = vadd.xlane.f32.xlu2 %v694_v7 }
 0x5f3   :  { %v696_v33 = vpop.xlane.xlu2 %695 }
 0x5f4   :  { %v697_v37 = vmul.f32 %v696_v33, %v6224_v3  ;;  %v4374_v33 = vor.u32 %v5688_v28, %v4371_v29  ;;  %v5715_v28 = vld [vmem:[%s7675_s3] sm:$0xff] }
 0x5f5   :  { %v5739_v29 = vld [vmem:[%s7675_s3 + $0xc0] sm:$0xff] }
 0x5f6   :  { %v698_v47 = vadd.f32 1e-05, %v697_v37  ;;  %v4443_v37 = vld [vmem:[%s7674_s2 + $0x1f4] sm:$0xf0] }
 0x5f7   :  { %v4446_v43 = vor.u32 %v5705_v36, %v4443_v37  ;;  %v5760_v36 = vld [vmem:[%s7675_s3 + $0x168] sm:$0xff] }
 0x5f8   :  { %6037 = vrsqrt.f32 %v698_v47  ;;  %vm705_vm7 = vweird.f32 %v698_v47  ;;  %v5768_v37 = vld [vmem:[%s7675_s3 + $0x1a8] sm:$0xff] }
 0x5fe   :  { %v6038_v60 = vpop.eup %6037 }
 0x5ff   :  { %v700_v61 = vmul.f32 %v6038_v60, %v698_v47  ;;  %vm706_vm6 = vweird.f32 %v6038_v60  ;;  %v4454_v47 = vor.u32 %v5706_v40, %v4451_v41  ;;  %v5759_v40 = vld [vmem:[%s7675_s3 + $0x160] sm:$0xff] }
 0x600   :  { %vm707_vm8 = vmor %vm705_vm7, %vm706_vm6  ;;  %v5767_v41 = vld [vmem:[%s7675_s3 + $0x1a0] sm:$0xff] }
 0x601   :  { %v701_v62 = vmul.f32 %v6038_v60, %v700_v61  ;;  %v5746_v61 = vld [vmem:[%s7675_s3 + $0xf8] sm:$0xff] }
 0x603   :  { %v702_v63 = vmul.f32 0.5, %v701_v62  ;;  %v5729_v62 = vld [vmem:[%s7675_s3 + $0x70] sm:$0xff] }
 0x605   :  { %v703_v0 = vsub.f32 1.5, %v702_v63  ;;  %v5737_v63 = vld [vmem:[%s7675_s3 + $0xb0] sm:$0xff] }
 0x607   :  { %v704_v1 = vmul.f32 %v6038_v60, %v703_v0  ;;  %v5721_v0 = vld [vmem:[%s7675_s3 + $0x30] sm:$0xff] }
 0x609   :  { %v708_v4 = vsel %vm707_vm8, %v6038_v60, %v704_v1  ;;  %v5722_v60 = vld [vmem:[%s7675_s3 + $0x38] sm:$0xff]  ;;  %v5745_v1 = vld [vmem:[%s7675_s3 + $0xf0] sm:$0xff] }
 0x60a   :  { %v709_v5 = vmul.f32 %v708_v4, %v6227_v6  ;;  %v4427_v6 = vld [vmem:[%s7674_s2 + $0x1e4] sm:$0xf0] }
 0x60b   :  { %v4430_v19 = vor.u32 %v5703_v10, %v4427_v6  ;;  %v5736_v4 = vld [vmem:[%s7675_s3 + $0xa8] sm:$0xff]  ;;  %v5743_v10 = vld [vmem:[%s7675_s3 + $0xe0] sm:$0xff]  ;;  %v5726_v6 = vld [vmem:[%s7675_s3 + $0x58] sm:$0xff] }
 0x60c   :  { %v710_v7 = vmul.f32 %v709_v5, %v348_v2  ;;  %v5728_v2 = vld [vmem:[%s7675_s3 + $0x68] sm:$0xff] }
 0x60d   :  { %v5720_v5 = vld [vmem:[%s7675_s3 + $0x28] sm:$0xff] }
 0x60e   :  { %v6351_v13 = vadd.f32 %v710_v7, %v349_v11  ;;  %v5744_v11 = vld [vmem:[%s7675_s3 + $0xe8] sm:$0xff]  ;;  %v5727_v7 = vld [vmem:[%s7675_s3 + $0x60] sm:$0xff] }
 0x610   :  { %v6364_v17 = vpack.c.bf16 %v6351_v13, %v6351_v13 }
 0x612   :  { %4455 = vmatmul.msk.bf16.vlgmr.msra.gmra.mxu3 %vm374_vm1, %v6364_v17  ;;  %4456 = vmatmul.msk.bf16.vlgmr.msrb.gmra.mxu0 %vm374_vm1, %v6364_v17 }
 0x613   :  { %4457 = vmatmul.msk.bf16.vlgmr.msrb.gmra.mxu1 %vm374_vm1, %v6364_v17  ;;  %4458 = vmatmul.msk.bf16.vlgmr.msrb.gmra.mxu2 %vm374_vm1, %v6364_v17 }
 0x614   :  { %1020 = vmatpush.bf16.msra.mxu3 %v4426_v18  ;;  %1033 = vmatpush.bf16.msrb.mxu0 %v4430_v19  ;;  %v5733_v18 = vld [vmem:[%s7675_s3 + $0x90] sm:$0xff] }
 0x615   :  { %1046 = vmatpush.bf16.msrb.mxu1 %v4434_v22  ;;  %1059 = vmatpush.bf16.msrb.mxu2 %v4438_v23  ;;  %v5717_v19 = vld [vmem:[%s7675_s3 + $0x10] sm:$0xff]  ;;  %v5716_v22 = vld [vmem:[%s7675_s3 + $0x8] sm:$0xff] }
 0x616   :  { %v5740_v23 = vld [vmem:[%s7675_s3 + $0xc8] sm:$0xff] }
 0x618   :  { %1021 = vmatpush.bf16.msra.mxu3 %v4362_v30  ;;  %1034 = vmatpush.bf16.msrb.mxu0 %v4366_v31  ;;  %v5754_v30 = vld [vmem:[%s7675_s3 + $0x138] sm:$0xff] }
 0x619   :  { %1047 = vmatpush.bf16.msrb.mxu1 %v4370_v32  ;;  %1060 = vmatpush.bf16.msrb.mxu2 %v4374_v33  ;;  %v5778_v31 = vld [vmem:[%s7675_s3 + $0x1f8] sm:$0xff]  ;;  %v5761_v32 = vld [vmem:[%s7675_s3 + $0x170] sm:$0xff] }
 0x61a   :  { %v5769_v33 = vld [vmem:[%s7675_s3 + $0x1b0] sm:$0xff] }
 0x622   :  { %4459 = vmatmul.msk.bf16.vlgmr.msrb.gmra.mxu3 %vm374_vm1, %v6364_v17  ;;  %4460 = vmatmul.msk.bf16.vlgmr.msra.gmra.mxu0 %vm374_vm1, %v6364_v17 }
 0x623   :  { %4461 = vmatmul.msk.bf16.vlgmr.msra.gmra.mxu1 %vm374_vm1, %v6364_v17  ;;  %4462 = vmatmul.msk.bf16.vlgmr.msra.gmra.mxu2 %vm374_vm1, %v6364_v17 }
 0x624   :  { %1072 = vmatpush.bf16.msrb.mxu3 %v4442_v42  ;;  %1085 = vmatpush.bf16.msra.mxu0 %v4446_v43  ;;  %v5751_v42 = vld [vmem:[%s7675_s3 + $0x120] sm:$0xff] }
 0x625   :  { %1098 = vmatpush.bf16.msra.mxu1 %v4450_v46  ;;  %1111 = vmatpush.bf16.msra.mxu2 %v4454_v47  ;;  %v5775_v43 = vld [vmem:[%s7675_s3 + $0x1e0] sm:$0xff]  ;;  %v5757_v46 = vld [vmem:[%s7675_s3 + $0x150] sm:$0xff] }
 0x626   :  { %v5765_v47 = vld [vmem:[%s7675_s3 + $0x190] sm:$0xff] }
 0x628   :  { %1073 = vmatpush.bf16.msrb.mxu3 %v4378_v54  ;;  %1086 = vmatpush.bf16.msra.mxu0 %v4382_v55  ;;  %v5755_v54 = vld [vmem:[%s7675_s3 + $0x140] sm:$0xff] }
 0x629   :  { %1099 = vmatpush.bf16.msra.mxu1 %v4386_v56  ;;  %1112 = vmatpush.bf16.msra.mxu2 %v4390_v57  ;;  %v5763_v55 = vld [vmem:[%s7675_s3 + $0x180] sm:$0xff]  ;;  %v5748_v56 = vld [vmem:[%s7675_s3 + $0x108] sm:$0xff] }
 0x62a   :  { %v5772_v57 = vld [vmem:[%s7675_s3 + $0x1c8] sm:$0xff] }
 0x632   :  { %4463 = vmatmul.msk.bf16.vlgmr.msra.gmra.mxu3 %vm374_vm1, %v6364_v17  ;;  %4464 = vmatmul.msk.bf16.vlgmr.msrb.gmra.mxu0 %vm374_vm1, %v6364_v17 }
 0x633   :  { %4465 = vmatmul.msk.bf16.vlgmr.msrb.gmra.mxu1 %vm374_vm1, %v6364_v17  ;;  %4466 = vmatmul.msk.bf16.vlgmr.msrb.gmra.mxu2 %vm374_vm1, %v6364_v17 }
 0x634   :  { %1931 = vmatpush.bf16.msrb.mxu0 %v5730_v58  ;;  %1944 = vmatpush.bf16.msrb.mxu1 %v5738_v59  ;;  %v5747_v58 = vld [vmem:[%s7675_s3 + $0x100] sm:$0xff] }
 0x635   :  { %1918 = vmatpush.bf16.msra.mxu3 %v5722_v60  ;;  %1957 = vmatpush.bf16.msrb.mxu2 %v5746_v61  ;;  %v5771_v59 = vld [vmem:[%s7675_s3 + $0x1c0] sm:$0xff] }
 0x636   :  { %v4297_v60 = vld [vmem:[%s7676_s4 + $0x80] ss:$8 sm:$0xf] }
 0x637   :  { %v4298_v61 = vld [vmem:[%s7676_s4 + $0x80] ss:$8 sm:$0xf0] }
 0x638   :  { %1932 = vmatpush.bf16.msrb.mxu0 %v5729_v62  ;;  %1945 = vmatpush.bf16.msrb.mxu1 %v5737_v63  ;;  %v6668_v62 = vor.u32 %v4298_v61, %v4297_v60 }
 0x639   :  { %1919 = vmatpush.bf16.msra.mxu3 %v5721_v0  ;;  %1958 = vmatpush.bf16.msrb.mxu2 %v5745_v1 }
 0x63a   :  { %v716_v63 = vperm.slane %v6668_v62, 1  ;;  %v717_v0 = vperm.slane %v6668_v62, 2 }
 0x63c   :  { %1933 = vmatpush.bf16.msrb.mxu0 %v5728_v2  ;;  %1946 = vmatpush.bf16.msrb.mxu1 %v5736_v4 }
 0x63d   :  { %1920 = vmatpush.bf16.msra.mxu3 %v5720_v5  ;;  %1959 = vmatpush.bf16.msrb.mxu2 %v5744_v11 }
 0x640   :  { %1934 = vmatpush.bf16.msrb.mxu0 %v5727_v7  ;;  %1947 = vmatpush.bf16.msrb.mxu1 %v5735_v8  ;;  %v715_v7 = vperm.slane %v6668_v62, 0 }
 0x641   :  { %1921 = vmatpush.bf16.msra.mxu3 %v5719_v9  ;;  %1960 = vmatpush.bf16.msrb.mxu2 %v5743_v10  ;;  %v718_v9 = vperm.slane %v6668_v62, 3  ;;  %v5794_v10 = vld [vmem:[%s7675_s3 + $0x278] sm:$0xff] }
 0x642   :  { %4467 = vmatmul.msk.bf16.vlgmr.msrb.gmra.mxu3 %vm374_vm1, %v6364_v17  ;;  %4468 = vmatmul.msk.bf16.vlgmr.msra.gmra.mxu0 %vm374_vm1, %v6364_v17 }
 0x643   :  { %4469 = vmatmul.msk.bf16.vlgmr.msra.gmra.mxu1 %vm374_vm1, %v6364_v17  ;;  %4470 = vmatmul.msk.bf16.vlgmr.msra.gmra.mxu2 %vm374_vm1, %v6364_v17  ;;  %v5741_v17 = vld [vmem:[%s7675_s3 + $0xd0] sm:$0xff] }
 0x644   :  { %1935 = vmatpush.bf16.msrb.mxu0 %v5726_v6  ;;  %1948 = vmatpush.bf16.msrb.mxu1 %v5734_v12  ;;  %v5802_v12 = vld [vmem:[%s7675_s3 + $0x2b8] sm:$0xff] }
 0x645   :  { %1922 = vmatpush.bf16.msra.mxu3 %v5718_v14  ;;  %1961 = vmatpush.bf16.msrb.mxu2 %v5742_v15 }
 0x648   :  { %1936 = vmatpush.bf16.msrb.mxu0 %v5725_v16  ;;  %1949 = vmatpush.bf16.msrb.mxu1 %v5733_v18 }
 0x649   :  { %1923 = vmatpush.bf16.msra.mxu3 %v5717_v19  ;;  %1962 = vmatpush.bf16.msrb.mxu2 %v5741_v17 }
 0x64c   :  { %1937 = vmatpush.bf16.msrb.mxu0 %v5724_v20  ;;  %1950 = vmatpush.bf16.msrb.mxu1 %v5732_v21  ;;  %v5793_v20 = vld [vmem:[%s7675_s3 + $0x270] sm:$0xff] }
 0x64d   :  { %1924 = vmatpush.bf16.msra.mxu3 %v5716_v22  ;;  %1963 = vmatpush.bf16.msrb.mxu2 %v5740_v23  ;;  %v5801_v23 = vld [vmem:[%s7675_s3 + $0x2b0] sm:$0xff] }
 0x650   :  { %1938 = vmatpush.bf16.msrb.mxu0 %v5723_v24  ;;  %1951 = vmatpush.bf16.msrb.mxu1 %v5731_v25  ;;  %v5786_v25 = vld [vmem:[%s7675_s3 + $0x238] sm:$0xff] }
 0x651   :  { %1925 = vmatpush.bf16.msra.mxu3 %v5715_v28  ;;  %1964 = vmatpush.bf16.msrb.mxu2 %v5739_v29  ;;  %v5792_v29 = vld [vmem:[%s7675_s3 + $0x268] sm:$0xff] }
 0x654   :  { %1983 = vmatpush.bf16.msra.mxu0 %v5762_v26  ;;  %1996 = vmatpush.bf16.msra.mxu1 %v5770_v27  ;;  %v5810_v27 = vld [vmem:[%s7675_s3 + $0x2f8] sm:$0xff] }
 0x655   :  { %1970 = vmatpush.bf16.msrb.mxu3 %v5754_v30  ;;  %2009 = vmatpush.bf16.msra.mxu2 %v5778_v31  ;;  %v5800_v30 = vld [vmem:[%s7675_s3 + $0x2a8] sm:$0xff]  ;;  %v720_v31 = vperm.slane %v6668_v62, 5 }
 0x658   :  { %1984 = vmatpush.bf16.msra.mxu0 %v5761_v32  ;;  %1997 = vmatpush.bf16.msra.mxu1 %v5769_v33  ;;  %v721_v33 = vperm.slane %v6668_v62, 6 }
 0x659   :  { %1971 = vmatpush.bf16.msrb.mxu3 %v5753_v34  ;;  %2010 = vmatpush.bf16.msra.mxu2 %v5777_v35  ;;  %v5785_v34 = vld [vmem:[%s7675_s3 + $0x230] sm:$0xff] }
 0x65c   :  { %1985 = vmatpush.bf16.msra.mxu0 %v5760_v36  ;;  %1998 = vmatpush.bf16.msra.mxu1 %v5768_v37  ;;  %v5809_v36 = vld [vmem:[%s7675_s3 + $0x2f0] sm:$0xff] }
 0x65d   :  { %1972 = vmatpush.bf16.msrb.mxu3 %v5752_v38  ;;  %2011 = vmatpush.bf16.msra.mxu2 %v5776_v39  ;;  %v5791_v38 = vld [vmem:[%s7675_s3 + $0x260] sm:$0xff] }
 0x660   :  { %1986 = vmatpush.bf16.msra.mxu0 %v5759_v40  ;;  %1999 = vmatpush.bf16.msra.mxu1 %v5767_v41  ;;  %v5799_v41 = vld [vmem:[%s7675_s3 + $0x2a0] sm:$0xff] }
 0x661   :  { %1973 = vmatpush.bf16.msrb.mxu3 %v5751_v42  ;;  %2012 = vmatpush.bf16.msra.mxu2 %v5775_v43  ;;  %v5784_v43 = vld [vmem:[%s7675_s3 + $0x228] sm:$0xff] }
 0x664   :  { %1987 = vmatpush.bf16.msra.mxu0 %v5758_v44  ;;  %2000 = vmatpush.bf16.msra.mxu1 %v5766_v45  ;;  %v5808_v45 = vld [vmem:[%s7675_s3 + $0x2e8] sm:$0xff] }
 0x665   :  { %1974 = vmatpush.bf16.msrb.mxu3 %v5750_v48  ;;  %2013 = vmatpush.bf16.msra.mxu2 %v5774_v49  ;;  %v722_v48 = vperm.slane %v6668_v62, 7  ;;  %v5790_v49 = vld [vmem:[%s7675_s3 + $0x258] sm:$0xff] }
 0x668   :  { %1988 = vmatpush.bf16.msra.mxu0 %v5757_v46  ;;  %2001 = vmatpush.bf16.msra.mxu1 %v5765_v47  ;;  %v719_v46 = vperm.slane %v6668_v62, 4  ;;  %v5789_v62 = vld [vmem:[%s7675_s3 + $0x250] sm:$0xff] }
 0x669   :  { %1975 = vmatpush.bf16.msrb.mxu3 %v5749_v52  ;;  %2014 = vmatpush.bf16.msra.mxu2 %v5773_v53  ;;  %v5783_v52 = vld [vmem:[%s7675_s3 + $0x220] sm:$0xff] }
 0x66c   :  { %1989 = vmatpush.bf16.msra.mxu0 %v5756_v50  ;;  %2002 = vmatpush.bf16.msra.mxu1 %v5764_v51  ;;  %v5798_v51 = vld [vmem:[%s7675_s3 + $0x298] sm:$0xff] }
 0x66d   :  { %1976 = vmatpush.bf16.msrb.mxu3 %v5748_v56  ;;  %2015 = vmatpush.bf16.msra.mxu2 %v5772_v57  ;;  %v4300_v56 = vld [vmem:[%s7676_s4 + $0xc0] ss:$8 sm:$0xf0] }
 0x670   :  { %1990 = vmatpush.bf16.msra.mxu0 %v5755_v54  ;;  %2003 = vmatpush.bf16.msra.mxu1 %v5763_v55  ;;  %v4299_v55 = vld [vmem:[%s7676_s4 + $0xc0] ss:$8 sm:$0xf] }
 0x671   :  { %1977 = vmatpush.bf16.msrb.mxu3 %v5747_v58  ;;  %2016 = vmatpush.bf16.msra.mxu2 %v5771_v59  ;;  %v5807_v59 = vld [vmem:[%s7675_s3 + $0x2e0] sm:$0xff] }
 0x68f   :  { %v932_v1 = vpop.f32.mrf.mxu0 }
 0x690   :  { %v933_v2 = vadd.f32 %v932_v1, %v716_v63  ;;  %v945_v4 = vpop.f32.mrf.mxu1  ;;  %v5797_v1 = vld [vmem:[%s7675_s3 + $0x290] sm:$0xff] }
 0x691   :  { %v946_v5 = vadd.f32 %v945_v4, %v717_v0 }
 0x692   :  { %v1119_v11 = vmax.f32 %v933_v2, 0.0  ;;  %v6744_v2 = vor.u32 %v4300_v56, %v4299_v55  ;;  %v5831_v56 = vld [vmem:[%s7675_s3 + $0x3a0] sm:$0xff] }
 0x693   :  { %v1120_v8 = vmax.f32 %v946_v5, 0.0  ;;  %v5782_v5 = vld [vmem:[%s7675_s3 + $0x218] sm:$0xff] }
 0x694   :  { %v1135_v6 = vpack.c.bf16 %v1119_v11, %v1119_v11 }
 0x695   :  { %v1136_v14 = vpack.c.bf16 %v1120_v8, %v1120_v8  ;;  %v919_v15 = vpop.f32.mrf.mxu3 }
 0x696   :  { %v920_v16 = vadd.f32 %v919_v15, %v715_v7  ;;  %v958_v18 = vpop.f32.mrf.mxu2  ;;  %1939 = vmatmul.bf16.vlgmr.msrb.gmra.mxu0 %v1135_v6  ;;  %v5806_v7 = vld [vmem:[%s7675_s3 + $0x2d8] sm:$0xff]  ;;  %v724_v6 = vperm.slane %v6744_v2, 1  ;;  %v5781_v15 = vld [vmem:[%s7675_s3 + $0x210] sm:$0xff] }
 0x697   :  { %v959_v19 = vadd.f32 %v958_v18, %v718_v9  ;;  %1952 = vmatmul.bf16.vlgmr.msrb.gmra.mxu1 %v1136_v14  ;;  %2035 = vmatpush.bf16.msrb.mxu0 %v5794_v10  ;;  %v934_v17 = vpop.f32.mrf.mxu0  ;;  %v5788_v9 = vld [vmem:[%s7675_s3 + $0x248] sm:$0xff]  ;;  %v725_v14 = vperm.slane %v6744_v2, 2  ;;  %v5805_v18 = vld [vmem:[%s7675_s3 + $0x2d0] sm:$0xff] }
 0x698   :  { %v1118_v21 = vmax.f32 %v920_v16, 0.0  ;;  %2048 = vmatpush.bf16.msrb.mxu1 %v5802_v12  ;;  %v947_v22 = vpop.f32.mrf.mxu1  ;;  %v5796_v10 = vld [vmem:[%s7675_s3 + $0x288] sm:$0xff]  ;;  %v5787_v17 = vld [vmem:[%s7675_s3 + $0x240] sm:$0xff] }
 0x699   :  { %v1121_v24 = vmax.f32 %v959_v19, 0.0  ;;  %v5795_v22 = vld [vmem:[%s7675_s3 + $0x280] sm:$0xff] }
 0x69a   :  { %v1134_v26 = vpack.c.bf16 %v1118_v21, %v1118_v21 }
 0x69b   :  { %v1137_v28 = vpack.c.bf16 %v1121_v24, %v1121_v24  ;;  %2036 = vmatpush.bf16.msrb.mxu0 %v5793_v20 }
 0x69c   :  { %2049 = vmatpush.bf16.msrb.mxu1 %v5801_v23  ;;  %1926 = vmatmul.bf16.vlgmr.msra.gmra.mxu3 %v1134_v26  ;;  %v5826_v23 = vld [vmem:[%s7675_s3 + $0x378] sm:$0xff]  ;;  %v5780_v26 = vld [vmem:[%s7675_s3 + $0x208] sm:$0xff] }
 0x69d   :  { %1965 = vmatmul.bf16.vlgmr.msrb.gmra.mxu2 %v1137_v28  ;;  %2022 = vmatpush.bf16.msra.mxu3 %v5786_v25  ;;  %v921_v32 = vpop.f32.mrf.mxu3  ;;  %v5834_v25 = vld [vmem:[%s7675_s3 + $0x3b8] sm:$0xff]  ;;  %v5804_v28 = vld [vmem:[%s7675_s3 + $0x2c8] sm:$0xff] }
 0x69e   :  { %2061 = vmatpush.bf16.msrb.mxu2 %v5810_v27  ;;  %v960_v35 = vpop.f32.mrf.mxu2 }
 0x69f   :  { %2037 = vmatpush.bf16.msrb.mxu0 %v5792_v29  ;;  %v984_v37 = vpop.f32.mrf.mxu0  ;;  %v723_v29 = vperm.slane %v6744_v2, 0 }
 0x6a0   :  { %2050 = vmatpush.bf16.msrb.mxu1 %v5800_v30  ;;  %v985_v39 = vadd.f32 %v984_v37, %v720_v31  ;;  %v997_v40 = vpop.f32.mrf.mxu1  ;;  %v726_v31 = vperm.slane %v6744_v2, 3  ;;  %v5779_v37 = vld [vmem:[%s7675_s3 + $0x200] sm:$0xff] }
 0x6a1   :  { %v998_v42 = vadd.f32 %v997_v40, %v721_v33  ;;  %2023 = vmatpush.bf16.msra.mxu3 %v5785_v34  ;;  %v5825_v33 = vld [vmem:[%s7675_s3 + $0x370] sm:$0xff]  ;;  %v5803_v40 = vld [vmem:[%s7675_s3 + $0x2c0] sm:$0xff] }
 0x6a2   :  { %v1123_v44 = vmax.f32 %v985_v39, 0.0  ;;  %2062 = vmatpush.bf16.msrb.mxu2 %v5809_v36  ;;  %v5833_v36 = vld [vmem:[%s7675_s3 + $0x3b0] sm:$0xff] }
 0x6a3   :  { %v1124_v47 = vmax.f32 %v998_v42, 0.0  ;;  %2038 = vmatpush.bf16.msrb.mxu0 %v5791_v38 }
 0x6a4   :  { %v1139_v50 = vpack.c.bf16 %v1123_v44, %v1123_v44  ;;  %2051 = vmatpush.bf16.msrb.mxu1 %v5799_v41  ;;  %v5818_v41 = vld [vmem:[%s7675_s3 + $0x338] sm:$0xff] }
 0x6a5   :  { %v1140_v53 = vpack.c.bf16 %v1124_v47, %v1124_v47  ;;  %2024 = vmatpush.bf16.msra.mxu3 %v5784_v43  ;;  %v971_v54 = vpop.f32.mrf.mxu3  ;;  %v5842_v44 = vld [vmem:[%s7675_s3 + $0x3f8] sm:$0xff]  ;;  %v5824_v47 = vld [vmem:[%s7675_s3 + $0x368] sm:$0xff] }
 0x6a6   :  { %2063 = vmatpush.bf16.msrb.mxu2 %v5808_v45  ;;  %v972_v57 = vadd.f32 %v971_v54, %v719_v46  ;;  %v1010_v58 = vpop.f32.mrf.mxu2  ;;  %1991 = vmatmul.bf16.vlgmr.msra.gmra.mxu0 %v1139_v50  ;;  %v5823_v54 = vld [vmem:[%s7675_s3 + $0x360] sm:$0xff] }
 0x6a7   :  { %v1011_v60 = vadd.f32 %v1010_v58, %v722_v48  ;;  %2004 = vmatmul.bf16.vlgmr.msra.gmra.mxu1 %v1140_v53  ;;  %2039 = vmatpush.bf16.msrb.mxu0 %v5790_v49  ;;  %v986_v61 = vpop.f32.mrf.mxu0  ;;  %v5832_v49 = vld [vmem:[%s7675_s3 + $0x3a8] sm:$0xff]  ;;  %v5841_v53 = vld [vmem:[%s7675_s3 + $0x3f0] sm:$0xff] }
 0x6a8   :  { %v1122_v63 = vmax.f32 %v972_v57, 0.0  ;;  %2052 = vmatpush.bf16.msrb.mxu1 %v5798_v51  ;;  %v999_v0 = vpop.f32.mrf.mxu1  ;;  %v5817_v51 = vld [vmem:[%s7675_s3 + $0x330] sm:$0xff]  ;;  %v5816_v58 = vld [vmem:[%s7675_s3 + $0x328] sm:$0xff] }
 0x6a9   :  { %v1125_v4 = vmax.f32 %v1011_v60, 0.0  ;;  %2025 = vmatpush.bf16.msra.mxu3 %v5783_v52  ;;  %v5840_v60 = vld [vmem:[%s7675_s3 + $0x3e8] sm:$0xff]  ;;  %v5815_v0 = vld [vmem:[%s7675_s3 + $0x320] sm:$0xff] }
 0x6aa   :  { %v1138_v11 = vpack.c.bf16 %v1122_v63, %v1122_v63  ;;  %2064 = vmatpush.bf16.msrb.mxu2 %v5807_v59  ;;  %v5830_v63 = vld [vmem:[%s7675_s3 + $0x398] sm:$0xff] }
 0x6ab   :  { %v1141_v8 = vpack.c.bf16 %v1125_v4, %v1125_v4  ;;  %2040 = vmatpush.bf16.msrb.mxu0 %v5789_v62  ;;  %v5822_v62 = vld [vmem:[%s7675_s3 + $0x358] sm:$0xff]  ;;  %v5821_v4 = vld [vmem:[%s7675_s3 + $0x350] sm:$0xff] }
 0x6ac   :  { %2053 = vmatpush.bf16.msrb.mxu1 %v5797_v1  ;;  %1978 = vmatmul.bf16.vlgmr.msrb.gmra.mxu3 %v1138_v11  ;;  %v5839_v1 = vld [vmem:[%s7675_s3 + $0x3e0] sm:$0xff] }
 0x6ad   :  { %2017 = vmatmul.bf16.vlgmr.msra.gmra.mxu2 %v1141_v8  ;;  %2026 = vmatpush.bf16.msra.mxu3 %v5782_v5  ;;  %v973_v12 = vpop.f32.mrf.mxu3  ;;  %v728_v5 = vperm.slane %v6744_v2, 5  ;;  %v729_v8 = vperm.slane %v6744_v2, 6 }
 0x6ae   :  { %2065 = vmatpush.bf16.msrb.mxu2 %v5806_v7  ;;  %v1012_v16 = vpop.f32.mrf.mxu2  ;;  %v5829_v7 = vld [vmem:[%s7675_s3 + $0x390] sm:$0xff]  ;;  %v5838_v12 = vld [vmem:[%s7675_s3 + $0x3d8] sm:$0xff] }
 0x6af   :  { %2041 = vmatpush.bf16.msrb.mxu0 %v5788_v9  ;;  %v1036_v19 = vpop.f32.mrf.mxu0 }
 0x6b0   :  { %2054 = vmatpush.bf16.msrb.mxu1 %v5796_v10  ;;  %v1037_v20 = vadd.f32 %v1036_v19, %v724_v6  ;;  %v1049_v21 = vpop.f32.mrf.mxu1  ;;  %v5814_v10 = vld [vmem:[%s7675_s3 + $0x318] sm:$0xff] }
 0x6b1   :  { %v1050_v24 = vadd.f32 %v1049_v21, %v725_v14  ;;  %2027 = vmatpush.bf16.msra.mxu3 %v5781_v15  ;;  %v5820_v15 = vld [vmem:[%s7675_s3 + $0x348] sm:$0xff]  ;;  %v5837_v21 = vld [vmem:[%s7675_s3 + $0x3d0] sm:$0xff] }
 0x6b2   :  { %v1127_v27 = vmax.f32 %v1037_v20, 0.0  ;;  %2066 = vmatpush.bf16.msrb.mxu2 %v5805_v18  ;;  %v5828_v18 = vld [vmem:[%s7675_s3 + $0x388] sm:$0xff]  ;;  %v727_v20 = vperm.slane %v6744_v2, 4 }
 0x6b3   :  { %v1128_v30 = vmax.f32 %v1050_v24, 0.0  ;;  %2042 = vmatpush.bf16.msrb.mxu0 %v5787_v17  ;;  %v5813_v17 = vld [vmem:[%s7675_s3 + $0x310] sm:$0xff] }
 0x6b4   :  { %v1143_v32 = vpack.c.bf16 %v1127_v27, %v1127_v27  ;;  %2055 = vmatpush.bf16.msrb.mxu1 %v5795_v22  ;;  %v730_v22 = vperm.slane %v6744_v2, 7 }
 0x6b5   :  { %v1144_v34 = vpack.c.bf16 %v1128_v30, %v1128_v30  ;;  %2028 = vmatpush.bf16.msra.mxu3 %v5780_v26  ;;  %v1023_v35 = vpop.f32.mrf.mxu3  ;;  %v5827_v26 = vld [vmem:[%s7675_s3 + $0x380] sm:$0xff]  ;;  %v5836_v30 = vld [vmem:[%s7675_s3 + $0x3c8] sm:$0xff] }
 0x6b6   :  { %2067 = vmatpush.bf16.msrb.mxu2 %v5804_v28  ;;  %v1024_v38 = vadd.f32 %v1023_v35, %v723_v29  ;;  %v1062_v39 = vpop.f32.mrf.mxu2  ;;  %2043 = vmatmul.bf16.vlgmr.msrb.gmra.mxu0 %v1143_v32  ;;  %v5812_v29 = vld [vmem:[%s7675_s3 + $0x308] sm:$0xff] }
 0x6b7   :  { %2087 = vmatpush.bf16.msra.mxu0 %v5826_v23  ;;  %v1063_v42 = vadd.f32 %v1062_v39, %v726_v31  ;;  %2056 = vmatmul.bf16.vlgmr.msrb.gmra.mxu1 %v1144_v34  ;;  %v1038_v43 = vpop.f32.mrf.mxu0  ;;  %v5819_v23 = vld [vmem:[%s7675_s3 + $0x340] sm:$0xff] }
 0x6b8   :  { %2100 = vmatpush.bf16.msra.mxu1 %v5834_v25  ;;  %v1126_v45 = vmax.f32 %v1024_v38, 0.0  ;;  %v1051_v46 = vpop.f32.mrf.mxu1  ;;  %v5811_v34 = vld [vmem:[%s7675_s3 + $0x300] sm:$0xff] }
 0x6b9   :  { %v1129_v48 = vmax.f32 %v1063_v42, 0.0  ;;  %2029 = vmatpush.bf16.msra.mxu3 %v5779_v37 }
 0x6ba   :  { %v1142_v50 = vpack.c.bf16 %v1126_v45, %v1126_v45  ;;  %2068 = vmatpush.bf16.msrb.mxu2 %v5803_v40 }
 0x6bb   :  { %2088 = vmatpush.bf16.msra.mxu0 %v5825_v33  ;;  %v1145_v52 = vpack.c.bf16 %v1129_v48, %v1129_v48 }
 0x6bc   :  { %2101 = vmatpush.bf16.msra.mxu1 %v5833_v36  ;;  %2030 = vmatmul.bf16.vlgmr.msra.gmra.mxu3 %v1142_v50  ;;  %v5835_v36 = vld [vmem:[%s7675_s3 + $0x3c0] sm:$0xff] }
 0x6bd   :  { %2074 = vmatpush.bf16.msrb.mxu3 %v5818_v41  ;;  %2069 = vmatmul.bf16.vlgmr.msrb.gmra.mxu2 %v1145_v52  ;;  %v1025_v55 = vpop.f32.mrf.mxu3 }
 0x6be   :  { %2113 = vmatpush.bf16.msra.mxu2 %v5842_v44  ;;  %v1064_v57 = vpop.f32.mrf.mxu2 }
 0x6bf   :  { %2089 = vmatpush.bf16.msra.mxu0 %v5824_v47  ;;  %v1088_v59 = vpop.f32.mrf.mxu0 }
 0x6c0   :  { %2102 = vmatpush.bf16.msra.mxu1 %v5832_v49  ;;  %v1101_v61 = vpop.f32.mrf.mxu1  ;;  %v1089_v16 = vadd.f32 %v1088_v59, %v728_v5 }
 0x6c1   :  { %2075 = vmatpush.bf16.msrb.mxu3 %v5817_v51  ;;  %v1102_v19 = vadd.f32 %v1101_v61, %v729_v8 }
 0x6c2   :  { %2114 = vmatpush.bf16.msra.mxu2 %v5841_v53  ;;  %v1131_v24 = vmax.f32 %v1089_v16, 0.0  ;;  %v360_v53 = vld [vmem:[%s7676_s4 + $0x81] ss:$0 sm:$0xff] }
 0x6c3   :  { %2090 = vmatpush.bf16.msra.mxu0 %v5823_v54  ;;  %v1132_v27 = vmax.f32 %v1102_v19, 0.0 }
 0x6c4   :  { %2103 = vmatpush.bf16.msra.mxu1 %v5831_v56  ;;  %v1147_v32 = vpack.c.bf16 %v1131_v24, %v1131_v24 }
 0x6c5   :  { %2076 = vmatpush.bf16.msrb.mxu3 %v5816_v58  ;;  %v1075_v11 = vpop.f32.mrf.mxu3  ;;  %v1148_v33 = vpack.c.bf16 %v1132_v27, %v1132_v27 }
 0x6c6   :  { %2115 = vmatpush.bf16.msra.mxu2 %v5840_v60  ;;  %v1114_v9 = vpop.f32.mrf.mxu2  ;;  %v1076_v2 = vadd.f32 %v1075_v11, %v727_v20 }
 0x6c7   :  { %2091 = vmatpush.bf16.msra.mxu0 %v5822_v62  ;;  %v1090_v6 = vpop.f32.mrf.mxu0  ;;  %v1115_v31 = vadd.f32 %v1114_v9, %v730_v22 }
 0x6c8   :  { %2104 = vmatpush.bf16.msra.mxu1 %v5830_v63  ;;  %v1103_v14 = vpop.f32.mrf.mxu1  ;;  %v1130_v35 = vmax.f32 %v1076_v2, 0.0 }
 0x6c9   :  { %2077 = vmatpush.bf16.msrb.mxu3 %v5815_v0  ;;  %v1133_v37 = vmax.f32 %v1115_v31, 0.0 }
 0x6ca   :  { %2116 = vmatpush.bf16.msra.mxu2 %v5839_v1  ;;  %v1146_v38 = vpack.c.bf16 %v1130_v35, %v1130_v35  ;;  %v5844_v35 = vld [vmem:[%s7674_s2 + $0x200] sm:$0xf0] }
 0x6cb   :  { %2092 = vmatpush.bf16.msra.mxu0 %v5821_v4  ;;  %v1149_v39 = vpack.c.bf16 %v1133_v37, %v1133_v37  ;;  %v5843_v37 = vld [vmem:[%s7674_s2 + $0xd8] sm:$0xf0] }
 0x6cc   :  { %2105 = vmatpush.bf16.msra.mxu1 %v5829_v7 }
 0x6cd   :  { %2078 = vmatpush.bf16.msrb.mxu3 %v5814_v10  ;;  %v1077_v25 = vpop.f32.mrf.mxu3 }
 0x6ce   :  { %2117 = vmatpush.bf16.msra.mxu2 %v5838_v12  ;;  %v1116_v28 = vpop.f32.mrf.mxu2 }
 0x6cf   :  { %2093 = vmatpush.bf16.msra.mxu0 %v5820_v15 }
 0x6d0   :  { %2106 = vmatpush.bf16.msra.mxu1 %v5828_v18 }
 0x6d1   :  { %2079 = vmatpush.bf16.msrb.mxu3 %v5813_v17 }
 0x6d2   :  { %2118 = vmatpush.bf16.msra.mxu2 %v5837_v21 }
 0x6d3   :  { %2094 = vmatpush.bf16.msra.mxu0 %v5819_v23 }
 0x6d4   :  { %2107 = vmatpush.bf16.msra.mxu1 %v5827_v26 }
 0x6d5   :  { %2080 = vmatpush.bf16.msrb.mxu3 %v5812_v29 }
 0x6d6   :  { %2119 = vmatpush.bf16.msra.mxu2 %v5836_v30  ;;  %2095 = vmatmul.bf16.vlgmr.msra.gmra.mxu0 %v1147_v32 }
 0x6d7   :  { %2108 = vmatmul.bf16.vlgmr.msra.gmra.mxu1 %v1148_v33 }
 0x6d9   :  { %2081 = vmatpush.bf16.msrb.mxu3 %v5811_v34  ;;  %v4993_v34 = vld [vmem:[%s7674_s2 + $0x170] sm:$0xf] }
 0x6da   :  { %2120 = vmatpush.bf16.msra.mxu2 %v5835_v36  ;;  %v4989_v36 = vld [vmem:[%s7674_s2 + $0x48] sm:$0xf] }
 0x6dc   :  { %2082 = vmatmul.bf16.vlgmr.msrb.gmra.mxu3 %v1146_v38  ;;  %v4990_v38 = vor.u32 %v5843_v37, %v4989_v36 }
 0x6dd   :  { %2121 = vmatmul.bf16.vlgmr.msra.gmra.mxu2 %v1149_v39 }
 0x713   :  { %v1940_v40 = vpop.f32.mrf.mxu0 }
 0x714   :  { %v1953_v41 = vpop.f32.mrf.mxu1 }
 0x71b   :  { %v1942_v42 = vpop.f32.mrf.mxu0 }
 0x71c   :  { %v1955_v43 = vpop.f32.mrf.mxu1 }
 0x71f   :  { %v1927_v44 = vpop.f32.mrf.mxu3 }
 0x720   :  { %v1966_v45 = vpop.f32.mrf.mxu2  ;;  %v1928_v55 = vadd.f32 %v1927_v44, %v360_v53 }
 0x722   :  { %v1941_v58 = vadd.f32 %v1940_v40, %v1928_v55  ;;  %v2447_v55 = vld [vmem:[%s7676_s4 + $0x82] ss:$0 sm:$0xff] }
 0x723   :  { %v1992_v46 = vpop.f32.mrf.mxu0 }
 0x724   :  { %v2005_v47 = vpop.f32.mrf.mxu1  ;;  %v1954_v61 = vadd.f32 %v1953_v41, %v1941_v58 }
 0x726   :  { %v1967_v0 = vadd.f32 %v1966_v45, %v1954_v61 }
 0x727   :  { %v1929_v48 = vpop.f32.mrf.mxu3 }
 0x728   :  { %v1968_v49 = vpop.f32.mrf.mxu2  ;;  %v350_v48 = vld [vmem:[%s7676_s4 + $0x6] ss:$0 sm:$0xff] }
 0x72b   :  { %v1994_v50 = vpop.f32.mrf.mxu0 }
 0x72c   :  { %v2007_v51 = vpop.f32.mrf.mxu1 }
 0x72d   :  { %v351_v51 = vld [vmem:[%s7676_s4 + $0x7] ss:$0 sm:$0xff] }
 0x72f   :  { %v1979_v52 = vpop.f32.mrf.mxu3 }
 0x730   :  { %v2018_v54 = vpop.f32.mrf.mxu2  ;;  %v1980_v5 = vadd.f32 %v1979_v52, %v1967_v0 }
 0x732   :  { %v1993_v11 = vadd.f32 %v1992_v46, %v1980_v5 }
 0x733   :  { %v2044_v56 = vpop.f32.mrf.mxu0 }
 0x734   :  { %v2057_v57 = vpop.f32.mrf.mxu1  ;;  %v2006_v9 = vadd.f32 %v2005_v47, %v1993_v11 }
 0x736   :  { %v2019_v10 = vadd.f32 %v2018_v54, %v2006_v9 }
 0x737   :  { %v1981_v59 = vpop.f32.mrf.mxu3 }
 0x738   :  { %v2020_v60 = vpop.f32.mrf.mxu2 }
 0x73b   :  { %v2046_v62 = vpop.f32.mrf.mxu0 }
 0x73c   :  { %v2059_v63 = vpop.f32.mrf.mxu1 }
 0x73f   :  { %v2031_v1 = vpop.f32.mrf.mxu3 }
 0x740   :  { %v2070_v4 = vpop.f32.mrf.mxu2  ;;  %v2032_v6 = vadd.f32 %v2031_v1, %v2019_v10 }
 0x742   :  { %v2045_v15 = vadd.f32 %v2044_v56, %v2032_v6 }
 0x744   :  { %v2058_v16 = vadd.f32 %v2057_v57, %v2045_v15 }
 0x746   :  { %v2071_v17 = vadd.f32 %v2070_v4, %v2058_v16 }
 0x747   :  { %v2033_v7 = vpop.f32.mrf.mxu3 }
 0x748   :  { %v2072_v8 = vpop.f32.mrf.mxu2 }
 0x753   :  { %v2096_v12 = vpop.f32.mrf.mxu0 }
 0x754   :  { %v2109_v14 = vpop.f32.mrf.mxu1 }
 0x75b   :  { %v2098_v18 = vpop.f32.mrf.mxu0 }
 0x75c   :  { %v2111_v19 = vpop.f32.mrf.mxu1 }
 0x75f   :  { %v2083_v20 = vpop.f32.mrf.mxu3 }
 0x760   :  { %v2084_v21 = vadd.f32 %v2083_v20, %v2071_v17  ;;  %v2122_v22 = vpop.f32.mrf.mxu2 }
 0x762   :  { %v2097_v23 = vadd.f32 %v2096_v12, %v2084_v21 }
 0x764   :  { %v2110_v24 = vadd.f32 %v2109_v14, %v2097_v23 }
 0x766   :  { %v2123_v25 = vadd.f32 %v2122_v22, %v2110_v24 }
 0x767   :  { %v2085_v26 = vpop.f32.mrf.mxu3 }
 0x768   :  { %v2124_v27 = vpop.f32.mrf.mxu2  ;;  %v2126_v28 = vadd.f32 %v2123_v25, %v6351_v13  ;;  %v4994_v13 = vor.u32 %v5844_v35, %v4993_v34 }
 0x76a   :  { %v2127_v29 = vsel %vm374_vm1, %v2126_v28, 0.0  ;;  %2484 = vmatpush.bf16.msra.mxu3 %v4994_v13 }
 0x76b   :  { %2128 = vadd.xlane.f32.xlu1 %v2127_v29 }
 0x76e   :  { %2485 = vmatpush.bf16.msra.mxu3 %v4990_v38 }
 0x7de   :  { %v2129_v2 = vpop.xlane.xlu1 %2128 }
 0x7df   :  { %v2130_v30 = vmul.f32 %v2129_v2, %v6224_v3 }
 0x7e1   :  { %v2131_v31 = vsub.f32 %v2126_v28, %v2130_v30 }
 0x7e3   :  { %v2132_v32 = vmul.f32 %v2131_v31, %v2131_v31 }
 0x7e5   :  { %v2133_v33 = vsel %vm374_vm1, %v2132_v32, 0.0 }
 0x7e6   :  { %2134 = vadd.xlane.f32.xlu1 %v2133_v33 }
 0x859   :  { %v2135_v39 = vpop.xlane.xlu1 %2134 }
 0x85a   :  { %v2136_v40 = vmul.f32 %v2135_v39, %v6224_v3 }
 0x85c   :  { %v2137_v41 = vadd.f32 1e-05, %v2136_v40 }
 0x85e   :  { %6039 = vrsqrt.f32 %v2137_v41  ;;  %vm2144_vm10 = vweird.f32 %v2137_v41 }
 0x864   :  { %v6040_v42 = vpop.eup %6039 }
 0x865   :  { %v2139_v43 = vmul.f32 %v6040_v42, %v2137_v41  ;;  %vm2145_vm9 = vweird.f32 %v6040_v42 }
 0x866   :  { %vm2146_vm11 = vmor %vm2144_vm10, %vm2145_vm9 }
 0x867   :  { %v2140_v44 = vmul.f32 %v6040_v42, %v2139_v43 }
 0x869   :  { %v2141_v45 = vmul.f32 0.5, %v2140_v44 }
 0x86b   :  { %v2142_v46 = vsub.f32 1.5, %v2141_v45 }
 0x86d   :  { %v2143_v47 = vmul.f32 %v6040_v42, %v2142_v46 }
 0x86f   :  { %v2147_v49 = vsel %vm2146_vm11, %v6040_v42, %v2143_v47 }
 0x870   :  { %v2148_v50 = vmul.f32 %v2147_v49, %v2131_v31 }
 0x872   :  { %v2149_v52 = vmul.f32 %v2148_v50, %v350_v48 }
 0x874   :  { %v6912_v53 = vadd.f32 %v2149_v52, %v351_v51 }
 0x876   :  { %v2462_v54 = vpack.c.bf16 %v6912_v53, %v6912_v53 }
 0x878   :  { %4995 = vmatmul.msk.bf16.vlgmr.msra.gmra.mxu3 %vm374_vm1, %v2462_v54 }
 0x8fb   :  { %v2487_v56 = vpop.f32.mrf.mxu3 }
 0x8fc   :  { %v2488_v57 = vadd.f32 %v2487_v56, %v2447_v55 }
 0x8fe   :  { %2492 = vrot.lane.b32.xlu2 %v2488_v57, %s6088_s8  ;;  %2498 = vrot.lane.b32.xlu0 %v2488_v57, %s6087_s7  ;;  %v2501_v9 = vpack.c.bf16 %v2488_v57, %v2488_v57 }
 0x8ff   :  { %2495 = vrot.lane.b32.xlu1 %v2488_v57, %s6089_s9 }
 0x900   :  { %v2506_v10 = vunpack.c.l.b16 %v2501_v9 }
 0x902   :  { %v2507_v6 = vpack.c.b16 %v2506_v10, %v2506_v10 }
 0x903   :  { %v2489_v58 = vpop.f32.mrf.mxu3 }
 0x958   :  { %v2493_v59 = vpop.permute.xlu2 %2492 }
 0x959   :  { %v2502_v60 = vpack.c.bf16 %v2493_v59, %v2493_v59 }
 0x95b   :  { %v2530_v61 = vunpack.c.l.b16 %v2502_v60 }
 0x95d   :  { %v2531_v62 = vpack.c.b16 %v2530_v61, %v2530_v61 }
 0x95f   :  { %2532 = vrot.lane.b32.xlu2 %v2531_v62, %s6090_s10 }
 0x970   :  { %v2499_v63 = vpop.permute.xlu0 %2498 }
 0x971   :  { %v2504_v0 = vpack.c.bf16 %v2499_v63, %v2499_v63  ;;  %v2496_v1 = vpop.permute.xlu1 %2495 }
 0x972   :  { %v2503_v4 = vpack.c.bf16 %v2496_v1, %v2496_v1 }
 0x973   :  { %v2578_v5 = vunpack.c.l.b16 %v2504_v0 }
 0x974   :  { %v2554_v11 = vunpack.c.l.b16 %v2503_v4 }
 0x975   :  { %v2579_v7 = vpack.c.b16 %v2578_v5, %v2578_v5 }
 0x976   :  { %v2555_v8 = vpack.c.b16 %v2554_v11, %v2554_v11 }
 0x977   :  { %2580 = vrot.lane.b32.xlu1 %v2579_v7, %s6090_s10 }
 0x978   :  { %2556 = vrot.lane.b32.xlu0 %v2555_v8, %s6090_s10 }
 0x980   :  { %2508 = vrot.lane.b32.xlu0 %v2507_v6, %s6090_s10 }
 0x9b9   :  { %v2533_v12 = vpop.permute.xlu2 %2532 }
 0x9ba   :  { %v2538_v14 = vsel %vm410_vm2, %v2533_v12, 0 }
 0x9bb   :  { %2547 = vmatpush.bf16.xpose.msrb.mxu1 %v2538_v14 }
 0x9c2   :  { %4997 = vmatmul.msk.bf16.vlgmr.msrb.gmra.mxu1 %vm410_vm2, %v2502_v60 }
 0x9e9   :  { %v2581_v15 = vpop.permute.xlu1 %2580 }
 0x9ea   :  { %v2557_v16 = vpop.permute.xlu0 %2556  ;;  %v2586_v18 = vsel %vm410_vm2, %v2581_v15, 0 }
 0x9eb   :  { %v2562_v19 = vsel %vm410_vm2, %v2557_v16, 0  ;;  %2595 = vmatpush.bf16.xpose.msrb.mxu3 %v2586_v18 }
 0x9ec   :  { %2571 = vmatpush.bf16.xpose.msrb.mxu2 %v2562_v19 }
 0x9f2   :  { %v2509_v17 = vpop.permute.xlu0 %2508  ;;  %4999 = vmatmul.msk.bf16.vlgmr.msrb.gmra.mxu3 %vm410_vm2, %v2504_v0 }
 0x9f3   :  { %v2514_v20 = vsel %vm410_vm2, %v2509_v17, 0  ;;  %4998 = vmatmul.msk.bf16.vlgmr.msrb.gmra.mxu2 %vm410_vm2, %v2503_v4 }
 0x9f4   :  { %2523 = vmatpush.bf16.xpose.msrb.mxu0 %v2514_v20 }
 0x9fb   :  { %4996 = vmatmul.msk.bf16.vlgmr.msrb.gmra.mxu0 %vm410_vm2, %v2501_v9 }
 0xa3f   :  { %v2549_v21 = vpop.f32.mrf.mxu1 }
 0xa40   :  { %v2604_v22 = vsel %vm410_vm2, %v2549_v21, -inf }
 0xa41   :  { %2605 = vmax.xlane.f32.xlu0 %v2604_v22  ;;  %v5010_v22 = vld [vmem:[%s7674_s2 + $0x174] sm:$0xf] }
 0xa47   :  { %v2551_v23 = vpop.f32.mrf.mxu1 }
 0xa48   :  { %v5846_v23 = vld [vmem:[%s7674_s2 + $0x204] sm:$0xf0] }
 0xa75   :  { %v2597_v24 = vpop.f32.mrf.mxu3 }
 0xa76   :  { %v2573_v25 = vpop.f32.mrf.mxu2  ;;  %v2610_v26 = vsel %vm410_vm2, %v2597_v24, -inf }
 0xa77   :  { %v2607_v27 = vsel %vm410_vm2, %v2573_v25, -inf  ;;  %2611 = vmax.xlane.f32.xlu2 %v2610_v26  ;;  %v5006_v26 = vld [vmem:[%s7674_s2 + $0x4c] sm:$0xf] }
 0xa78   :  { %2608 = vmax.xlane.f32.xlu1 %v2607_v27  ;;  %v2525_v28 = vpop.f32.mrf.mxu0  ;;  %v5845_v27 = vld [vmem:[%s7674_s2 + $0xdc] sm:$0xf0] }
 0xa79   :  { %v2601_v30 = vsel %vm410_vm2, %v2525_v28, -inf }
 0xa7d   :  { %v2599_v29 = vpop.f32.mrf.mxu3 }
 0xa7e   :  { %v2575_v2 = vpop.f32.mrf.mxu2 }
 0xa80   :  { %2602 = vmax.xlane.f32.xlu1 %v2601_v30  ;;  %v2527_v31 = vpop.f32.mrf.mxu0 }
 0xab4   :  { %v2606_v32 = vpop.xlane.xlu0 %2605 }
 0xab5   :  { %v2614_v33 = vsub.f32 %v2549_v21, %v2606_v32 }
 0xab7   :  { %v2619_v34 = vmul.f32 1.442695, %v2614_v33 }
 0xab9   :  { %6041 = vpow2.f32 %v2619_v34 }
 0xabf   :  { %v6042_v35 = vpop.eup %6041 }
 0xac0   :  { %v2628_v13 = vsel %vm410_vm2, %v6042_v35, 0.0 }
 0xac1   :  { %2629 = vadd.xlane.f32.xlu1 %v2628_v13 }
 0xada   :  { %2670 = vrot.lane.b32.xlu1 %v2531_v62, %s6091_s11 }
 0xaea   :  { %v2612_v36 = vpop.xlane.xlu2 %2611 }
 0xaeb   :  { %v2616_v37 = vsub.f32 %v2597_v24, %v2612_v36  ;;  %v2609_v38 = vpop.xlane.xlu1 %2608  ;;  %v5011_v24 = vor.u32 %v5846_v23, %v5010_v22 }
 0xaec   :  { %v2615_v39 = vsub.f32 %v2573_v25, %v2609_v38 }
 0xaed   :  { %v2623_v40 = vmul.f32 1.442695, %v2616_v37 }
 0xaee   :  { %v2621_v41 = vmul.f32 1.442695, %v2615_v39 }
 0xaef   :  { %6043 = vpow2.f32 %v2623_v40 }
 0xaf0   :  { %6045 = vpow2.f32 %v2621_v41 }
 0xaf3   :  { %v2603_v46 = vpop.xlane.xlu1 %2602 }
 0xaf4   :  { %v2613_v47 = vsub.f32 %v2525_v28, %v2603_v46  ;;  %v5007_v28 = vor.u32 %v5845_v27, %v5006_v26  ;;  %v5863_v46 = vld [vmem:[%s7674_s2 + $0x17c] sm:$0xf]  ;;  %v5033_v27 = vld [vmem:[%s7674_s2 + $0xf4] sm:$0xf0] }
 0xaf5   :  { %v6044_v42 = vpop.eup %6043 }
 0xaf6   :  { %v6046_v43 = vpop.eup %6045  ;;  %v2634_v44 = vsel %vm410_vm2, %v6044_v42, 0.0  ;;  %v2617_v48 = vmul.f32 1.442695, %v2613_v47 }
 0xaf7   :  { %v2631_v45 = vsel %vm410_vm2, %v6046_v43, 0.0  ;;  %2635 = vadd.xlane.f32.xlu0 %v2634_v44 }
 0xaf8   :  { %2632 = vadd.xlane.f32.xlu2 %v2631_v45  ;;  %6047 = vpow2.f32 %v2617_v48  ;;  %v5079_v45 = vld [vmem:[%s7674_s2 + $0x178] sm:$0xf]  ;;  %v5081_v48 = vld [vmem:[%s7674_s2 + $0x20c] sm:$0xf0] }
 0xafe   :  { %v6048_v49 = vpop.eup %6047 }
 0xaff   :  { %v2625_v50 = vsel %vm410_vm2, %v6048_v49, 0.0 }
 0xb0b   :  { %2712 = vrot.lane.b32.xlu0 %v2579_v7, %s6091_s11 }
 0xb10   :  { %2691 = vrot.lane.b32.xlu2 %v2555_v8, %s6091_s11 }
 0xb18   :  { %2649 = vrot.lane.b32.xlu2 %v2507_v6, %s6091_s11 }
 0xb34   :  { %v2630_v51 = vpop.xlane.xlu1 %2629 }
 0xb35   :  { %2626 = vadd.xlane.f32.xlu0 %v2625_v50  ;;  %6049 = vrcp.f32 %v2630_v51  ;;  %v5872_v50 = vld [vmem:[%s7674_s2 + $0x210] sm:$0xf0]  ;;  %v5084_v51 = vor.u32 %v5863_v46, %v5081_v48  ;;  %v5867_v46 = vld [vmem:[%s7674_s2 + $0x19c] sm:$0xf] }
 0xb3b   :  { %v6050_v52 = vpop.eup %6049 }
 0xb3c   :  { %v2642_v54 = vmul.f32 %v6050_v52, %v6042_v35  ;;  %v2448_v35 = vld [vmem:[%s7676_s4 + $0x83] ss:$0 sm:$0xff] }
 0xb3e   :  { %v2646_v57 = vpack.c.bf16 %v2642_v54, %v2642_v54  ;;  %v5864_v54 = vld [vmem:[%s7674_s2 + $0x184] sm:$0xf] }
 0xb4c   :  { %v2671_v55 = vpop.permute.xlu1 %2670 }
 0xb4d   :  { %v2676_v56 = vsel %vm555_vm3, %v2671_v55, 0  ;;  %v5089_v55 = vld [vmem:[%s7674_s2 + $0x214] sm:$0xf0] }
 0xb4e   :  { %2685 = vmatpush.bf16.msra.mxu1 %v2676_v56  ;;  %v5092_v56 = vor.u32 %v5864_v54, %v5089_v55 }
 0xb51   :  { %5001 = vmatmul.msk.bf16.vlgmr.msra.gmra.mxu1 %vm410_vm2, %v2646_v57  ;;  %v5015_v57 = vld [vmem:[%s7674_s2 + $0x50] sm:$0xf] }
 0xb6a   :  { %v2636_v59 = vpop.xlane.xlu0 %2635 }
 0xb6b   :  { %v2633_v58 = vpop.xlane.xlu2 %2632 }
 0xb6c   :  { %6051 = vrcp.f32 %v2633_v58  ;;  %v5855_v58 = vld [vmem:[%s7674_s2 + $0xe0] sm:$0xf0] }
 0xb6d   :  { %6053 = vrcp.f32 %v2636_v59  ;;  %v5847_v59 = vld [vmem:[%s7674_s2 + $0x54] sm:$0xf] }
 0xb72   :  { %v6052_v60 = vpop.eup %6051 }
 0xb73   :  { %v2643_v61 = vmul.f32 %v6052_v60, %v6046_v43  ;;  %v2692_v62 = vpop.permute.xlu2 %2691  ;;  %v6054_v1 = vpop.eup %6053  ;;  %v5016_v60 = vor.u32 %v5855_v58, %v5015_v57  ;;  %v5859_v57 = vld [vmem:[%s7674_s2 + $0x100] sm:$0xf0] }
 0xb74   :  { %v2697_v63 = vsel %vm555_vm3, %v2692_v62, 0  ;;  %v2644_v5 = vmul.f32 %v6054_v1, %v6044_v42  ;;  %v5023_v62 = vld [vmem:[%s7674_s2 + $0x58] sm:$0xf] }
 0xb75   :  { %v2647_v0 = vpack.c.bf16 %v2643_v61, %v2643_v61  ;;  %2706 = vmatpush.bf16.msra.mxu2 %v2697_v63  ;;  %v5017_v61 = vld [vmem:[%s7674_s2 + $0xe4] sm:$0xf0]  ;;  %v5856_v63 = vld [vmem:[%s7674_s2 + $0xe8] sm:$0xf0] }
 0xb76   :  { %v2648_v9 = vpack.c.bf16 %v2644_v5, %v2644_v5  ;;  %v5024_v1 = vor.u32 %v5856_v63, %v5023_v62  ;;  %v5025_v5 = vld [vmem:[%s7674_s2 + $0xec] sm:$0xf0]  ;;  %v5055_v62 = vld [vmem:[%s7674_s2 + $0x78] sm:$0xf]  ;;  %v5860_v63 = vld [vmem:[%s7674_s2 + $0x108] sm:$0xf0] }
 0xb78   :  { %5002 = vmatmul.msk.bf16.vlgmr.msra.gmra.mxu2 %vm410_vm2, %v2647_v0  ;;  %v5020_v0 = vor.u32 %v5847_v59, %v5017_v61  ;;  %v5049_v61 = vld [vmem:[%s7674_s2 + $0x104] sm:$0xf0] }
 0xb79   :  { %3019 = vmatpush.bf16.msrb.mxu2 %v5084_v51  ;;  %v5121_v51 = vld [vmem:[%s7674_s2 + $0x234] sm:$0xf0] }
 0xb7b   :  { %v2650_v4 = vpop.permute.xlu2 %2649 }
 0xb7c   :  { %v2655_v11 = vsel %vm555_vm3, %v2650_v4, 0  ;;  %v5848_v4 = vld [vmem:[%s7674_s2 + $0x5c] sm:$0xf] }
 0xb7d   :  { %2664 = vmatpush.bf16.msra.mxu0 %v2655_v11  ;;  %v2713_v7 = vpop.permute.xlu0 %2712  ;;  %v5028_v11 = vor.u32 %v5848_v4, %v5025_v5  ;;  %3020 = vmatpush.bf16.msrb.mxu2 %v5020_v0  ;;  %v5852_v0 = vld [vmem:[%s7674_s2 + $0x7c] sm:$0xf] }
 0xb7e   :  { %v2718_v8 = vsel %vm555_vm3, %v2713_v7, 0 }
 0xb7f   :  { %2727 = vmatpush.bf16.msra.mxu3 %v2718_v8  ;;  %v5095_v8 = vld [vmem:[%s7674_s2 + $0x188] sm:$0xf] }
 0xb81   :  { %2770 = vmatpush.bf16.msrb.mxu0 %v5011_v24  ;;  %v5857_v24 = vld [vmem:[%s7674_s2 + $0xf0] sm:$0xf0] }
 0xb82   :  { %5003 = vmatmul.msk.bf16.vlgmr.msra.gmra.mxu3 %vm410_vm2, %v2648_v9  ;;  %v5873_v9 = vld [vmem:[%s7674_s2 + $0x218] sm:$0xf0] }
 0xb85   :  { %2771 = vmatpush.bf16.msrb.mxu0 %v5007_v28  ;;  %v5039_v28 = vld [vmem:[%s7674_s2 + $0x68] sm:$0xf] }
 0xba8   :  { %v2627_v10 = vpop.xlane.xlu0 %2626 }
 0xba9   :  { %6055 = vrcp.f32 %v2627_v10  ;;  %v5865_v10 = vld [vmem:[%s7674_s2 + $0x18c] sm:$0xf] }
 0xbaf   :  { %v6056_v6 = vpop.eup %6055 }
 0xbb0   :  { %v2641_v12 = vmul.f32 %v6056_v6, %v6048_v49  ;;  %v5087_v49 = vld [vmem:[%s7674_s2 + $0x180] sm:$0xf] }
 0xbb1   :  { %v5088_v52 = vor.u32 %v5872_v50, %v5087_v49  ;;  %v5876_v49 = vld [vmem:[%s7674_s2 + $0x230] sm:$0xf0]  ;;  %v5868_v50 = vld [vmem:[%s7674_s2 + $0x1a4] sm:$0xf] }
 0xbb2   :  { %v2645_v14 = vpack.c.bf16 %v2641_v12, %v2641_v12  ;;  %v5096_v12 = vor.u32 %v5873_v9, %v5095_v8  ;;  %v5124_v59 = vor.u32 %v5868_v50, %v5121_v51  ;;  %v5127_v8 = vld [vmem:[%s7674_s2 + $0x1a8] sm:$0xf]  ;;  %v5877_v9 = vld [vmem:[%s7674_s2 + $0x238] sm:$0xf0]  ;;  %v5881_v51 = vld [vmem:[%s7675_s3 + $0x410] sm:$0xff] }
 0xbb3   :  { %3032 = vmatpush.bf16.msrb.mxu3 %v5088_v52  ;;  %v5898_v50 = vld [vmem:[%s7675_s3 + $0x498] sm:$0xff] }
 0xbb4   :  { %5000 = vmatmul.msk.bf16.vlgmr.msra.gmra.mxu0 %vm410_vm2, %v2645_v14  ;;  %v5097_v14 = vld [vmem:[%s7674_s2 + $0x21c] sm:$0xf0] }
 0xbb5   :  { %3045 = vmatpush.bf16.msra.mxu0 %v5092_v56  ;;  %v5047_v56 = vld [vmem:[%s7674_s2 + $0x70] sm:$0xf] }
 0xbb6   :  { %v5048_v4 = vor.u32 %v5859_v57, %v5047_v56  ;;  %v5880_v56 = vld [vmem:[%s7675_s3 + $0x408] sm:$0xff] }
 0xbb7   :  { %3033 = vmatpush.bf16.msrb.mxu3 %v5024_v1  ;;  %v5057_v1 = vld [vmem:[%s7674_s2 + $0x10c] sm:$0xf0]  ;;  %v5904_v57 = vld [vmem:[%s7675_s3 + $0x4c8] sm:$0xff] }
 0xbb9   :  { %3046 = vmatpush.bf16.msra.mxu0 %v5028_v11  ;;  %v5056_v11 = vor.u32 %v5860_v63, %v5055_v62  ;;  %v5918_v62 = vld [vmem:[%s7675_s3 + $0x538] sm:$0xff] }
 0xbba   :  { %v5942_v63 = vld [vmem:[%s7675_s3 + $0x5f8] sm:$0xff] }
 0xbce   :  { %v2687_v15 = vpop.f32.mrf.mxu1 }
 0xbcf   :  { %2734 = vrot.lane.b32.xlu1 %v2687_v15, %s6093_s13  ;;  %v5103_v15 = vld [vmem:[%s7674_s2 + $0x190] sm:$0xf] }
 0xbd6   :  { %v2689_v16 = vpop.f32.mrf.mxu1 }
 0xbd7   :  { %v5874_v16 = vld [vmem:[%s7674_s2 + $0x220] sm:$0xf0] }
 0xbfb   :  { %v2708_v18 = vpop.f32.mrf.mxu2 }
 0xbfc   :  { %2738 = vrot.lane.b32.xlu2 %v2708_v18, %s6092_s12  ;;  %v5100_v18 = vor.u32 %v5865_v10, %v5097_v14  ;;  %v5869_v10 = vld [vmem:[%s7674_s2 + $0x1ac] sm:$0xf]  ;;  %v5878_v14 = vld [vmem:[%s7674_s2 + $0x240] sm:$0xf0] }
 0xbfe   :  { %3071 = vmatpush.bf16.msra.mxu2 %v5100_v18  ;;  %v5128_v18 = vor.u32 %v5877_v9, %v5127_v8  ;;  %v5925_v8 = vld [vmem:[%s7675_s3 + $0x570] sm:$0xff] }
 0xbff   :  { %v5933_v9 = vld [vmem:[%s7675_s3 + $0x5b0] sm:$0xff] }
 0xc03   :  { %v2710_v19 = vpop.f32.mrf.mxu2 }
 0xc04   :  { %v5104_v19 = vor.u32 %v5874_v16, %v5103_v15  ;;  %v5870_v15 = vld [vmem:[%s7674_s2 + $0x1b4] sm:$0xf]  ;;  %v5137_v16 = vld [vmem:[%s7674_s2 + $0x244] sm:$0xf0] }
 0xc05   :  { %v2729_v17 = vpop.f32.mrf.mxu3 }
 0xc06   :  { %2742 = vrot.lane.b32.xlu1 %v2729_v17, %s6094_s14  ;;  %v5866_v17 = vld [vmem:[%s7674_s2 + $0x194] sm:$0xf]  ;;  %3084 = vmatpush.bf16.msra.mxu3 %v5104_v19 }
 0xc0d   :  { %v2731_v20 = vpop.f32.mrf.mxu3 }
 0xc0e   :  { %v5105_v20 = vld [vmem:[%s7674_s2 + $0x224] sm:$0xf0] }
 0xc0f   :  { %v5108_v23 = vor.u32 %v5866_v17, %v5105_v20  ;;  %v5063_v17 = vld [vmem:[%s7674_s2 + $0x80] sm:$0xf]  ;;  %v5861_v20 = vld [vmem:[%s7674_s2 + $0x110] sm:$0xf0] }
 0xc31   :  { %v2666_v21 = vpop.f32.mrf.mxu0 }
 0xc39   :  { %v2668_v25 = vpop.f32.mrf.mxu0 }
 0xc3a   :  { %v5849_v25 = vld [vmem:[%s7674_s2 + $0x64] sm:$0xf] }
 0xc41   :  { %v2735_v29 = vpop.permute.xlu1 %2734 }
 0xc42   :  { %v2745_v30 = vsel %vm410_vm2, %v2666_v21, %v2735_v29  ;;  %v5031_v21 = vld [vmem:[%s7674_s2 + $0x60] sm:$0xf]  ;;  %v5858_v29 = vld [vmem:[%s7674_s2 + $0xf8] sm:$0xf0] }
 0xc43   :  { %v5032_v26 = vor.u32 %v5857_v24, %v5031_v21  ;;  %v5065_v24 = vld [vmem:[%s7674_s2 + $0x114] sm:$0xf0] }
 0xc56   :  { %v2739_v2 = vpop.permute.xlu2 %2738 }
 0xc57   :  { %v2746_v31 = vsel %vm33_vm0, %v2745_v30, %v2739_v2  ;;  %v5036_v2 = vor.u32 %v5849_v25, %v5033_v27  ;;  %v5040_v30 = vor.u32 %v5858_v29, %v5039_v28  ;;  %v5071_v25 = vld [vmem:[%s7674_s2 + $0x88] sm:$0xf]  ;;  %v5854_v27 = vld [vmem:[%s7674_s2 + $0x8c] sm:$0xf]  ;;  %v5073_v28 = vld [vmem:[%s7674_s2 + $0x11c] sm:$0xf0]  ;;  %v5064_v29 = vor.u32 %v5861_v20, %v5063_v17 }
 0xc58   :  { %v5914_v17 = vld [vmem:[%s7675_s3 + $0x518] sm:$0xff] }
 0xc59   :  { %3072 = vmatpush.bf16.msra.mxu2 %v5036_v2  ;;  %3085 = vmatpush.bf16.msra.mxu3 %v5040_v30  ;;  %v5938_v20 = vld [vmem:[%s7675_s3 + $0x5d8] sm:$0xff] }
 0xc78   :  { %v2743_v32 = vpop.permute.xlu1 %2742 }
 0xc79   :  { %v2747_v33 = vsel %vm649_vm4, %v2746_v31, %v2743_v32  ;;  %v5850_v31 = vld [vmem:[%s7674_s2 + $0x6c] sm:$0xf]  ;;  %v5041_v32 = vld [vmem:[%s7674_s2 + $0xfc] sm:$0xf0] }
 0xc7a   :  { %v2748_v34 = vpack.c.bf16 %v2747_v33, %v2747_v33  ;;  %v5044_v33 = vor.u32 %v5850_v31, %v5041_v32  ;;  %v5076_v31 = vor.u32 %v5854_v27, %v5073_v28  ;;  %v5886_v32 = vld [vmem:[%s7675_s3 + $0x438] sm:$0xff]  ;;  %v5921_v27 = vld [vmem:[%s7675_s3 + $0x550] sm:$0xff] }
 0xc7b   :  { %v5929_v28 = vld [vmem:[%s7675_s3 + $0x590] sm:$0xff] }
 0xc7c   :  { %5012 = vmatmul.msk.bf16.vlgmr.msrb.gmra.mxu0 %vm374_vm1, %v2748_v34 }
 0xc7d   :  { %3097 = vmatpush.bf16.msrb.mxu0 %v5108_v23  ;;  %v5853_v23 = vld [vmem:[%s7674_s2 + $0x84] sm:$0xf] }
 0xc7e   :  { %v5068_v2 = vor.u32 %v5853_v23, %v5065_v24  ;;  %v5922_v23 = vld [vmem:[%s7675_s3 + $0x558] sm:$0xff] }
 0xc7f   :  { %v5930_v24 = vld [vmem:[%s7675_s3 + $0x598] sm:$0xff] }
 0xc81   :  { %3098 = vmatpush.bf16.msrb.mxu0 %v5044_v33  ;;  %v5910_v33 = vld [vmem:[%s7675_s3 + $0x4f8] sm:$0xff] }
 0xcf9   :  { %v2773_v13 = vpop.f32.mrf.mxu0 }
 0xcfa   :  { %v2774_v36 = vadd.f32 %v2773_v13, %v2448_v35 }
 0xcfc   :  { %v2777_v37 = vadd.f32 %v2774_v36, %v6912_v53  ;;  %v5871_v53 = vld [vmem:[%s7674_s2 + $0x208] sm:$0xf0] }
 0xcfd   :  { %v5080_v47 = vor.u32 %v5871_v53, %v5079_v45  ;;  %v5111_v45 = vld [vmem:[%s7674_s2 + $0x198] sm:$0xf]  ;;  %v5875_v53 = vld [vmem:[%s7674_s2 + $0x228] sm:$0xf0] }
 0xcfe   :  { %v2778_v38 = vsel %vm374_vm1, %v2777_v37, 0.0  ;;  %v5112_v54 = vor.u32 %v5875_v53, %v5111_v45  ;;  %v5907_v45 = vld [vmem:[%s7675_s3 + $0x4e0] sm:$0xff] }
 0xcff   :  { %2779 = vadd.xlane.f32.xlu2 %v2778_v38  ;;  %3006 = vmatpush.bf16.msrb.mxu1 %v5080_v47  ;;  %v5119_v47 = vld [vmem:[%s7674_s2 + $0x1a0] sm:$0xf] }
 0xd00   :  { %v5120_v58 = vor.u32 %v5876_v49, %v5119_v47  ;;  %v5891_v53 = vld [vmem:[%s7675_s3 + $0x460] sm:$0xff]  ;;  %v5906_v47 = vld [vmem:[%s7675_s3 + $0x4d8] sm:$0xff] }
 0xd01   :  { %v2775_v39 = vpop.f32.mrf.mxu0  ;;  %v5890_v49 = vld [vmem:[%s7675_s3 + $0x458] sm:$0xff] }
 0xd02   :  { %v2449_v39 = vld [vmem:[%s7676_s4 + $0x84] ss:$0 sm:$0xff] }
 0xd03   :  { %3007 = vmatpush.bf16.msrb.mxu1 %v5016_v60  ;;  %v5851_v60 = vld [vmem:[%s7674_s2 + $0x74] sm:$0xf] }
 0xd04   :  { %v5052_v5 = vor.u32 %v5851_v60, %v5049_v61  ;;  %v5879_v60 = vld [vmem:[%s7675_s3 + $0x400] sm:$0xff] }
 0xd05   :  { %v5903_v61 = vld [vmem:[%s7675_s3 + $0x4c0] sm:$0xff] }
 0xd07   :  { %3058 = vmatpush.bf16.msra.mxu1 %v5096_v12  ;;  %v5135_v12 = vld [vmem:[%s7674_s2 + $0x1b0] sm:$0xf] }
 0xd08   :  { %v5136_v21 = vor.u32 %v5878_v14, %v5135_v12  ;;  %v5924_v12 = vld [vmem:[%s7675_s3 + $0x568] sm:$0xff] }
 0xd09   :  { %v5932_v14 = vld [vmem:[%s7675_s3 + $0x5a8] sm:$0xff] }
 0xd0b   :  { %3059 = vmatpush.bf16.msra.mxu1 %v5032_v26  ;;  %v5862_v26 = vld [vmem:[%s7674_s2 + $0x118] sm:$0xf0] }
 0xd0c   :  { %v5072_v30 = vor.u32 %v5862_v26, %v5071_v25  ;;  %v5912_v25 = vld [vmem:[%s7675_s3 + $0x508] sm:$0xff] }
 0xd0d   :  { %v5936_v26 = vld [vmem:[%s7675_s3 + $0x5c8] sm:$0xff] }
 0xd72   :  { %v2780_v40 = vpop.xlane.xlu2 %2779 }
 0xd73   :  { %v2781_v41 = vmul.f32 %v2780_v40, %v6224_v3 }
 0xd75   :  { %v6980_v42 = vsub.f32 %v2777_v37, %v2781_v41 }
 0xd77   :  { %v2783_v43 = vmul.f32 %v6980_v42, %v6980_v42 }
 0xd79   :  { %v2784_v44 = vsel %vm374_vm1, %v2783_v43, 0.0  ;;  %v2450_v43 = vld [vmem:[%s7676_s4 + $0x85] ss:$0 sm:$0xff] }
 0xd7a   :  { %2785 = vadd.xlane.f32.xlu1 %v2784_v44 }
 0xded   :  { %v2786_v7 = vpop.xlane.xlu1 %2785 }
 0xdee   :  { %v2787_v6 = vmul.f32 %v2786_v7, %v6224_v3  ;;  %v5060_v7 = vor.u32 %v5852_v0, %v5057_v1  ;;  %v5887_v0 = vld [vmem:[%s7675_s3 + $0x440] sm:$0xff] }
 0xdef   :  { %v5895_v1 = vld [vmem:[%s7675_s3 + $0x480] sm:$0xff] }
 0xdf0   :  { %v2788_v22 = vadd.f32 1e-05, %v2787_v6  ;;  %v5129_v6 = vld [vmem:[%s7674_s2 + $0x23c] sm:$0xf0] }
 0xdf1   :  { %v5132_v19 = vor.u32 %v5869_v10, %v5129_v6  ;;  %v5916_v10 = vld [vmem:[%s7675_s3 + $0x528] sm:$0xff] }
 0xdf2   :  { %6057 = vrsqrt.f32 %v2788_v22  ;;  %vm2795_vm13 = vweird.f32 %v2788_v22  ;;  %v5940_v6 = vld [vmem:[%s7675_s3 + $0x5e8] sm:$0xff] }
 0xdf8   :  { %v6058_v34 = vpop.eup %6057 }
 0xdf9   :  { %v2790_v35 = vmul.f32 %v6058_v34, %v2788_v22  ;;  %vm2796_vm12 = vweird.f32 %v6058_v34  ;;  %v5140_v22 = vor.u32 %v5870_v15, %v5137_v16  ;;  %v5915_v15 = vld [vmem:[%s7675_s3 + $0x520] sm:$0xff] }
 0xdfa   :  { %vm2797_vm14 = vmor %vm2795_vm13, %vm2796_vm12  ;;  %v5939_v16 = vld [vmem:[%s7675_s3 + $0x5e0] sm:$0xff] }
 0xdfb   :  { %v2791_v13 = vmul.f32 %v6058_v34, %v2790_v35  ;;  %v5902_v35 = vld [vmem:[%s7675_s3 + $0x4b8] sm:$0xff] }
 0xdfd   :  { %v2792_v36 = vmul.f32 0.5, %v2791_v13  ;;  %v5885_v13 = vld [vmem:[%s7675_s3 + $0x430] sm:$0xff] }
 0xdff   :  { %v2793_v37 = vsub.f32 1.5, %v2792_v36  ;;  %v5909_v36 = vld [vmem:[%s7675_s3 + $0x4f0] sm:$0xff] }
 0xe01   :  { %v2794_v38 = vmul.f32 %v6058_v34, %v2793_v37  ;;  %v5893_v37 = vld [vmem:[%s7675_s3 + $0x470] sm:$0xff] }
 0xe03   :  { %v2798_v40 = vsel %vm2797_vm14, %v6058_v34, %v2794_v38  ;;  %v5894_v34 = vld [vmem:[%s7675_s3 + $0x478] sm:$0xff]  ;;  %v5901_v38 = vld [vmem:[%s7675_s3 + $0x4b0] sm:$0xff] }
 0xe04   :  { %v2799_v41 = vmul.f32 %v2798_v40, %v6980_v42  ;;  %v5113_v42 = vld [vmem:[%s7674_s2 + $0x22c] sm:$0xf0]  ;;  %v5908_v40 = vld [vmem:[%s7675_s3 + $0x4e8] sm:$0xff] }
 0xe05   :  { %v5116_v55 = vor.u32 %v5867_v46, %v5113_v42  ;;  %v5899_v46 = vld [vmem:[%s7675_s3 + $0x4a0] sm:$0xff]  ;;  %v5882_v42 = vld [vmem:[%s7675_s3 + $0x418] sm:$0xff] }
 0xe06   :  { %v2800_v44 = vmul.f32 %v2799_v41, %v2449_v39  ;;  %v5884_v39 = vld [vmem:[%s7675_s3 + $0x428] sm:$0xff] }
 0xe07   :  { %v5892_v41 = vld [vmem:[%s7675_s3 + $0x468] sm:$0xff] }
 0xe08   :  { %v7104_v48 = vadd.f32 %v2800_v44, %v2450_v43  ;;  %v5900_v43 = vld [vmem:[%s7675_s3 + $0x4a8] sm:$0xff]  ;;  %v5883_v44 = vld [vmem:[%s7675_s3 + $0x420] sm:$0xff] }
 0xe0a   :  { %v7117_v52 = vpack.c.bf16 %v7104_v48, %v7104_v48 }
 0xe0c   :  { %5141 = vmatmul.msk.bf16.vlgmr.msrb.gmra.mxu1 %vm374_vm1, %v7117_v52  ;;  %5142 = vmatmul.msk.bf16.vlgmr.msrb.gmra.mxu2 %vm374_vm1, %v7117_v52 }
 0xe0d   :  { %5143 = vmatmul.msk.bf16.vlgmr.msrb.gmra.mxu3 %vm374_vm1, %v7117_v52  ;;  %5144 = vmatmul.msk.bf16.vlgmr.msra.gmra.mxu0 %vm374_vm1, %v7117_v52 }
 0xe0e   :  { %3110 = vmatpush.bf16.msrb.mxu1 %v5112_v54  ;;  %3123 = vmatpush.bf16.msrb.mxu2 %v5116_v55  ;;  %v5905_v54 = vld [vmem:[%s7675_s3 + $0x4d0] sm:$0xff] }
 0xe0f   :  { %3136 = vmatpush.bf16.msrb.mxu3 %v5120_v58  ;;  %3149 = vmatpush.bf16.msra.mxu0 %v5124_v59  ;;  %v5889_v55 = vld [vmem:[%s7675_s3 + $0x450] sm:$0xff]  ;;  %v5888_v58 = vld [vmem:[%s7675_s3 + $0x448] sm:$0xff] }
 0xe10   :  { %v5896_v59 = vld [vmem:[%s7675_s3 + $0x488] sm:$0xff] }
 0xe12   :  { %3111 = vmatpush.bf16.msrb.mxu1 %v5048_v4  ;;  %3124 = vmatpush.bf16.msrb.mxu2 %v5052_v5  ;;  %v5926_v4 = vld [vmem:[%s7675_s3 + $0x578] sm:$0xff] }
 0xe13   :  { %3137 = vmatpush.bf16.msrb.mxu3 %v5056_v11  ;;  %3150 = vmatpush.bf16.msra.mxu0 %v5060_v7  ;;  %v5934_v5 = vld [vmem:[%s7675_s3 + $0x5b8] sm:$0xff]  ;;  %v5917_v11 = vld [vmem:[%s7675_s3 + $0x530] sm:$0xff] }
 0xe14   :  { %v5941_v7 = vld [vmem:[%s7675_s3 + $0x5f0] sm:$0xff] }
 0xe1c   :  { %5145 = vmatmul.msk.bf16.vlgmr.msra.gmra.mxu1 %vm374_vm1, %v7117_v52  ;;  %5146 = vmatmul.msk.bf16.vlgmr.msra.gmra.mxu2 %vm374_vm1, %v7117_v52 }
 0xe1d   :  { %5147 = vmatmul.msk.bf16.vlgmr.msra.gmra.mxu3 %vm374_vm1, %v7117_v52  ;;  %5148 = vmatmul.msk.bf16.vlgmr.msrb.gmra.mxu0 %vm374_vm1, %v7117_v52 }
 0xe1e   :  { %3162 = vmatpush.bf16.msra.mxu1 %v5128_v18  ;;  %3175 = vmatpush.bf16.msra.mxu2 %v5132_v19  ;;  %v5923_v18 = vld [vmem:[%s7675_s3 + $0x560] sm:$0xff] }
 0xe1f   :  { %3188 = vmatpush.bf16.msra.mxu3 %v5136_v21  ;;  %3201 = vmatpush.bf16.msrb.mxu0 %v5140_v22  ;;  %v5931_v19 = vld [vmem:[%s7675_s3 + $0x5a0] sm:$0xff]  ;;  %v5913_v21 = vld [vmem:[%s7675_s3 + $0x510] sm:$0xff] }
 0xe20   :  { %v5937_v22 = vld [vmem:[%s7675_s3 + $0x5d0] sm:$0xff] }
 0xe22   :  { %3163 = vmatpush.bf16.msra.mxu1 %v5064_v29  ;;  %3176 = vmatpush.bf16.msra.mxu2 %v5068_v2  ;;  %v5911_v29 = vld [vmem:[%s7675_s3 + $0x500] sm:$0xff] }
 0xe23   :  { %3189 = vmatpush.bf16.msra.mxu3 %v5072_v30  ;;  %3202 = vmatpush.bf16.msrb.mxu0 %v5076_v31  ;;  %v5935_v2 = vld [vmem:[%s7675_s3 + $0x5c0] sm:$0xff]  ;;  %v5920_v30 = vld [vmem:[%s7675_s3 + $0x548] sm:$0xff] }
 0xe24   :  { %v5928_v31 = vld [vmem:[%s7675_s3 + $0x588] sm:$0xff] }
 0xe2c   :  { %5149 = vmatmul.msk.bf16.vlgmr.msrb.gmra.mxu1 %vm374_vm1, %v7117_v52  ;;  %5150 = vmatmul.msk.bf16.vlgmr.msrb.gmra.mxu2 %vm374_vm1, %v7117_v52 }
 0xe2d   :  { %5151 = vmatmul.msk.bf16.vlgmr.msrb.gmra.mxu3 %vm374_vm1, %v7117_v52  ;;  %5152 = vmatmul.msk.bf16.vlgmr.msra.gmra.mxu0 %vm374_vm1, %v7117_v52 }
 0xe2e   :  { %4008 = vmatpush.bf16.msrb.mxu1 %v5886_v32  ;;  %4047 = vmatpush.bf16.msra.mxu0 %v5910_v33  ;;  %v5919_v32 = vld [vmem:[%s7675_s3 + $0x540] sm:$0xff] }
 0xe2f   :  { %4021 = vmatpush.bf16.msrb.mxu2 %v5894_v34  ;;  %4034 = vmatpush.bf16.msrb.mxu3 %v5902_v35  ;;  %v5927_v33 = vld [vmem:[%s7675_s3 + $0x580] sm:$0xff] }
 0xe30   :  { %v4983_v34 = vld [vmem:[%s7676_s4 + $0x100] ss:$8 sm:$0xf] }
 0xe31   :  { %v4984_v35 = vld [vmem:[%s7676_s4 + $0x100] ss:$8 sm:$0xf0] }
 0xe32   :  { %4009 = vmatpush.bf16.msrb.mxu1 %v5885_v13  ;;  %4048 = vmatpush.bf16.msra.mxu0 %v5909_v36  ;;  %v7421_v13 = vor.u32 %v4984_v35, %v4983_v34 }
 0xe33   :  { %4022 = vmatpush.bf16.msrb.mxu2 %v5893_v37  ;;  %4035 = vmatpush.bf16.msrb.mxu3 %v5901_v38 }
 0xe34   :  { %v2805_v36 = vperm.slane %v7421_v13, 0  ;;  %v2808_v37 = vperm.slane %v7421_v13, 3 }
 0xe36   :  { %4010 = vmatpush.bf16.msrb.mxu1 %v5884_v39  ;;  %4049 = vmatpush.bf16.msra.mxu0 %v5908_v40 }
 0xe37   :  { %4023 = vmatpush.bf16.msrb.mxu2 %v5892_v41  ;;  %4036 = vmatpush.bf16.msrb.mxu3 %v5900_v43 }
 0xe3a   :  { %4011 = vmatpush.bf16.msrb.mxu1 %v5883_v44  ;;  %4050 = vmatpush.bf16.msra.mxu0 %v5907_v45  ;;  %v2806_v44 = vperm.slane %v7421_v13, 1 }
 0xe3b   :  { %4024 = vmatpush.bf16.msrb.mxu2 %v5891_v53  ;;  %4037 = vmatpush.bf16.msrb.mxu3 %v5899_v46  ;;  %v2807_v53 = vperm.slane %v7421_v13, 2  ;;  %v5950_v46 = vld [vmem:[%s7675_s3 + $0x638] sm:$0xff] }
 0xe3c   :  { %5153 = vmatmul.msk.bf16.vlgmr.msra.gmra.mxu1 %vm374_vm1, %v7117_v52  ;;  %5154 = vmatmul.msk.bf16.vlgmr.msra.gmra.mxu2 %vm374_vm1, %v7117_v52 }
 0xe3d   :  { %5155 = vmatmul.msk.bf16.vlgmr.msra.gmra.mxu3 %vm374_vm1, %v7117_v52  ;;  %5156 = vmatmul.msk.bf16.vlgmr.msrb.gmra.mxu0 %vm374_vm1, %v7117_v52  ;;  %v5897_v52 = vld [vmem:[%s7675_s3 + $0x490] sm:$0xff] }
 0xe3e   :  { %4012 = vmatpush.bf16.msrb.mxu1 %v5882_v42  ;;  %4051 = vmatpush.bf16.msra.mxu0 %v5906_v47  ;;  %v5974_v47 = vld [vmem:[%s7675_s3 + $0x6f8] sm:$0xff] }
 0xe3f   :  { %4025 = vmatpush.bf16.msrb.mxu2 %v5890_v49  ;;  %4038 = vmatpush.bf16.msrb.mxu3 %v5898_v50 }
 0xe42   :  { %4013 = vmatpush.bf16.msrb.mxu1 %v5881_v51  ;;  %4052 = vmatpush.bf16.msra.mxu0 %v5905_v54 }
 0xe43   :  { %4026 = vmatpush.bf16.msrb.mxu2 %v5889_v55  ;;  %4039 = vmatpush.bf16.msrb.mxu3 %v5897_v52 }
 0xe46   :  { %4014 = vmatpush.bf16.msrb.mxu1 %v5880_v56  ;;  %4053 = vmatpush.bf16.msra.mxu0 %v5904_v57  ;;  %v5949_v56 = vld [vmem:[%s7675_s3 + $0x630] sm:$0xff] }
 0xe47   :  { %4027 = vmatpush.bf16.msrb.mxu2 %v5888_v58  ;;  %4040 = vmatpush.bf16.msrb.mxu3 %v5896_v59  ;;  %v5973_v59 = vld [vmem:[%s7675_s3 + $0x6f0] sm:$0xff] }
 0xe4a   :  { %4015 = vmatpush.bf16.msrb.mxu1 %v5879_v60  ;;  %4054 = vmatpush.bf16.msra.mxu0 %v5903_v61  ;;  %v5958_v61 = vld [vmem:[%s7675_s3 + $0x678] sm:$0xff] }
 0xe4b   :  { %4028 = vmatpush.bf16.msrb.mxu2 %v5887_v0  ;;  %4041 = vmatpush.bf16.msrb.mxu3 %v5895_v1  ;;  %v5948_v1 = vld [vmem:[%s7675_s3 + $0x628] sm:$0xff] }
 0xe4e   :  { %4060 = vmatpush.bf16.msra.mxu1 %v5918_v62  ;;  %4099 = vmatpush.bf16.msrb.mxu0 %v5942_v63  ;;  %v5966_v63 = vld [vmem:[%s7675_s3 + $0x6b8] sm:$0xff] }
 0xe4f   :  { %4073 = vmatpush.bf16.msra.mxu2 %v5926_v4  ;;  %4086 = vmatpush.bf16.msra.mxu3 %v5934_v5  ;;  %v5972_v4 = vld [vmem:[%s7675_s3 + $0x6e8] sm:$0xff]  ;;  %v2809_v5 = vperm.slane %v7421_v13, 4 }
 0xe52   :  { %4061 = vmatpush.bf16.msra.mxu1 %v5917_v11  ;;  %4100 = vmatpush.bf16.msrb.mxu0 %v5941_v7  ;;  %v2812_v7 = vperm.slane %v7421_v13, 7 }
 0xe53   :  { %4074 = vmatpush.bf16.msra.mxu2 %v5925_v8  ;;  %4087 = vmatpush.bf16.msra.mxu3 %v5933_v9  ;;  %v5957_v8 = vld [vmem:[%s7675_s3 + $0x670] sm:$0xff] }
 0xe56   :  { %4062 = vmatpush.bf16.msra.mxu1 %v5916_v10  ;;  %4101 = vmatpush.bf16.msrb.mxu0 %v5940_v6  ;;  %v5965_v10 = vld [vmem:[%s7675_s3 + $0x6b0] sm:$0xff] }
 0xe57   :  { %4075 = vmatpush.bf16.msra.mxu2 %v5924_v12  ;;  %4088 = vmatpush.bf16.msra.mxu3 %v5932_v14  ;;  %v5947_v12 = vld [vmem:[%s7675_s3 + $0x620] sm:$0xff] }
 0xe5a   :  { %4063 = vmatpush.bf16.msra.mxu1 %v5915_v15  ;;  %4102 = vmatpush.bf16.msrb.mxu0 %v5939_v16  ;;  %v5971_v16 = vld [vmem:[%s7675_s3 + $0x6e0] sm:$0xff] }
 0xe5b   :  { %4076 = vmatpush.bf16.msra.mxu2 %v5923_v18  ;;  %4089 = vmatpush.bf16.msra.mxu3 %v5931_v19  ;;  %v5956_v19 = vld [vmem:[%s7675_s3 + $0x668] sm:$0xff] }
 0xe5e   :  { %4064 = vmatpush.bf16.msra.mxu1 %v5914_v17  ;;  %4103 = vmatpush.bf16.msrb.mxu0 %v5938_v20  ;;  %v5964_v20 = vld [vmem:[%s7675_s3 + $0x6a8] sm:$0xff] }
 0xe5f   :  { %4077 = vmatpush.bf16.msra.mxu2 %v5922_v23  ;;  %4090 = vmatpush.bf16.msra.mxu3 %v5930_v24  ;;  %v2811_v23 = vperm.slane %v7421_v13, 6  ;;  %v5946_v24 = vld [vmem:[%s7675_s3 + $0x618] sm:$0xff] }
 0xe62   :  { %4065 = vmatpush.bf16.msra.mxu1 %v5913_v21  ;;  %4104 = vmatpush.bf16.msrb.mxu0 %v5937_v22  ;;  %v2810_v21 = vperm.slane %v7421_v13, 5  ;;  %v5945_v13 = vld [vmem:[%s7675_s3 + $0x610] sm:$0xff] }
 0xe63   :  { %4078 = vmatpush.bf16.msra.mxu2 %v5921_v27  ;;  %4091 = vmatpush.bf16.msra.mxu3 %v5929_v28  ;;  %v5955_v27 = vld [vmem:[%s7675_s3 + $0x660] sm:$0xff] }
 0xe66   :  { %4066 = vmatpush.bf16.msra.mxu1 %v5912_v25  ;;  %4105 = vmatpush.bf16.msrb.mxu0 %v5936_v26  ;;  %v5970_v26 = vld [vmem:[%s7675_s3 + $0x6d8] sm:$0xff] }
 0xe67   :  { %4079 = vmatpush.bf16.msra.mxu2 %v5920_v30  ;;  %4092 = vmatpush.bf16.msra.mxu3 %v5928_v31  ;;  %v4986_v30 = vld [vmem:[%s7676_s4 + $0x140] ss:$8 sm:$0xf0] }
 0xe6a   :  { %4067 = vmatpush.bf16.msra.mxu1 %v5911_v29  ;;  %4106 = vmatpush.bf16.msrb.mxu0 %v5935_v2  ;;  %v4985_v2 = vld [vmem:[%s7676_s4 + $0x140] ss:$8 sm:$0xf] }
 0xe6b   :  { %4080 = vmatpush.bf16.msra.mxu2 %v5919_v32  ;;  %4093 = vmatpush.bf16.msra.mxu3 %v5927_v33  ;;  %v5963_v33 = vld [vmem:[%s7675_s3 + $0x6a0] sm:$0xff] }
 0xe89   :  { %v3009_v38 = vpop.f32.mrf.mxu1 }
 0xe8a   :  { %v3010_v39 = vadd.f32 %v3009_v38, %v2805_v36  ;;  %v3048_v40 = vpop.f32.mrf.mxu0  ;;  %v5969_v38 = vld [vmem:[%s7675_s3 + $0x6d0] sm:$0xff] }
 0xe8b   :  { %v3049_v41 = vadd.f32 %v3048_v40, %v2808_v37 }
 0xe8c   :  { %v3208_v43 = vmax.f32 %v3010_v39, 0.0  ;;  %v7497_v39 = vor.u32 %v4986_v30, %v4985_v2  ;;  %v6003_v30 = vld [vmem:[%s7675_s3 + $0x7e0] sm:$0xff] }
 0xe8d   :  { %v3211_v45 = vmax.f32 %v3049_v41, 0.0  ;;  %v5954_v41 = vld [vmem:[%s7675_s3 + $0x658] sm:$0xff] }
 0xe8e   :  { %v3224_v42 = vpack.c.bf16 %v3208_v43, %v3208_v43 }
 0xe8f   :  { %v3227_v49 = vpack.c.bf16 %v3211_v45, %v3211_v45  ;;  %v3022_v50 = vpop.f32.mrf.mxu2 }
 0xe90   :  { %v3023_v51 = vadd.f32 %v3022_v50, %v2806_v44  ;;  %v3035_v54 = vpop.f32.mrf.mxu3  ;;  %4016 = vmatmul.bf16.vlgmr.msrb.gmra.mxu1 %v3224_v42  ;;  %v5962_v44 = vld [vmem:[%s7675_s3 + $0x698] sm:$0xff]  ;;  %v2813_v42 = vperm.slane %v7497_v39, 0  ;;  %v5953_v50 = vld [vmem:[%s7675_s3 + $0x650] sm:$0xff] }
 0xe91   :  { %v3036_v55 = vadd.f32 %v3035_v54, %v2807_v53  ;;  %4055 = vmatmul.bf16.vlgmr.msra.gmra.mxu0 %v3227_v49  ;;  %4112 = vmatpush.bf16.msrb.mxu1 %v5950_v46  ;;  %v3011_v52 = vpop.f32.mrf.mxu1  ;;  %v5944_v53 = vld [vmem:[%s7675_s3 + $0x608] sm:$0xff]  ;;  %v2816_v49 = vperm.slane %v7497_v39, 3  ;;  %v5961_v54 = vld [vmem:[%s7675_s3 + $0x690] sm:$0xff] }
 0xe92   :  { %v3209_v57 = vmax.f32 %v3023_v51, 0.0  ;;  %4151 = vmatpush.bf16.msra.mxu0 %v5974_v47  ;;  %v3050_v58 = vpop.f32.mrf.mxu0  ;;  %v5968_v46 = vld [vmem:[%s7675_s3 + $0x6c8] sm:$0xff]  ;;  %v5943_v52 = vld [vmem:[%s7675_s3 + $0x600] sm:$0xff] }
 0xe93   :  { %v3210_v60 = vmax.f32 %v3036_v55, 0.0  ;;  %v5967_v58 = vld [vmem:[%s7675_s3 + $0x6c0] sm:$0xff] }
 0xe94   :  { %v3225_v62 = vpack.c.bf16 %v3209_v57, %v3209_v57 }
 0xe95   :  { %v3226_v0 = vpack.c.bf16 %v3210_v60, %v3210_v60  ;;  %4113 = vmatpush.bf16.msrb.mxu1 %v5949_v56 }
 0xe96   :  { %4152 = vmatpush.bf16.msra.mxu0 %v5973_v59  ;;  %4029 = vmatmul.bf16.vlgmr.msrb.gmra.mxu2 %v3225_v62  ;;  %v5982_v59 = vld [vmem:[%s7675_s3 + $0x738] sm:$0xff]  ;;  %v5952_v62 = vld [vmem:[%s7675_s3 + $0x648] sm:$0xff] }
 0xe97   :  { %4042 = vmatmul.bf16.vlgmr.msrb.gmra.mxu3 %v3226_v0  ;;  %4125 = vmatpush.bf16.msrb.mxu2 %v5958_v61  ;;  %v3024_v11 = vpop.f32.mrf.mxu2  ;;  %v6006_v61 = vld [vmem:[%s7675_s3 + $0x7f8] sm:$0xff]  ;;  %v5960_v0 = vld [vmem:[%s7675_s3 + $0x688] sm:$0xff] }
 0xe98   :  { %4138 = vmatpush.bf16.msrb.mxu3 %v5966_v63  ;;  %v3037_v9 = vpop.f32.mrf.mxu3 }
 0xe99   :  { %4114 = vmatpush.bf16.msrb.mxu1 %v5948_v1  ;;  %v3061_v6 = vpop.f32.mrf.mxu1  ;;  %v2814_v1 = vperm.slane %v7497_v39, 1 }
 0xe9a   :  { %4153 = vmatpush.bf16.msra.mxu0 %v5972_v4  ;;  %v3062_v14 = vadd.f32 %v3061_v6, %v2809_v5  ;;  %v3100_v15 = vpop.f32.mrf.mxu0  ;;  %v2815_v5 = vperm.slane %v7497_v39, 2  ;;  %v5951_v6 = vld [vmem:[%s7675_s3 + $0x640] sm:$0xff] }
 0xe9b   :  { %v3101_v18 = vadd.f32 %v3100_v15, %v2812_v7  ;;  %4126 = vmatpush.bf16.msrb.mxu2 %v5957_v8  ;;  %v5981_v7 = vld [vmem:[%s7675_s3 + $0x730] sm:$0xff]  ;;  %v5959_v15 = vld [vmem:[%s7675_s3 + $0x680] sm:$0xff] }
 0xe9c   :  { %v3212_v17 = vmax.f32 %v3062_v14, 0.0  ;;  %4139 = vmatpush.bf16.msrb.mxu3 %v5965_v10  ;;  %v6005_v10 = vld [vmem:[%s7675_s3 + $0x7f0] sm:$0xff] }
 0xe9d   :  { %v3215_v22 = vmax.f32 %v3101_v18, 0.0  ;;  %4115 = vmatpush.bf16.msrb.mxu1 %v5947_v12 }
 0xe9e   :  { %v3228_v25 = vpack.c.bf16 %v3212_v17, %v3212_v17  ;;  %4154 = vmatpush.bf16.msra.mxu0 %v5971_v16  ;;  %v5990_v16 = vld [vmem:[%s7675_s3 + $0x778] sm:$0xff] }
 0xe9f   :  { %v3231_v28 = vpack.c.bf16 %v3215_v22, %v3215_v22  ;;  %4127 = vmatpush.bf16.msrb.mxu2 %v5956_v19  ;;  %v3074_v29 = vpop.f32.mrf.mxu2  ;;  %v5998_v17 = vld [vmem:[%s7675_s3 + $0x7b8] sm:$0xff]  ;;  %v5980_v22 = vld [vmem:[%s7675_s3 + $0x728] sm:$0xff] }
 0xea0   :  { %4140 = vmatpush.bf16.msrb.mxu3 %v5964_v20  ;;  %v3075_v31 = vadd.f32 %v3074_v29, %v2810_v21  ;;  %v3087_v32 = vpop.f32.mrf.mxu3  ;;  %4068 = vmatmul.bf16.vlgmr.msra.gmra.mxu1 %v3228_v25  ;;  %v5979_v29 = vld [vmem:[%s7675_s3 + $0x720] sm:$0xff] }
 0xea1   :  { %v3088_v34 = vadd.f32 %v3087_v32, %v2811_v23  ;;  %4107 = vmatmul.bf16.vlgmr.msrb.gmra.mxu0 %v3231_v28  ;;  %4116 = vmatpush.bf16.msrb.mxu1 %v5946_v24  ;;  %v3063_v35 = vpop.f32.mrf.mxu1  ;;  %v6004_v24 = vld [vmem:[%s7675_s3 + $0x7e8] sm:$0xff]  ;;  %v5997_v28 = vld [vmem:[%s7675_s3 + $0x7b0] sm:$0xff] }
 0xea2   :  { %v3213_v36 = vmax.f32 %v3075_v31, 0.0  ;;  %4155 = vmatpush.bf16.msra.mxu0 %v5970_v26  ;;  %v3102_v37 = vpop.f32.mrf.mxu0  ;;  %v5989_v26 = vld [vmem:[%s7675_s3 + $0x770] sm:$0xff]  ;;  %v5988_v32 = vld [vmem:[%s7675_s3 + $0x768] sm:$0xff] }
 0xea3   :  { %v3214_v40 = vmax.f32 %v3088_v34, 0.0  ;;  %4128 = vmatpush.bf16.msrb.mxu2 %v5955_v27  ;;  %v5996_v34 = vld [vmem:[%s7675_s3 + $0x7a8] sm:$0xff]  ;;  %v5987_v37 = vld [vmem:[%s7675_s3 + $0x760] sm:$0xff] }
 0xea4   :  { %v3229_v43 = vpack.c.bf16 %v3213_v36, %v3213_v36  ;;  %4141 = vmatpush.bf16.msrb.mxu3 %v5963_v33  ;;  %v6002_v36 = vld [vmem:[%s7675_s3 + $0x7d8] sm:$0xff] }
 0xea5   :  { %v3230_v45 = vpack.c.bf16 %v3214_v40, %v3214_v40  ;;  %4117 = vmatpush.bf16.msrb.mxu1 %v5945_v13  ;;  %v5978_v13 = vld [vmem:[%s7675_s3 + $0x718] sm:$0xff]  ;;  %v5977_v40 = vld [vmem:[%s7675_s3 + $0x710] sm:$0xff] }
 0xea6   :  { %4156 = vmatpush.bf16.msra.mxu0 %v5969_v38  ;;  %4081 = vmatmul.bf16.vlgmr.msra.gmra.mxu2 %v3229_v43  ;;  %v5995_v38 = vld [vmem:[%s7675_s3 + $0x7a0] sm:$0xff] }
 0xea7   :  { %4094 = vmatmul.bf16.vlgmr.msra.gmra.mxu3 %v3230_v45  ;;  %4129 = vmatpush.bf16.msrb.mxu2 %v5954_v41  ;;  %v3076_v47 = vpop.f32.mrf.mxu2  ;;  %v2817_v41 = vperm.slane %v7497_v39, 4  ;;  %v2820_v45 = vperm.slane %v7497_v39, 7 }
 0xea8   :  { %4142 = vmatpush.bf16.msrb.mxu3 %v5962_v44  ;;  %v3089_v51 = vpop.f32.mrf.mxu3  ;;  %v6001_v44 = vld [vmem:[%s7675_s3 + $0x7d0] sm:$0xff]  ;;  %v5994_v47 = vld [vmem:[%s7675_s3 + $0x798] sm:$0xff] }
 0xea9   :  { %4118 = vmatpush.bf16.msrb.mxu1 %v5944_v53  ;;  %v3113_v55 = vpop.f32.mrf.mxu1 }
 0xeaa   :  { %4157 = vmatpush.bf16.msra.mxu0 %v5968_v46  ;;  %v3114_v56 = vadd.f32 %v3113_v55, %v2813_v42  ;;  %v3152_v57 = vpop.f32.mrf.mxu0  ;;  %v5986_v46 = vld [vmem:[%s7675_s3 + $0x758] sm:$0xff] }
 0xeab   :  { %v3153_v60 = vadd.f32 %v3152_v57, %v2816_v49  ;;  %4130 = vmatpush.bf16.msrb.mxu2 %v5953_v50  ;;  %v5976_v50 = vld [vmem:[%s7675_s3 + $0x708] sm:$0xff]  ;;  %v5993_v57 = vld [vmem:[%s7675_s3 + $0x790] sm:$0xff] }
 0xeac   :  { %v3216_v63 = vmax.f32 %v3114_v56, 0.0  ;;  %4143 = vmatpush.bf16.msrb.mxu3 %v5961_v54  ;;  %v6000_v54 = vld [vmem:[%s7675_s3 + $0x7c8] sm:$0xff]  ;;  %v2818_v56 = vperm.slane %v7497_v39, 5 }
 0xead   :  { %v3219_v4 = vmax.f32 %v3153_v60, 0.0  ;;  %4119 = vmatpush.bf16.msrb.mxu1 %v5943_v52  ;;  %v5985_v52 = vld [vmem:[%s7675_s3 + $0x750] sm:$0xff] }
 0xeae   :  { %v3232_v11 = vpack.c.bf16 %v3216_v63, %v3216_v63  ;;  %4158 = vmatpush.bf16.msra.mxu0 %v5967_v58  ;;  %v2819_v58 = vperm.slane %v7497_v39, 6 }
 0xeaf   :  { %v3235_v8 = vpack.c.bf16 %v3219_v4, %v3219_v4  ;;  %4131 = vmatpush.bf16.msrb.mxu2 %v5952_v62  ;;  %v3126_v9 = vpop.f32.mrf.mxu2  ;;  %v5999_v62 = vld [vmem:[%s7675_s3 + $0x7c0] sm:$0xff]  ;;  %v5992_v4 = vld [vmem:[%s7675_s3 + $0x788] sm:$0xff] }
 0xeb0   :  { %4144 = vmatpush.bf16.msrb.mxu3 %v5960_v0  ;;  %v3127_v12 = vadd.f32 %v3126_v9, %v2814_v1  ;;  %v3139_v14 = vpop.f32.mrf.mxu3  ;;  %4120 = vmatmul.bf16.vlgmr.msrb.gmra.mxu1 %v3232_v11  ;;  %v5984_v1 = vld [vmem:[%s7675_s3 + $0x748] sm:$0xff] }
 0xeb1   :  { %4164 = vmatpush.bf16.msra.mxu1 %v5982_v59  ;;  %v3140_v18 = vadd.f32 %v3139_v14, %v2815_v5  ;;  %4159 = vmatmul.bf16.vlgmr.msra.gmra.mxu0 %v3235_v8  ;;  %v3115_v19 = vpop.f32.mrf.mxu1  ;;  %v5975_v59 = vld [vmem:[%s7675_s3 + $0x700] sm:$0xff] }
 0xeb2   :  { %4203 = vmatpush.bf16.msrb.mxu0 %v6006_v61  ;;  %v3217_v20 = vmax.f32 %v3127_v12, 0.0  ;;  %v3154_v21 = vpop.f32.mrf.mxu0  ;;  %v5983_v8 = vld [vmem:[%s7675_s3 + $0x740] sm:$0xff] }
 0xeb3   :  { %v3218_v23 = vmax.f32 %v3140_v18, 0.0  ;;  %4132 = vmatpush.bf16.msrb.mxu2 %v5951_v6 }
 0xeb4   :  { %v3233_v25 = vpack.c.bf16 %v3217_v20, %v3217_v20  ;;  %4145 = vmatpush.bf16.msrb.mxu3 %v5959_v15 }
 0xeb5   :  { %4165 = vmatpush.bf16.msra.mxu1 %v5981_v7  ;;  %v3234_v27 = vpack.c.bf16 %v3218_v23, %v3218_v23 }
 0xeb6   :  { %4204 = vmatpush.bf16.msrb.mxu0 %v6005_v10  ;;  %4133 = vmatmul.bf16.vlgmr.msrb.gmra.mxu2 %v3233_v25  ;;  %v5991_v10 = vld [vmem:[%s7675_s3 + $0x780] sm:$0xff] }
 0xeb7   :  { %4177 = vmatpush.bf16.msra.mxu2 %v5990_v16  ;;  %4146 = vmatmul.bf16.vlgmr.msrb.gmra.mxu3 %v3234_v27  ;;  %v3128_v2 = vpop.f32.mrf.mxu2 }
 0xeb8   :  { %4190 = vmatpush.bf16.msra.mxu3 %v5998_v17  ;;  %v3141_v31 = vpop.f32.mrf.mxu3 }
 0xeb9   :  { %4166 = vmatpush.bf16.msra.mxu1 %v5980_v22  ;;  %v3165_v33 = vpop.f32.mrf.mxu1 }
 0xeba   :  { %4205 = vmatpush.bf16.msrb.mxu0 %v6004_v24  ;;  %v3204_v35 = vpop.f32.mrf.mxu0  ;;  %v3166_v51 = vadd.f32 %v3165_v33, %v2817_v41 }
 0xebb   :  { %4178 = vmatpush.bf16.msra.mxu2 %v5989_v26  ;;  %v3205_v55 = vadd.f32 %v3204_v35, %v2820_v45 }
 0xebc   :  { %4191 = vmatpush.bf16.msra.mxu3 %v5997_v28  ;;  %v3220_v60 = vmax.f32 %v3166_v51, 0.0  ;;  %v2461_v28 = vld [vmem:[%s7676_s4 + $0x101] ss:$0 sm:$0xff] }
 0xebd   :  { %4167 = vmatpush.bf16.msra.mxu1 %v5979_v29  ;;  %v3223_v63 = vmax.f32 %v3205_v55, 0.0 }
 0xebe   :  { %4206 = vmatpush.bf16.msrb.mxu0 %v6003_v30  ;;  %v3236_v11 = vpack.c.bf16 %v3220_v60, %v3220_v60 }
 0xebf   :  { %4179 = vmatpush.bf16.msra.mxu2 %v5988_v32  ;;  %v3178_v43 = vpop.f32.mrf.mxu2  ;;  %v3239_v7 = vpack.c.bf16 %v3223_v63, %v3223_v63 }
 0xec0   :  { %4192 = vmatpush.bf16.msra.mxu3 %v5996_v34  ;;  %v3191_v53 = vpop.f32.mrf.mxu3  ;;  %v3179_v39 = vadd.f32 %v3178_v43, %v2818_v56 }
 0xec1   :  { %4168 = vmatpush.bf16.msra.mxu1 %v5978_v13  ;;  %v3167_v42 = vpop.f32.mrf.mxu1  ;;  %v3192_v5 = vadd.f32 %v3191_v53, %v2819_v58 }
 0xec2   :  { %4207 = vmatpush.bf16.msrb.mxu0 %v6002_v36  ;;  %v3206_v49 = vpop.f32.mrf.mxu0  ;;  %v3221_v9 = vmax.f32 %v3179_v39, 0.0 }
 0xec3   :  { %4180 = vmatpush.bf16.msra.mxu2 %v5987_v37  ;;  %v3222_v6 = vmax.f32 %v3192_v5, 0.0 }
 0xec4   :  { %4193 = vmatpush.bf16.msra.mxu3 %v5995_v38  ;;  %v3237_v12 = vpack.c.bf16 %v3221_v9, %v3221_v9 }
 0xec5   :  { %4169 = vmatpush.bf16.msra.mxu1 %v5977_v40  ;;  %v3238_v14 = vpack.c.bf16 %v3222_v6, %v3222_v6  ;;  %v6007_v6 = vld [vmem:[%s7674_s2 + $0x120] sm:$0xf0] }
 0xec6   :  { %4208 = vmatpush.bf16.msrb.mxu0 %v6001_v44 }
 0xec7   :  { %4181 = vmatpush.bf16.msra.mxu2 %v5986_v46  ;;  %v3180_v61 = vpop.f32.mrf.mxu2 }
 0xec8   :  { %4194 = vmatpush.bf16.msra.mxu3 %v5994_v47  ;;  %v3193_v0 = vpop.f32.mrf.mxu3 }
 0xec9   :  { %4170 = vmatpush.bf16.msra.mxu1 %v5976_v50 }
 0xeca   :  { %4209 = vmatpush.bf16.msrb.mxu0 %v6000_v54 }
 0xecb   :  { %4182 = vmatpush.bf16.msra.mxu2 %v5985_v52 }
 0xecc   :  { %4195 = vmatpush.bf16.msra.mxu3 %v5993_v57 }
 0xecd   :  { %4171 = vmatpush.bf16.msra.mxu1 %v5975_v59 }
 0xece   :  { %4210 = vmatpush.bf16.msrb.mxu0 %v5999_v62 }
 0xecf   :  { %4183 = vmatpush.bf16.msra.mxu2 %v5984_v1 }
 0xed0   :  { %4196 = vmatpush.bf16.msra.mxu3 %v5992_v4  ;;  %4172 = vmatmul.bf16.vlgmr.msra.gmra.mxu1 %v3236_v11 }
 0xed1   :  { %4211 = vmatmul.bf16.vlgmr.msrb.gmra.mxu0 %v3239_v7 }
 0xed3   :  { %4184 = vmatpush.bf16.msra.mxu2 %v5983_v8  ;;  %v5675_v8 = vld [vmem:[%s7674_s2 + $0x1b8] sm:$0xf] }
 0xed4   :  { %4197 = vmatpush.bf16.msra.mxu3 %v5991_v10  ;;  %v5671_v10 = vld [vmem:[%s7674_s2 + $0x90] sm:$0xf] }
 0xed6   :  { %4185 = vmatmul.bf16.vlgmr.msra.gmra.mxu2 %v3237_v12  ;;  %v5672_v12 = vor.u32 %v6007_v6, %v5671_v10 }
 0xed7   :  { %4198 = vmatmul.bf16.vlgmr.msra.gmra.mxu3 %v3238_v14 }
 0xf0d   :  { %v4017_v15 = vpop.f32.mrf.mxu1 }
 0xf0e   :  { %v4056_v16 = vpop.f32.mrf.mxu0  ;;  %v4018_v2 = vadd.f32 %v4017_v15, %v2461_v28 }
 0xf15   :  { %v4019_v18 = vpop.f32.mrf.mxu1 }
 0xf16   :  { %v4058_v19 = vpop.f32.mrf.mxu0 }
 0xf19   :  { %v4030_v17 = vpop.f32.mrf.mxu2 }
 0xf1a   :  { %v4043_v20 = vpop.f32.mrf.mxu3  ;;  %v4031_v32 = vadd.f32 %v4030_v17, %v4018_v2 }
 0xf1c   :  { %v4044_v35 = vadd.f32 %v4043_v20, %v4031_v32 }
 0xf1d   :  { %v4069_v21 = vpop.f32.mrf.mxu1 }
 0xf1e   :  { %v4108_v22 = vpop.f32.mrf.mxu0  ;;  %v4057_v37 = vadd.f32 %v4056_v16, %v4044_v35 }
 0xf20   :  { %v4070_v41 = vadd.f32 %v4069_v21, %v4057_v37 }
 0xf21   :  { %v4032_v23 = vpop.f32.mrf.mxu2 }
 0xf22   :  { %v4045_v24 = vpop.f32.mrf.mxu3  ;;  %v2451_v23 = vld [vmem:[%s7676_s4 + $0x86] ss:$0 sm:$0xff] }
 0xf25   :  { %v4071_v25 = vpop.f32.mrf.mxu1 }
 0xf26   :  { %v4110_v26 = vpop.f32.mrf.mxu0 }
 0xf29   :  { %v4082_v27 = vpop.f32.mrf.mxu2 }
 0xf2a   :  { %v4095_v29 = vpop.f32.mrf.mxu3  ;;  %v4083_v43 = vadd.f32 %v4082_v27, %v4070_v41 }
 0xf2c   :  { %v4096_v44 = vadd.f32 %v4095_v29, %v4083_v43  ;;  %v4245_v29 = vld [vmem:[%s7676_s4 + $0x1] ss:$0 sm:$0xff] }
 0xf2d   :  { %v4121_v30 = vpop.f32.mrf.mxu1 }
 0xf2e   :  { %v4160_v31 = vpop.f32.mrf.mxu0  ;;  %v4109_v46 = vadd.f32 %v4108_v22, %v4096_v44 }
 0xf30   :  { %v4122_v42 = vadd.f32 %v4121_v30, %v4109_v46 }
 0xf31   :  { %v4084_v33 = vpop.f32.mrf.mxu2 }
 0xf32   :  { %v4097_v34 = vpop.f32.mrf.mxu3 }
 0xf35   :  { %v4123_v13 = vpop.f32.mrf.mxu1 }
 0xf36   :  { %v4162_v36 = vpop.f32.mrf.mxu0 }
 0xf39   :  { %v4134_v38 = vpop.f32.mrf.mxu2 }
 0xf3a   :  { %v4147_v40 = vpop.f32.mrf.mxu3  ;;  %v4135_v49 = vadd.f32 %v4134_v38, %v4122_v42 }
 0xf3c   :  { %v4148_v51 = vadd.f32 %v4147_v40, %v4135_v49 }
 0xf3e   :  { %v4161_v55 = vadd.f32 %v4160_v31, %v4148_v51 }
 0xf41   :  { %v4136_v45 = vpop.f32.mrf.mxu2 }
 0xf42   :  { %v4149_v53 = vpop.f32.mrf.mxu3 }
 0xf4d   :  { %v4173_v47 = vpop.f32.mrf.mxu1 }
 0xf4e   :  { %v4212_v50 = vpop.f32.mrf.mxu0  ;;  %v4174_v56 = vadd.f32 %v4173_v47, %v4161_v55 }
 0xf55   :  { %v4175_v54 = vpop.f32.mrf.mxu1 }
 0xf56   :  { %v4214_v52 = vpop.f32.mrf.mxu0 }
 0xf59   :  { %v4186_v57 = vpop.f32.mrf.mxu2 }
 0xf5a   :  { %v4187_v58 = vadd.f32 %v4186_v57, %v4174_v56  ;;  %v4199_v59 = vpop.f32.mrf.mxu3 }
 0xf5c   :  { %v4200_v60 = vadd.f32 %v4199_v59, %v4187_v58 }
 0xf5e   :  { %v4213_v61 = vadd.f32 %v4212_v50, %v4200_v60 }
 0xf60   :  { %v4216_v62 = vadd.f32 %v4213_v61, %v7104_v48  ;;  %v6008_v48 = vld [vmem:[%s7674_s2 + $0x248] sm:$0xf0] }
 0xf61   :  { %v4188_v63 = vpop.f32.mrf.mxu2  ;;  %v5676_v9 = vor.u32 %v6008_v48, %v5675_v8 }
 0xf62   :  { %v4201_v0 = vpop.f32.mrf.mxu3  ;;  %v4217_v1 = vsel %vm374_vm1, %v4216_v62, 0.0 }
 0xf63   :  { %4218 = vadd.xlane.f32.xlu0 %v4217_v1  ;;  %4268 = vmatpush.bf16.msrb.mxu1 %v5676_v9 }
 0xf67   :  { %4269 = vmatpush.bf16.msrb.mxu1 %v5672_v12 }
 0xfd6   :  { %v4219_v39 = vpop.xlane.xlu0 %4218 }
 0xfd7   :  { %v4220_v4 = vmul.f32 %v4219_v39, %v6224_v3 }
 0xfd9   :  { %v4221_v5 = vsub.f32 %v4216_v62, %v4220_v4 }
 0xfdb   :  { %v4222_v11 = vmul.f32 %v4221_v5, %v4221_v5 }
 0xfdd   :  { %v4223_v7 = vsel %vm374_vm1, %v4222_v11, 0.0 }
 0xfde   :  { %4224 = vadd.xlane.f32.xlu0 %v4223_v7 }
0x1051   :  { %v4225_v14 = vpop.xlane.xlu0 %4224 }
0x1052   :  { %v4226_v15 = vmul.f32 %v4225_v14, %v6224_v3  ;;  %v2452_v3 = vld [vmem:[%s7676_s4 + $0x87] ss:$0 sm:$0xff] }
0x1054   :  { %v4227_v16 = vadd.f32 1e-05, %v4226_v15 }
0x1056   :  { %6059 = vrsqrt.f32 %v4227_v16  ;;  %vm4234_vm0 = vweird.f32 %v4227_v16 }
0x105c   :  { %v6060_v18 = vpop.eup %6059 }
0x105d   :  { %v4229_v19 = vmul.f32 %v6060_v18, %v4227_v16  ;;  %vm4235_vm15 = vweird.f32 %v6060_v18 }
0x105e   :  { %vm4236_vm2 = vmor %vm4234_vm0, %vm4235_vm15 }
0x105f   :  { %v4230_v17 = vmul.f32 %v6060_v18, %v4229_v19 }
0x1061   :  { %v4231_v20 = vmul.f32 0.5, %v4230_v17 }
0x1063   :  { %v4232_v21 = vsub.f32 1.5, %v4231_v20 }
0x1065   :  { %v4233_v22 = vmul.f32 %v6060_v18, %v4232_v21 }
0x1067   :  { %v4237_v24 = vsel %vm4236_vm2, %v6060_v18, %v4233_v22 }
0x1068   :  { %v4238_v25 = vmul.f32 %v4237_v24, %v4221_v5 }
0x106a   :  { %v4239_v26 = vmul.f32 %v4238_v25, %v2451_v23 }
0x106c   :  { %v4240_v27 = vadd.f32 %v4239_v26, %v2452_v3 }
0x106e   :  { %v4246_v28 = vpack.c.bf16 %v4240_v27, %v4240_v27 }
0x1070   :  { %5677 = vmatmul.msk.bf16.vlgmr.msrb.gmra.mxu1 %vm374_vm1, %v4246_v28 }
0x10ed   :  { %v4271_v2 = vpop.f32.mrf.mxu1 }
0x10ee   :  { %v4272_v30 = vadd.f32 %v4271_v2, %v4245_v29 }
0x10f0   :  { %4275 = vst [vmem:[#allocation2] sm:$0xff] %v4272_v30 }
0x10f1   :  { %4286 = dma.vmem_to_hbm [thread:$0]  %s4282_s26, 128, %s4284_s28, [#allocation3]  }
0x10f5   :  { %v4273_v31 = vpop.f32.mrf.mxu1 }
0x10f6   :  { %6085 = dma.done.wait [#allocation3], 128  }
0x10f7   :  { %6086 = vsyncadd [#allocation3], 4294967168 }
0x10f8   :  { %4291 = vsyncpa [#allocation3], 1 }

</bundles_post_ra>
